<compile_context>
chip_gen: v7x
topology: tpu7x:2x2x1
jax: 0.10.0
libtpu: 0.0.40
codegen_flags: <defaults>
</compile_context>

<pallas_src>
import functools

import jax
import jax.numpy as jnp
from jax import lax
from jax.experimental import pallas as pl
from jax.experimental.pallas import tpu as pltpu


# ------------------------------ Pallas kernel ------------------------------

def _conv_kernel(*refs, K, Cin, Co, OH, OW, relu_cols, has_skip):
    """One (batch, output-depth-plane, kd) step of a 3-D conv.

    x_ref : (1, 1, Hp, Wp, Cin)  bf16  padded input depth-plane (d*stride+kd)
    w_ref : (1, K, K, Cin, Co)   bf16  weight slab for this kd
    b_ref : (1, 1, Co)           f32   bias
    s_ref : (1, 1, OH, OW, Co)   f32   optional fused residual
    o_ref : (1, 1, OH, OW, Co)   f32   output plane (written at kd == K-1)
    acc   : (OH, OW, Co)         f32   VMEM accumulator
    """
    if has_skip:
        x_ref, w_ref, b_ref, s_ref, o_ref, acc_ref = refs
    else:
        x_ref, w_ref, b_ref, o_ref, acc_ref = refs

    kd = pl.program_id(2)

    @pl.when(kd == 0)
    def _init():
        if has_skip:
            acc_ref[...] = s_ref[0, 0] + b_ref[...]          # bias broadcasts
        else:
            acc_ref[...] = jnp.broadcast_to(b_ref[...], (OH, OW, Co))

    # K*K shifted patches of the resident depth-plane; batched (over H) bf16
    # matmuls on the MXU with f32 accumulation.
    contrib = jnp.zeros((OH, OW, Co), jnp.float32)
    for kh in range(K):
        for kw in range(K):
            patch = x_ref[0, 0, kh:kh + OH, kw:kw + OW, :]        # (OH,OW,Cin)
            wk = jnp.broadcast_to(w_ref[0, kh, kw], (OH, Cin, Co))
            contrib = contrib + jnp.einsum(
                "hwc,hco->hwo", patch, wk,
                preferred_element_type=jnp.float32)
    acc_ref[...] += contrib

    @pl.when(kd == K - 1)
    def _finalize():
        out = acc_ref[...]
        if relu_cols >= Co:                    # full ReLU
            out = jnp.maximum(out, 0.0)
        elif relu_cols > 0:                    # fused conv1+skep: ReLU on half
            ch = lax.broadcasted_iota(jnp.int32, (OH, OW, Co), 2)
            out = jnp.where(ch < relu_cols, jnp.maximum(out, 0.0), out)
        o_ref[0, 0] = out.astype(o_ref.dtype)


# ------------------------------ conv wrapper -------------------------------

def conv3d_pallas(x, w, b, *, stride=1, relu_cols=0, skip=None):
    """3-D conv (padding = K//2) in NDHWC via a depth-plane Pallas kernel.

    x: [N, D, H, W, Cin] f32, w: [K, K, K, Cin, Co] f32, b: [Co] f32
    skip: optional [N, D, H, W, Co] residual fused into the output (stride 1).
    relu_cols: apply ReLU to the first `relu_cols` output channels.
    """
    N, D, H, W, Cin = x.shape
    K, Co = w.shape[0], w.shape[-1]
    # TODO(synk): even ksize would need asymmetric padding to match Conv3d.
    assert K % 2 == 1, "only odd kernel sizes supported"
    pad = K // 2
    Dp, Hp, Wp = D + 2 * pad, H + 2 * pad, W + 2 * pad
    OH, OW = Hp - K + 1, Wp - K + 1              # dense (stride-1) H/W output
    Do = (D + 2 * pad - K) // stride + 1         # strided depth output

    xp = jnp.pad(x.astype(jnp.bfloat16),
                 ((0, 0), (pad, pad), (pad, pad), (pad, pad), (0, 0)))
    wb = w.astype(jnp.bfloat16)
    bias = b.reshape(1, 1, Co).astype(jnp.float32)

    in_specs = [
        pl.BlockSpec((1, 1, Hp, Wp, Cin),
                     lambda n, d, kd: (n, d * stride + kd, 0, 0, 0)),
        pl.BlockSpec((1, K, K, Cin, Co), lambda n, d, kd: (kd, 0, 0, 0, 0)),
        pl.BlockSpec((1, 1, Co), lambda n, d, kd: (0, 0, 0)),
    ]
    args = [xp, wb, bias]
    has_skip = skip is not None
    if has_skip:
        assert stride == 1 and skip.shape == (N, Do, OH, OW, Co)
        in_specs.append(pl.BlockSpec((1, 1, OH, OW, Co),
                                     lambda n, d, kd: (n, d, 0, 0, 0)))
        args.append(skip.astype(jnp.float32))

    kernel = functools.partial(_conv_kernel, K=K, Cin=Cin, Co=Co,
                               OH=OH, OW=OW, relu_cols=relu_cols,
                               has_skip=has_skip)

    flops = 2 * N * Do * OH * OW * K * K * K * Cin * Co
    bytes_accessed = (N * Do * K * Hp * Wp * Cin * 2        # activation reads
                      + K * K * K * Cin * Co * 2            # weights
                      + N * Do * OH * OW * Co * 4           # output
                      + (N * Do * OH * OW * Co * 4 if has_skip else 0))

    out = pl.pallas_call(
        kernel,
        out_shape=jax.ShapeDtypeStruct((N, Do, OH, OW, Co), jnp.float32),
        grid=(N, Do, K),
        in_specs=in_specs,
        out_specs=pl.BlockSpec((1, 1, OH, OW, Co),
                               lambda n, d, kd: (n, d, 0, 0, 0)),
        scratch_shapes=[pltpu.VMEM((OH, OW, Co), jnp.float32)],
        compiler_params=pltpu.CompilerParams(
            dimension_semantics=("parallel", "parallel", "arbitrary"),
            vmem_limit_bytes=32 * 1024 * 1024),
        cost_estimate=pl.CostEstimate(flops=flops, transcendentals=0,
                                      bytes_accessed=bytes_accessed),
    )(*args)

    if stride > 1:
        out = out[:, :, ::stride, ::stride, :]   # dense H/W -> strided H/W
    return out


# ----------------------------- parameter init ------------------------------

def _init_conv3d(key, ci, co, k):
    """Mimics PyTorch Conv3d default init (uniform +/- 1/sqrt(fan_in))."""
    kw_, kb_ = jax.random.split(key)
    fan_in = ci * k * k * k
    bound = 1.0 / (fan_in ** 0.5)
    w = jax.random.uniform(kw_, (k, k, k, ci, co), jnp.float32, -bound, bound)
    b = jax.random.uniform(kb_, (co,), jnp.float32, -bound, bound)
    return w, b


# ------------------------------- the module --------------------------------

class ResnetBlockPallas:
    """Pallas port of models/adapters.py::ResnetBlock (forward pass)."""

    def __init__(self, key, in_c, out_c, down, ksize=3, sk=False, use_conv=True):
        self.in_c, self.out_c = in_c, out_c
        self.down, self.sk, self.ksize = down, sk, ksize
        keys = jax.random.split(key, 5)

        if down:
            if not use_conv:
                # TODO(synk): AvgPool3d path of Downsample (use_conv=False).
                raise NotImplementedError("Downsample(use_conv=False)")
            # Downsample: Conv3d(in_c, in_c, 3, stride=2, padding=1)
            self.w_down, self.b_down = _init_conv3d(keys[0], in_c, in_c, 3)

        if in_c != out_c or sk is False:
            self.w_in, self.b_in = _init_conv3d(keys[1], in_c, out_c, ksize)
        else:
            self.w_in = None

        self.w1, self.b1 = _init_conv3d(keys[2], out_c, out_c, 3)
        self.w2, self.b2 = _init_conv3d(keys[3], out_c, out_c, ksize)

        if sk:
            self.w_sk, self.b_sk = _init_conv3d(keys[4], in_c, out_c, ksize)
        else:
            self.w_sk = None

    def __call__(self, x_ncdhw):
        # x: [N, C, D, H, W] (PyTorch NCDHW) -> channels-last for the kernels
        x = jnp.transpose(x_ncdhw, (0, 2, 3, 4, 1)).astype(jnp.float32)

        if self.down:
            x = conv3d_pallas(x, self.w_down, self.b_down, stride=2)
        if self.w_in is not None:
            x = conv3d_pallas(x, self.w_in, self.b_in)

        if self.w_sk is not None and self.w_sk.shape[:4] == self.w1.shape[:4]:
            # block1(+ReLU) and skep read the same x -> one fused conv with
            # Cout doubled; ReLU masked onto the first out_c channels.
            w_cat = jnp.concatenate([self.w1, self.w_sk], axis=-1)
            b_cat = jnp.concatenate([self.b1, self.b_sk], axis=-1)
            hs = conv3d_pallas(x, w_cat, b_cat, relu_cols=self.out_c)
            h, skip = hs[..., :self.out_c], hs[..., self.out_c:]
        else:
            h = conv3d_pallas(x, self.w1, self.b1, relu_cols=self.out_c)
            skip = (conv3d_pallas(x, self.w_sk, self.b_sk)
                    if self.w_sk is not None else x)

        out = conv3d_pallas(h, self.w2, self.b2, skip=skip)  # fused h + skip
        return jnp.transpose(out, (0, 4, 1, 2, 3))           # back to NCDHW


# --------------------------- pure-JAX reference -----------------------------
# Matches the kernel's numerics: bf16 operands on the conv, f32 accumulation.

def _ref_conv(x, w, b, stride=1):
    pad = w.shape[0] // 2
    y = lax.conv_general_dilated(
        x.astype(jnp.bfloat16), w.astype(jnp.bfloat16),
        (stride,) * 3, [(pad, pad)] * 3,
        dimension_numbers=("NDHWC", "DHWIO", "NDHWC"),
        preferred_element_type=jnp.float32)
    return y + b.astype(jnp.float32)


def ref_forward(blk, x_ncdhw):
    x = jnp.transpose(x_ncdhw, (0, 2, 3, 4, 1)).astype(jnp.float32)
    if blk.down:
        x = _ref_conv(x, blk.w_down, blk.b_down, stride=2)
    if blk.w_in is not None:
        x = _ref_conv(x, blk.w_in, blk.b_in)
    h = jnp.maximum(_ref_conv(x, blk.w1, blk.b1), 0.0)
    h = _ref_conv(h, blk.w2, blk.b2)
    skip = _ref_conv(x, blk.w_sk, blk.b_sk) if blk.w_sk is not None else x
    return jnp.transpose(h + skip, (0, 4, 1, 2, 3))


# ----------------------------------- main -----------------------------------

if __name__ == "__main__":
    key = jax.random.PRNGKey(0)
    k_x, k_p = jax.random.split(key)

    configs = [
        dict(in_c=4, out_c=8, down=False, sk=False),
        dict(in_c=4, out_c=8, down=True,  sk=False),
        dict(in_c=8, out_c=8, down=False, sk=True),   # exercises conv1+skep fusion
    ]
    for cfg in configs:
        x = jax.random.normal(k_x, (2, cfg["in_c"], 8, 8, 8), jnp.float32)
        blk = ResnetBlockPallas(k_p, cfg["in_c"], cfg["out_c"], cfg["down"],
                                ksize=3, sk=cfg["sk"], use_conv=True)
        out = jax.block_until_ready(jax.jit(lambda xx: blk(xx))(x))
        ref = jax.block_until_ready(ref_forward(blk, x))
        assert out.shape == ref.shape, (out.shape, ref.shape)
        err = float(jnp.max(jnp.abs(out - ref)))
        assert err < 2e-3, f"mismatch ({cfg}): max abs err {err}"

    print("KERNEL_OK")
</pallas_src>

<mosaic_0001>
module attributes {stable_mosaic.version = 11 : i64} {
  func.func @_conv_kernel(%arg0: i32, %arg1: i32, %arg2: i32, %arg3: memref<1x1x10x10x4xbf16, #tpu.memory_space<vmem>>, %arg4: memref<1x3x3x4x8xbf16, #tpu.memory_space<vmem>>, %arg5: memref<1x1x8xf32, #tpu.memory_space<vmem>>, %arg6: memref<1x1x8x8x8xf32, #tpu.memory_space<vmem>>, %arg7: memref<8x8x8xf32, #tpu.memory_space<vmem>>) attributes {dimension_semantics = [#tpu.dimension_semantics<parallel>, #tpu.dimension_semantics<parallel>, #tpu.dimension_semantics<arbitrary>], iteration_bounds = array<i64: 2, 8, 3>, scalar_prefetch = 0 : i64, scratch_operands = 1 : i64, tpu.core_type = #tpu.core_type<tc>, window_params = [{transform_indices = @transform_0, window_bounds = array<i64: 1, 1, 10, 10, 4>}, {transform_indices = @transform_1, window_bounds = array<i64: 1, 3, 3, 4, 8>}, {pipeline_mode = #tpu.pipeline_mode<synchronous>, transform_indices = @transform_2, window_bounds = array<i64: 1, 1, 8>}, {transform_indices = @transform_3, window_bounds = array<i64: 1, 1, 8, 8, 8>}]} {
    %c0_i32 = arith.constant 0 : i32
    %0 = arith.cmpi eq, %arg2, %c0_i32 : i32
    %1 = arith.extui %0 : i1 to i32
    %c0_i32_0 = arith.constant 0 : i32
    %2 = arith.cmpi ne, %1, %c0_i32_0 : i32
    scf.if %2 {
      %c0_104 = arith.constant 0 : index
      %c0_105 = arith.constant 0 : index
      %c0_106 = arith.constant 0 : index
      %82 = vector.load %arg5[%c0_104, %c0_105, %c0_106] : memref<1x1x8xf32, #tpu.memory_space<vmem>>, vector<1x1x8xf32>
      %83 = vector.shape_cast %82 : vector<1x1x8xf32> to vector<1x1x8xf32>
      %84 = vector.broadcast %83 : vector<1x1x8xf32> to vector<8x8x8xf32>
      %c0_107 = arith.constant 0 : index
      %c0_108 = arith.constant 0 : index
      %c0_109 = arith.constant 0 : index
      %85 = vector.load %arg7[%c0_107, %c0_108, %c0_109] : memref<8x8x8xf32, #tpu.memory_space<vmem>>, vector<8x8x8xf32>
      tpu.vector_store %arg7[%c0_107, %c0_108, %c0_109], %84 {strides = array<i32>} : memref<8x8x8xf32, #tpu.memory_space<vmem>>, vector<8x8x8xf32>,
    } else {
    }
    %cst = arith.constant 0.000000e+00 : f32
    %3 = vector.broadcast %cst : f32 to vector<8x8x8xf32>
    %c0 = arith.constant 0 : index
    %c0_1 = arith.constant 0 : index
    %c0_2 = arith.constant 0 : index
    %c0_3 = arith.constant 0 : index
    %c0_4 = arith.constant 0 : index
    %4 = vector.load %arg3[%c0, %c0_1, %c0_2, %c0_3, %c0_4] : memref<1x1x10x10x4xbf16, #tpu.memory_space<vmem>>, vector<1x1x8x8x4xbf16>
    %5 = vector.shape_cast %4 : vector<1x1x8x8x4xbf16> to vector<8x8x4xbf16>
    %c0_5 = arith.constant 0 : index
    %c0_6 = arith.constant 0 : index
    %c0_7 = arith.constant 0 : index
    %c0_8 = arith.constant 0 : index
    %c0_9 = arith.constant 0 : index
    %6 = vector.load %arg4[%c0_5, %c0_6, %c0_7, %c0_8, %c0_9] : memref<1x3x3x4x8xbf16, #tpu.memory_space<vmem>>, vector<1x1x1x4x8xbf16>
    %7 = vector.shape_cast %6 : vector<1x1x1x4x8xbf16> to vector<4x8xbf16>
    %8 = vector.shape_cast %7 : vector<4x8xbf16> to vector<1x4x8xbf16>
    %9 = vector.broadcast %8 : vector<1x4x8xbf16> to vector<8x4x8xbf16>
    "tpu.trace_start"() <{level = 10 : i32, message = "hwc,hco->hwo"}> : () -> ()
    %cst_10 = arith.constant dense<0.000000e+00> : vector<8x8x8xf32>
    %10 = tpu.matmul %5, %9, %cst_10 {dimension_numbers = #tpu.dot_dimension_numbers<[2], [1], [1], [2], [0, 0, 0, 1, 1, 2], [0], [0]>} : vector<8x8x4xbf16>, vector<8x4x8xbf16>, vector<8x8x8xf32> -> vector<8x8x8xf32>
    "tpu.trace_stop"() : () -> ()
    %11 = arith.addf %3, %10 : vector<8x8x8xf32>
    %c0_11 = arith.constant 0 : index
    %c0_12 = arith.constant 0 : index
    %c0_13 = arith.constant 0 : index
    %c1 = arith.constant 1 : index
    %c0_14 = arith.constant 0 : index
    %12 = vector.load %arg3[%c0_11, %c0_12, %c0_13, %c1, %c0_14] : memref<1x1x10x10x4xbf16, #tpu.memory_space<vmem>>, vector<1x1x8x8x4xbf16>
    %13 = vector.shape_cast %12 : vector<1x1x8x8x4xbf16> to vector<8x8x4xbf16>
    %c0_15 = arith.constant 0 : index
    %c0_16 = arith.constant 0 : index
    %c1_17 = arith.constant 1 : index
    %c0_18 = arith.constant 0 : index
    %c0_19 = arith.constant 0 : index
    %14 = vector.load %arg4[%c0_15, %c0_16, %c1_17, %c0_18, %c0_19] : memref<1x3x3x4x8xbf16, #tpu.memory_space<vmem>>, vector<1x1x1x4x8xbf16>
    %15 = vector.shape_cast %14 : vector<1x1x1x4x8xbf16> to vector<4x8xbf16>
    %16 = vector.shape_cast %15 : vector<4x8xbf16> to vector<1x4x8xbf16>
    %17 = vector.broadcast %16 : vector<1x4x8xbf16> to vector<8x4x8xbf16>
    "tpu.trace_start"() <{level = 10 : i32, message = "hwc,hco->hwo"}> : () -> ()
    %cst_20 = arith.constant dense<0.000000e+00> : vector<8x8x8xf32>
    %18 = tpu.matmul %13, %17, %cst_20 {dimension_numbers = #tpu.dot_dimension_numbers<[2], [1], [1], [2], [0, 0, 0, 1, 1, 2], [0], [0]>} : vector<8x8x4xbf16>, vector<8x4x8xbf16>, vector<8x8x8xf32> -> vector<8x8x8xf32>
    "tpu.trace_stop"() : () -> ()
    %19 = arith.addf %11, %18 : vector<8x8x8xf32>
    %c0_21 = arith.constant 0 : index
    %c0_22 = arith.constant 0 : index
    %c0_23 = arith.constant 0 : index
    %c2 = arith.constant 2 : index
    %c0_24 = arith.constant 0 : index
    %20 = vector.load %arg3[%c0_21, %c0_22, %c0_23, %c2, %c0_24] : memref<1x1x10x10x4xbf16, #tpu.memory_space<vmem>>, vector<1x1x8x8x4xbf16>
    %21 = vector.shape_cast %20 : vector<1x1x8x8x4xbf16> to vector<8x8x4xbf16>
    %c0_25 = arith.constant 0 : index
    %c0_26 = arith.constant 0 : index
    %c2_27 = arith.constant 2 : index
    %c0_28 = arith.constant 0 : index
    %c0_29 = arith.constant 0 : index
    %22 = vector.load %arg4[%c0_25, %c0_26, %c2_27, %c0_28, %c0_29] : memref<1x3x3x4x8xbf16, #tpu.memory_space<vmem>>, vector<1x1x1x4x8xbf16>
    %23 = vector.shape_cast %22 : vector<1x1x1x4x8xbf16> to vector<4x8xbf16>
    %24 = vector.shape_cast %23 : vector<4x8xbf16> to vector<1x4x8xbf16>
    %25 = vector.broadcast %24 : vector<1x4x8xbf16> to vector<8x4x8xbf16>
    "tpu.trace_start"() <{level = 10 : i32, message = "hwc,hco->hwo"}> : () -> ()
    %cst_30 = arith.constant dense<0.000000e+00> : vector<8x8x8xf32>
    %26 = tpu.matmul %21, %25, %cst_30 {dimension_numbers = #tpu.dot_dimension_numbers<[2], [1], [1], [2], [0, 0, 0, 1, 1, 2], [0], [0]>} : vector<8x8x4xbf16>, vector<8x4x8xbf16>, vector<8x8x8xf32> -> vector<8x8x8xf32>
    "tpu.trace_stop"() : () -> ()
    %27 = arith.addf %19, %26 : vector<8x8x8xf32>
    %c0_31 = arith.constant 0 : index
    %c0_32 = arith.constant 0 : index
    %c1_33 = arith.constant 1 : index
    %c0_34 = arith.constant 0 : index
    %c0_35 = arith.constant 0 : index
    %28 = vector.load %arg3[%c0_31, %c0_32, %c1_33, %c0_34, %c0_35] : memref<1x1x10x10x4xbf16, #tpu.memory_space<vmem>>, vector<1x1x8x8x4xbf16>
    %29 = vector.shape_cast %28 : vector<1x1x8x8x4xbf16> to vector<8x8x4xbf16>
    %c0_36 = arith.constant 0 : index
    %c1_37 = arith.constant 1 : index
    %c0_38 = arith.constant 0 : index
    %c0_39 = arith.constant 0 : index
    %c0_40 = arith.constant 0 : index
    %30 = vector.load %arg4[%c0_36, %c1_37, %c0_38, %c0_39, %c0_40] : memref<1x3x3x4x8xbf16, #tpu.memory_space<vmem>>, vector<1x1x1x4x8xbf16>
    %31 = vector.shape_cast %30 : vector<1x1x1x4x8xbf16> to vector<4x8xbf16>
    %32 = vector.shape_cast %31 : vector<4x8xbf16> to vector<1x4x8xbf16>
    %33 = vector.broadcast %32 : vector<1x4x8xbf16> to vector<8x4x8xbf16>
    "tpu.trace_start"() <{level = 10 : i32, message = "hwc,hco->hwo"}> : () -> ()
    %cst_41 = arith.constant dense<0.000000e+00> : vector<8x8x8xf32>
    %34 = tpu.matmul %29, %33, %cst_41 {dimension_numbers = #tpu.dot_dimension_numbers<[2], [1], [1], [2], [0, 0, 0, 1, 1, 2], [0], [0]>} : vector<8x8x4xbf16>, vector<8x4x8xbf16>, vector<8x8x8xf32> -> vector<8x8x8xf32>
    "tpu.trace_stop"() : () -> ()
    %35 = arith.addf %27, %34 : vector<8x8x8xf32>
    %c0_42 = arith.constant 0 : index
    %c0_43 = arith.constant 0 : index
    %c1_44 = arith.constant 1 : index
    %c1_45 = arith.constant 1 : index
    %c0_46 = arith.constant 0 : index
    %36 = vector.load %arg3[%c0_42, %c0_43, %c1_44, %c1_45, %c0_46] : memref<1x1x10x10x4xbf16, #tpu.memory_space<vmem>>, vector<1x1x8x8x4xbf16>
    %37 = vector.shape_cast %36 : vector<1x1x8x8x4xbf16> to vector<8x8x4xbf16>
    %c0_47 = arith.constant 0 : index
    %c1_48 = arith.constant 1 : index
    %c1_49 = arith.constant 1 : index
    %c0_50 = arith.constant 0 : index
    %c0_51 = arith.constant 0 : index
    %38 = vector.load %arg4[%c0_47, %c1_48, %c1_49, %c0_50, %c0_51] : memref<1x3x3x4x8xbf16, #tpu.memory_space<vmem>>, vector<1x1x1x4x8xbf16>
    %39 = vector.shape_cast %38 : vector<1x1x1x4x8xbf16> to vector<4x8xbf16>
    %40 = vector.shape_cast %39 : vector<4x8xbf16> to vector<1x4x8xbf16>
    %41 = vector.broadcast %40 : vector<1x4x8xbf16> to vector<8x4x8xbf16>
    "tpu.trace_start"() <{level = 10 : i32, message = "hwc,hco->hwo"}> : () -> ()
    %cst_52 = arith.constant dense<0.000000e+00> : vector<8x8x8xf32>
    %42 = tpu.matmul %37, %41, %cst_52 {dimension_numbers = #tpu.dot_dimension_numbers<[2], [1], [1], [2], [0, 0, 0, 1, 1, 2], [0], [0]>} : vector<8x8x4xbf16>, vector<8x4x8xbf16>, vector<8x8x8xf32> -> vector<8x8x8xf32>
    "tpu.trace_stop"() : () -> ()
    %43 = arith.addf %35, %42 : vector<8x8x8xf32>
    %c0_53 = arith.constant 0 : index
    %c0_54 = arith.constant 0 : index
    %c1_55 = arith.constant 1 : index
    %c2_56 = arith.constant 2 : index
    %c0_57 = arith.constant 0 : index
    %44 = vector.load %arg3[%c0_53, %c0_54, %c1_55, %c2_56, %c0_57] : memref<1x1x10x10x4xbf16, #tpu.memory_space<vmem>>, vector<1x1x8x8x4xbf16>
    %45 = vector.shape_cast %44 : vector<1x1x8x8x4xbf16> to vector<8x8x4xbf16>
    %c0_58 = arith.constant 0 : index
    %c1_59 = arith.constant 1 : index
    %c2_60 = arith.constant 2 : index
    %c0_61 = arith.constant 0 : index
    %c0_62 = arith.constant 0 : index
    %46 = vector.load %arg4[%c0_58, %c1_59, %c2_60, %c0_61, %c0_62] : memref<1x3x3x4x8xbf16, #tpu.memory_space<vmem>>, vector<1x1x1x4x8xbf16>
    %47 = vector.shape_cast %46 : vector<1x1x1x4x8xbf16> to vector<4x8xbf16>
    %48 = vector.shape_cast %47 : vector<4x8xbf16> to vector<1x4x8xbf16>
    %49 = vector.broadcast %48 : vector<1x4x8xbf16> to vector<8x4x8xbf16>
    "tpu.trace_start"() <{level = 10 : i32, message = "hwc,hco->hwo"}> : () -> ()
    %cst_63 = arith.constant dense<0.000000e+00> : vector<8x8x8xf32>
    %50 = tpu.matmul %45, %49, %cst_63 {dimension_numbers = #tpu.dot_dimension_numbers<[2], [1], [1], [2], [0, 0, 0, 1, 1, 2], [0], [0]>} : vector<8x8x4xbf16>, vector<8x4x8xbf16>, vector<8x8x8xf32> -> vector<8x8x8xf32>
    "tpu.trace_stop"() : () -> ()
    %51 = arith.addf %43, %50 : vector<8x8x8xf32>
    %c0_64 = arith.constant 0 : index
    %c0_65 = arith.constant 0 : index
    %c2_66 = arith.constant 2 : index
    %c0_67 = arith.constant 0 : index
    %c0_68 = arith.constant 0 : index
    %52 = vector.load %arg3[%c0_64, %c0_65, %c2_66, %c0_67, %c0_68] : memref<1x1x10x10x4xbf16, #tpu.memory_space<vmem>>, vector<1x1x8x8x4xbf16>
    %53 = vector.shape_cast %52 : vector<1x1x8x8x4xbf16> to vector<8x8x4xbf16>
    %c0_69 = arith.constant 0 : index
    %c2_70 = arith.constant 2 : index
    %c0_71 = arith.constant 0 : index
    %c0_72 = arith.constant 0 : index
    %c0_73 = arith.constant 0 : index
    %54 = vector.load %arg4[%c0_69, %c2_70, %c0_71, %c0_72, %c0_73] : memref<1x3x3x4x8xbf16, #tpu.memory_space<vmem>>, vector<1x1x1x4x8xbf16>
    %55 = vector.shape_cast %54 : vector<1x1x1x4x8xbf16> to vector<4x8xbf16>
    %56 = vector.shape_cast %55 : vector<4x8xbf16> to vector<1x4x8xbf16>
    %57 = vector.broadcast %56 : vector<1x4x8xbf16> to vector<8x4x8xbf16>
    "tpu.trace_start"() <{level = 10 : i32, message = "hwc,hco->hwo"}> : () -> ()
    %cst_74 = arith.constant dense<0.000000e+00> : vector<8x8x8xf32>
    %58 = tpu.matmul %53, %57, %cst_74 {dimension_numbers = #tpu.dot_dimension_numbers<[2], [1], [1], [2], [0, 0, 0, 1, 1, 2], [0], [0]>} : vector<8x8x4xbf16>, vector<8x4x8xbf16>, vector<8x8x8xf32> -> vector<8x8x8xf32>
    "tpu.trace_stop"() : () -> ()
    %59 = arith.addf %51, %58 : vector<8x8x8xf32>
    %c0_75 = arith.constant 0 : index
    %c0_76 = arith.constant 0 : index
    %c2_77 = arith.constant 2 : index
    %c1_78 = arith.constant 1 : index
    %c0_79 = arith.constant 0 : index
    %60 = vector.load %arg3[%c0_75, %c0_76, %c2_77, %c1_78, %c0_79] : memref<1x1x10x10x4xbf16, #tpu.memory_space<vmem>>, vector<1x1x8x8x4xbf16>
    %61 = vector.shape_cast %60 : vector<1x1x8x8x4xbf16> to vector<8x8x4xbf16>
    %c0_80 = arith.constant 0 : index
    %c2_81 = arith.constant 2 : index
    %c1_82 = arith.constant 1 : index
    %c0_83 = arith.constant 0 : index
    %c0_84 = arith.constant 0 : index
    %62 = vector.load %arg4[%c0_80, %c2_81, %c1_82, %c0_83, %c0_84] : memref<1x3x3x4x8xbf16, #tpu.memory_space<vmem>>, vector<1x1x1x4x8xbf16>
    %63 = vector.shape_cast %62 : vector<1x1x1x4x8xbf16> to vector<4x8xbf16>
    %64 = vector.shape_cast %63 : vector<4x8xbf16> to vector<1x4x8xbf16>
    %65 = vector.broadcast %64 : vector<1x4x8xbf16> to vector<8x4x8xbf16>
    "tpu.trace_start"() <{level = 10 : i32, message = "hwc,hco->hwo"}> : () -> ()
    %cst_85 = arith.constant dense<0.000000e+00> : vector<8x8x8xf32>
    %66 = tpu.matmul %61, %65, %cst_85 {dimension_numbers = #tpu.dot_dimension_numbers<[2], [1], [1], [2], [0, 0, 0, 1, 1, 2], [0], [0]>} : vector<8x8x4xbf16>, vector<8x4x8xbf16>, vector<8x8x8xf32> -> vector<8x8x8xf32>
    "tpu.trace_stop"() : () -> ()
    %67 = arith.addf %59, %66 : vector<8x8x8xf32>
    %c0_86 = arith.constant 0 : index
    %c0_87 = arith.constant 0 : index
    %c2_88 = arith.constant 2 : index
    %c2_89 = arith.constant 2 : index
    %c0_90 = arith.constant 0 : index
    %68 = vector.load %arg3[%c0_86, %c0_87, %c2_88, %c2_89, %c0_90] : memref<1x1x10x10x4xbf16, #tpu.memory_space<vmem>>, vector<1x1x8x8x4xbf16>
    %69 = vector.shape_cast %68 : vector<1x1x8x8x4xbf16> to vector<8x8x4xbf16>
    %c0_91 = arith.constant 0 : index
    %c2_92 = arith.constant 2 : index
    %c2_93 = arith.constant 2 : index
    %c0_94 = arith.constant 0 : index
    %c0_95 = arith.constant 0 : index
    %70 = vector.load %arg4[%c0_91, %c2_92, %c2_93, %c0_94, %c0_95] : memref<1x3x3x4x8xbf16, #tpu.memory_space<vmem>>, vector<1x1x1x4x8xbf16>
    %71 = vector.shape_cast %70 : vector<1x1x1x4x8xbf16> to vector<4x8xbf16>
    %72 = vector.shape_cast %71 : vector<4x8xbf16> to vector<1x4x8xbf16>
    %73 = vector.broadcast %72 : vector<1x4x8xbf16> to vector<8x4x8xbf16>
    "tpu.trace_start"() <{level = 10 : i32, message = "hwc,hco->hwo"}> : () -> ()
    %cst_96 = arith.constant dense<0.000000e+00> : vector<8x8x8xf32>
    %74 = tpu.matmul %69, %73, %cst_96 {dimension_numbers = #tpu.dot_dimension_numbers<[2], [1], [1], [2], [0, 0, 0, 1, 1, 2], [0], [0]>} : vector<8x8x4xbf16>, vector<8x4x8xbf16>, vector<8x8x8xf32> -> vector<8x8x8xf32>
    "tpu.trace_stop"() : () -> ()
    %75 = arith.addf %67, %74 : vector<8x8x8xf32>
    %c0_97 = arith.constant 0 : index
    %c0_98 = arith.constant 0 : index
    %c0_99 = arith.constant 0 : index
    %76 = vector.load %arg7[%c0_97, %c0_98, %c0_99] : memref<8x8x8xf32, #tpu.memory_space<vmem>>, vector<8x8x8xf32>
    %77 = arith.addf %76, %75 : vector<8x8x8xf32>
    %c0_100 = arith.constant 0 : index
    %c0_101 = arith.constant 0 : index
    %c0_102 = arith.constant 0 : index
    %78 = vector.load %arg7[%c0_100, %c0_101, %c0_102] : memref<8x8x8xf32, #tpu.memory_space<vmem>>, vector<8x8x8xf32>
    tpu.vector_store %arg7[%c0_100, %c0_101, %c0_102], %77 {strides = array<i32>} : memref<8x8x8xf32, #tpu.memory_space<vmem>>, vector<8x8x8xf32>,
    %c2_i32 = arith.constant 2 : i32
    %79 = arith.cmpi eq, %arg2, %c2_i32 : i32
    %80 = arith.extui %79 : i1 to i32
    %c0_i32_103 = arith.constant 0 : i32
    %81 = arith.cmpi ne, %80, %c0_i32_103 : i32
    scf.if %81 {
      %c0_104 = arith.constant 0 : index
      %c0_105 = arith.constant 0 : index
      %c0_106 = arith.constant 0 : index
      %82 = vector.load %arg7[%c0_104, %c0_105, %c0_106] : memref<8x8x8xf32, #tpu.memory_space<vmem>>, vector<8x8x8xf32>
      %c0_107 = arith.constant 0 : index
      %c0_108 = arith.constant 0 : index
      %c0_109 = arith.constant 0 : index
      %c0_110 = arith.constant 0 : index
      %c0_111 = arith.constant 0 : index
      %83 = vector.load %arg6[%c0_107, %c0_108, %c0_109, %c0_110, %c0_111] : memref<1x1x8x8x8xf32, #tpu.memory_space<vmem>>, vector<1x1x8x8x8xf32>
      %84 = vector.shape_cast %83 : vector<1x1x8x8x8xf32> to vector<8x8x8xf32>
      %85 = vector.shape_cast %82 : vector<8x8x8xf32> to vector<1x1x8x8x8xf32>
      tpu.vector_store %arg6[%c0_107, %c0_108, %c0_109, %c0_110, %c0_111], %85 {strides = array<i32>} : memref<1x1x8x8x8xf32, #tpu.memory_space<vmem>>, vector<1x1x8x8x8xf32>,
    } else {
    }
    return
  }
  func.func @transform_0(%arg0: i32, %arg1: i32, %arg2: i32) -> (i32, i32, i32, i32, i32) {
    %c1_i32 = arith.constant 1 : i32
    %0 = arith.muli %arg1, %c1_i32 : i32
    %1 = arith.addi %0, %arg2 : i32
    %c0_i32 = arith.constant 0 : i32
    %c0_i32_0 = arith.constant 0 : i32
    %c0_i32_1 = arith.constant 0 : i32
    %c0_i32_2 = arith.constant 0 : i32
    return %arg0, %1, %c0_i32, %c0_i32_0, %c0_i32_1 : i32, i32, i32, i32, i32
  }
  func.func @transform_1(%arg0: i32, %arg1: i32, %arg2: i32) -> (i32, i32, i32, i32, i32) {
    %c0_i32 = arith.constant 0 : i32
    %c0_i32_0 = arith.constant 0 : i32
    %c0_i32_1 = arith.constant 0 : i32
    %c0_i32_2 = arith.constant 0 : i32
    %c0_i32_3 = arith.constant 0 : i32
    return %arg2, %c0_i32, %c0_i32_0, %c0_i32_1, %c0_i32_2 : i32, i32, i32, i32, i32
  }
  func.func @transform_2(%arg0: i32, %arg1: i32, %arg2: i32) -> (i32, i32, i32) {
    %c0_i32 = arith.constant 0 : i32
    %c0_i32_0 = arith.constant 0 : i32
    %c0_i32_1 = arith.constant 0 : i32
    %c0_i32_2 = arith.constant 0 : i32
    return %c0_i32, %c0_i32_0, %c0_i32_1 : i32, i32, i32
  }
  func.func @transform_3(%arg0: i32, %arg1: i32, %arg2: i32) -> (i32, i32, i32, i32, i32) {
    %c0_i32 = arith.constant 0 : i32
    %c0_i32_0 = arith.constant 0 : i32
    %c0_i32_1 = arith.constant 0 : i32
    %c0_i32_2 = arith.constant 0 : i32
    return %arg0, %arg1, %c0_i32, %c0_i32_0, %c0_i32_1 : i32, i32, i32, i32, i32
  }
}

module attributes {stable_mosaic.version = 11 : i64} {
  func.func @_conv_kernel(%arg0: i32, %arg1: i32, %arg2: i32, %arg3: memref<1x1x10x10x8xbf16, #tpu.memory_space<vmem>>, %arg4: memref<1x3x3x8x8xbf16, #tpu.memory_space<vmem>>, %arg5: memref<1x1x8xf32, #tpu.memory_space<vmem>>, %arg6: memref<1x1x8x8x8xf32, #tpu.memory_space<vmem>>, %arg7: memref<8x8x8xf32, #tpu.memory_space<vmem>>) attributes {dimension_semantics = [#tpu.dimension_semantics<parallel>, #tpu.dimension_semantics<parallel>, #tpu.dimension_semantics<arbitrary>], iteration_bounds = array<i64: 2, 8, 3>, scalar_prefetch = 0 : i64, scratch_operands = 1 : i64, tpu.core_type = #tpu.core_type<tc>, window_params = [{transform_indices = @transform_0, window_bounds = array<i64: 1, 1, 10, 10, 8>}, {transform_indices = @transform_1, window_bounds = array<i64: 1, 3, 3, 8, 8>}, {pipeline_mode = #tpu.pipeline_mode<synchronous>, transform_indices = @transform_2, window_bounds = array<i64: 1, 1, 8>}, {transform_indices = @transform_3, window_bounds = array<i64: 1, 1, 8, 8, 8>}]} {
    %c0_i32 = arith.constant 0 : i32
    %0 = arith.cmpi eq, %arg2, %c0_i32 : i32
    %1 = arith.extui %0 : i1 to i32
    %c0_i32_0 = arith.constant 0 : i32
    %2 = arith.cmpi ne, %1, %c0_i32_0 : i32
    scf.if %2 {
      %c0_104 = arith.constant 0 : index
      %c0_105 = arith.constant 0 : index
      %c0_106 = arith.constant 0 : index
      %82 = vector.load %arg5[%c0_104, %c0_105, %c0_106] : memref<1x1x8xf32, #tpu.memory_space<vmem>>, vector<1x1x8xf32>
      %83 = vector.shape_cast %82 : vector<1x1x8xf32> to vector<1x1x8xf32>
      %84 = vector.broadcast %83 : vector<1x1x8xf32> to vector<8x8x8xf32>
      %c0_107 = arith.constant 0 : index
      %c0_108 = arith.constant 0 : index
      %c0_109 = arith.constant 0 : index
      %85 = vector.load %arg7[%c0_107, %c0_108, %c0_109] : memref<8x8x8xf32, #tpu.memory_space<vmem>>, vector<8x8x8xf32>
      tpu.vector_store %arg7[%c0_107, %c0_108, %c0_109], %84 {strides = array<i32>} : memref<8x8x8xf32, #tpu.memory_space<vmem>>, vector<8x8x8xf32>,
    } else {
    }
    %cst = arith.constant 0.000000e+00 : f32
    %3 = vector.broadcast %cst : f32 to vector<8x8x8xf32>
    %c0 = arith.constant 0 : index
    %c0_1 = arith.constant 0 : index
    %c0_2 = arith.constant 0 : index
    %c0_3 = arith.constant 0 : index
    %c0_4 = arith.constant 0 : index
    %4 = vector.load %arg3[%c0, %c0_1, %c0_2, %c0_3, %c0_4] : memref<1x1x10x10x8xbf16, #tpu.memory_space<vmem>>, vector<1x1x8x8x8xbf16>
    %5 = vector.shape_cast %4 : vector<1x1x8x8x8xbf16> to vector<8x8x8xbf16>
    %c0_5 = arith.constant 0 : index
    %c0_6 = arith.constant 0 : index
    %c0_7 = arith.constant 0 : index
    %c0_8 = arith.constant 0 : index
    %c0_9 = arith.constant 0 : index
    %6 = vector.load %arg4[%c0_5, %c0_6, %c0_7, %c0_8, %c0_9] : memref<1x3x3x8x8xbf16, #tpu.memory_space<vmem>>, vector<1x1x1x8x8xbf16>
    %7 = vector.shape_cast %6 : vector<1x1x1x8x8xbf16> to vector<8x8xbf16>
    %8 = vector.shape_cast %7 : vector<8x8xbf16> to vector<1x8x8xbf16>
    %9 = vector.broadcast %8 : vector<1x8x8xbf16> to vector<8x8x8xbf16>
    "tpu.trace_start"() <{level = 10 : i32, message = "hwc,hco->hwo"}> : () -> ()
    %cst_10 = arith.constant dense<0.000000e+00> : vector<8x8x8xf32>
    %10 = tpu.matmul %5, %9, %cst_10 {dimension_numbers = #tpu.dot_dimension_numbers<[2], [1], [1], [2], [0, 0, 0, 1, 1, 2], [0], [0]>} : vector<8x8x8xbf16>, vector<8x8x8xbf16>, vector<8x8x8xf32> -> vector<8x8x8xf32>
    "tpu.trace_stop"() : () -> ()
    %11 = arith.addf %3, %10 : vector<8x8x8xf32>
    %c0_11 = arith.constant 0 : index
    %c0_12 = arith.constant 0 : index
    %c0_13 = arith.constant 0 : index
    %c1 = arith.constant 1 : index
    %c0_14 = arith.constant 0 : index
    %12 = vector.load %arg3[%c0_11, %c0_12, %c0_13, %c1, %c0_14] : memref<1x1x10x10x8xbf16, #tpu.memory_space<vmem>>, vector<1x1x8x8x8xbf16>
    %13 = vector.shape_cast %12 : vector<1x1x8x8x8xbf16> to vector<8x8x8xbf16>
    %c0_15 = arith.constant 0 : index
    %c0_16 = arith.constant 0 : index
    %c1_17 = arith.constant 1 : index
    %c0_18 = arith.constant 0 : index
    %c0_19 = arith.constant 0 : index
    %14 = vector.load %arg4[%c0_15, %c0_16, %c1_17, %c0_18, %c0_19] : memref<1x3x3x8x8xbf16, #tpu.memory_space<vmem>>, vector<1x1x1x8x8xbf16>
    %15 = vector.shape_cast %14 : vector<1x1x1x8x8xbf16> to vector<8x8xbf16>
    %16 = vector.shape_cast %15 : vector<8x8xbf16> to vector<1x8x8xbf16>
    %17 = vector.broadcast %16 : vector<1x8x8xbf16> to vector<8x8x8xbf16>
    "tpu.trace_start"() <{level = 10 : i32, message = "hwc,hco->hwo"}> : () -> ()
    %cst_20 = arith.constant dense<0.000000e+00> : vector<8x8x8xf32>
    %18 = tpu.matmul %13, %17, %cst_20 {dimension_numbers = #tpu.dot_dimension_numbers<[2], [1], [1], [2], [0, 0, 0, 1, 1, 2], [0], [0]>} : vector<8x8x8xbf16>, vector<8x8x8xbf16>, vector<8x8x8xf32> -> vector<8x8x8xf32>
    "tpu.trace_stop"() : () -> ()
    %19 = arith.addf %11, %18 : vector<8x8x8xf32>
    %c0_21 = arith.constant 0 : index
    %c0_22 = arith.constant 0 : index
    %c0_23 = arith.constant 0 : index
    %c2 = arith.constant 2 : index
    %c0_24 = arith.constant 0 : index
    %20 = vector.load %arg3[%c0_21, %c0_22, %c0_23, %c2, %c0_24] : memref<1x1x10x10x8xbf16, #tpu.memory_space<vmem>>, vector<1x1x8x8x8xbf16>
    %21 = vector.shape_cast %20 : vector<1x1x8x8x8xbf16> to vector<8x8x8xbf16>
    %c0_25 = arith.constant 0 : index
    %c0_26 = arith.constant 0 : index
    %c2_27 = arith.constant 2 : index
    %c0_28 = arith.constant 0 : index
    %c0_29 = arith.constant 0 : index
    %22 = vector.load %arg4[%c0_25, %c0_26, %c2_27, %c0_28, %c0_29] : memref<1x3x3x8x8xbf16, #tpu.memory_space<vmem>>, vector<1x1x1x8x8xbf16>
    %23 = vector.shape_cast %22 : vector<1x1x1x8x8xbf16> to vector<8x8xbf16>
    %24 = vector.shape_cast %23 : vector<8x8xbf16> to vector<1x8x8xbf16>
    %25 = vector.broadcast %24 : vector<1x8x8xbf16> to vector<8x8x8xbf16>
    "tpu.trace_start"() <{level = 10 : i32, message = "hwc,hco->hwo"}> : () -> ()
    %cst_30 = arith.constant dense<0.000000e+00> : vector<8x8x8xf32>
    %26 = tpu.matmul %21, %25, %cst_30 {dimension_numbers = #tpu.dot_dimension_numbers<[2], [1], [1], [2], [0, 0, 0, 1, 1, 2], [0], [0]>} : vector<8x8x8xbf16>, vector<8x8x8xbf16>, vector<8x8x8xf32> -> vector<8x8x8xf32>
    "tpu.trace_stop"() : () -> ()
    %27 = arith.addf %19, %26 : vector<8x8x8xf32>
    %c0_31 = arith.constant 0 : index
    %c0_32 = arith.constant 0 : index
    %c1_33 = arith.constant 1 : index
    %c0_34 = arith.constant 0 : index
    %c0_35 = arith.constant 0 : index
    %28 = vector.load %arg3[%c0_31, %c0_32, %c1_33, %c0_34, %c0_35] : memref<1x1x10x10x8xbf16, #tpu.memory_space<vmem>>, vector<1x1x8x8x8xbf16>
    %29 = vector.shape_cast %28 : vector<1x1x8x8x8xbf16> to vector<8x8x8xbf16>
    %c0_36 = arith.constant 0 : index
    %c1_37 = arith.constant 1 : index
    %c0_38 = arith.constant 0 : index
    %c0_39 = arith.constant 0 : index
    %c0_40 = arith.constant 0 : index
    %30 = vector.load %arg4[%c0_36, %c1_37, %c0_38, %c0_39, %c0_40] : memref<1x3x3x8x8xbf16, #tpu.memory_space<vmem>>, vector<1x1x1x8x8xbf16>
    %31 = vector.shape_cast %30 : vector<1x1x1x8x8xbf16> to vector<8x8xbf16>
    %32 = vector.shape_cast %31 : vector<8x8xbf16> to vector<1x8x8xbf16>
    %33 = vector.broadcast %32 : vector<1x8x8xbf16> to vector<8x8x8xbf16>
    "tpu.trace_start"() <{level = 10 : i32, message = "hwc,hco->hwo"}> : () -> ()
    %cst_41 = arith.constant dense<0.000000e+00> : vector<8x8x8xf32>
    %34 = tpu.matmul %29, %33, %cst_41 {dimension_numbers = #tpu.dot_dimension_numbers<[2], [1], [1], [2], [0, 0, 0, 1, 1, 2], [0], [0]>} : vector<8x8x8xbf16>, vector<8x8x8xbf16>, vector<8x8x8xf32> -> vector<8x8x8xf32>
    "tpu.trace_stop"() : () -> ()
    %35 = arith.addf %27, %34 : vector<8x8x8xf32>
    %c0_42 = arith.constant 0 : index
    %c0_43 = arith.constant 0 : index
    %c1_44 = arith.constant 1 : index
    %c1_45 = arith.constant 1 : index
    %c0_46 = arith.constant 0 : index
    %36 = vector.load %arg3[%c0_42, %c0_43, %c1_44, %c1_45, %c0_46] : memref<1x1x10x10x8xbf16, #tpu.memory_space<vmem>>, vector<1x1x8x8x8xbf16>
    %37 = vector.shape_cast %36 : vector<1x1x8x8x8xbf16> to vector<8x8x8xbf16>
    %c0_47 = arith.constant 0 : index
    %c1_48 = arith.constant 1 : index
    %c1_49 = arith.constant 1 : index
    %c0_50 = arith.constant 0 : index
    %c0_51 = arith.constant 0 : index
    %38 = vector.load %arg4[%c0_47, %c1_48, %c1_49, %c0_50, %c0_51] : memref<1x3x3x8x8xbf16, #tpu.memory_space<vmem>>, vector<1x1x1x8x8xbf16>
    %39 = vector.shape_cast %38 : vector<1x1x1x8x8xbf16> to vector<8x8xbf16>
    %40 = vector.shape_cast %39 : vector<8x8xbf16> to vector<1x8x8xbf16>
    %41 = vector.broadcast %40 : vector<1x8x8xbf16> to vector<8x8x8xbf16>
    "tpu.trace_start"() <{level = 10 : i32, message = "hwc,hco->hwo"}> : () -> ()
    %cst_52 = arith.constant dense<0.000000e+00> : vector<8x8x8xf32>
    %42 = tpu.matmul %37, %41, %cst_52 {dimension_numbers = #tpu.dot_dimension_numbers<[2], [1], [1], [2], [0, 0, 0, 1, 1, 2], [0], [0]>} : vector<8x8x8xbf16>, vector<8x8x8xbf16>, vector<8x8x8xf32> -> vector<8x8x8xf32>
    "tpu.trace_stop"() : () -> ()
    %43 = arith.addf %35, %42 : vector<8x8x8xf32>
    %c0_53 = arith.constant 0 : index
    %c0_54 = arith.constant 0 : index
    %c1_55 = arith.constant 1 : index
    %c2_56 = arith.constant 2 : index
    %c0_57 = arith.constant 0 : index
    %44 = vector.load %arg3[%c0_53, %c0_54, %c1_55, %c2_56, %c0_57] : memref<1x1x10x10x8xbf16, #tpu.memory_space<vmem>>, vector<1x1x8x8x8xbf16>
    %45 = vector.shape_cast %44 : vector<1x1x8x8x8xbf16> to vector<8x8x8xbf16>
    %c0_58 = arith.constant 0 : index
    %c1_59 = arith.constant 1 : index
    %c2_60 = arith.constant 2 : index
    %c0_61 = arith.constant 0 : index
    %c0_62 = arith.constant 0 : index
    %46 = vector.load %arg4[%c0_58, %c1_59, %c2_60, %c0_61, %c0_62] : memref<1x3x3x8x8xbf16, #tpu.memory_space<vmem>>, vector<1x1x1x8x8xbf16>
    %47 = vector.shape_cast %46 : vector<1x1x1x8x8xbf16> to vector<8x8xbf16>
    %48 = vector.shape_cast %47 : vector<8x8xbf16> to vector<1x8x8xbf16>
    %49 = vector.broadcast %48 : vector<1x8x8xbf16> to vector<8x8x8xbf16>
    "tpu.trace_start"() <{level = 10 : i32, message = "hwc,hco->hwo"}> : () -> ()
    %cst_63 = arith.constant dense<0.000000e+00> : vector<8x8x8xf32>
    %50 = tpu.matmul %45, %49, %cst_63 {dimension_numbers = #tpu.dot_dimension_numbers<[2], [1], [1], [2], [0, 0, 0, 1, 1, 2], [0], [0]>} : vector<8x8x8xbf16>, vector<8x8x8xbf16>, vector<8x8x8xf32> -> vector<8x8x8xf32>
    "tpu.trace_stop"() : () -> ()
    %51 = arith.addf %43, %50 : vector<8x8x8xf32>
    %c0_64 = arith.constant 0 : index
    %c0_65 = arith.constant 0 : index
    %c2_66 = arith.constant 2 : index
    %c0_67 = arith.constant 0 : index
    %c0_68 = arith.constant 0 : index
    %52 = vector.load %arg3[%c0_64, %c0_65, %c2_66, %c0_67, %c0_68] : memref<1x1x10x10x8xbf16, #tpu.memory_space<vmem>>, vector<1x1x8x8x8xbf16>
    %53 = vector.shape_cast %52 : vector<1x1x8x8x8xbf16> to vector<8x8x8xbf16>
    %c0_69 = arith.constant 0 : index
    %c2_70 = arith.constant 2 : index
    %c0_71 = arith.constant 0 : index
    %c0_72 = arith.constant 0 : index
    %c0_73 = arith.constant 0 : index
    %54 = vector.load %arg4[%c0_69, %c2_70, %c0_71, %c0_72, %c0_73] : memref<1x3x3x8x8xbf16, #tpu.memory_space<vmem>>, vector<1x1x1x8x8xbf16>
    %55 = vector.shape_cast %54 : vector<1x1x1x8x8xbf16> to vector<8x8xbf16>
    %56 = vector.shape_cast %55 : vector<8x8xbf16> to vector<1x8x8xbf16>
    %57 = vector.broadcast %56 : vector<1x8x8xbf16> to vector<8x8x8xbf16>
    "tpu.trace_start"() <{level = 10 : i32, message = "hwc,hco->hwo"}> : () -> ()
    %cst_74 = arith.constant dense<0.000000e+00> : vector<8x8x8xf32>
    %58 = tpu.matmul %53, %57, %cst_74 {dimension_numbers = #tpu.dot_dimension_numbers<[2], [1], [1], [2], [0, 0, 0, 1, 1, 2], [0], [0]>} : vector<8x8x8xbf16>, vector<8x8x8xbf16>, vector<8x8x8xf32> -> vector<8x8x8xf32>
    "tpu.trace_stop"() : () -> ()
    %59 = arith.addf %51, %58 : vector<8x8x8xf32>
    %c0_75 = arith.constant 0 : index
    %c0_76 = arith.constant 0 : index
    %c2_77 = arith.constant 2 : index
    %c1_78 = arith.constant 1 : index
    %c0_79 = arith.constant 0 : index
    %60 = vector.load %arg3[%c0_75, %c0_76, %c2_77, %c1_78, %c0_79] : memref<1x1x10x10x8xbf16, #tpu.memory_space<vmem>>, vector<1x1x8x8x8xbf16>
    %61 = vector.shape_cast %60 : vector<1x1x8x8x8xbf16> to vector<8x8x8xbf16>
    %c0_80 = arith.constant 0 : index
    %c2_81 = arith.constant 2 : index
    %c1_82 = arith.constant 1 : index
    %c0_83 = arith.constant 0 : index
    %c0_84 = arith.constant 0 : index
    %62 = vector.load %arg4[%c0_80, %c2_81, %c1_82, %c0_83, %c0_84] : memref<1x3x3x8x8xbf16, #tpu.memory_space<vmem>>, vector<1x1x1x8x8xbf16>
    %63 = vector.shape_cast %62 : vector<1x1x1x8x8xbf16> to vector<8x8xbf16>
    %64 = vector.shape_cast %63 : vector<8x8xbf16> to vector<1x8x8xbf16>
    %65 = vector.broadcast %64 : vector<1x8x8xbf16> to vector<8x8x8xbf16>
    "tpu.trace_start"() <{level = 10 : i32, message = "hwc,hco->hwo"}> : () -> ()
    %cst_85 = arith.constant dense<0.000000e+00> : vector<8x8x8xf32>
    %66 = tpu.matmul %61, %65, %cst_85 {dimension_numbers = #tpu.dot_dimension_numbers<[2], [1], [1], [2], [0, 0, 0, 1, 1, 2], [0], [0]>} : vector<8x8x8xbf16>, vector<8x8x8xbf16>, vector<8x8x8xf32> -> vector<8x8x8xf32>
    "tpu.trace_stop"() : () -> ()
    %67 = arith.addf %59, %66 : vector<8x8x8xf32>
    %c0_86 = arith.constant 0 : index
    %c0_87 = arith.constant 0 : index
    %c2_88 = arith.constant 2 : index
    %c2_89 = arith.constant 2 : index
    %c0_90 = arith.constant 0 : index
    %68 = vector.load %arg3[%c0_86, %c0_87, %c2_88, %c2_89, %c0_90] : memref<1x1x10x10x8xbf16, #tpu.memory_space<vmem>>, vector<1x1x8x8x8xbf16>
    %69 = vector.shape_cast %68 : vector<1x1x8x8x8xbf16> to vector<8x8x8xbf16>
    %c0_91 = arith.constant 0 : index
    %c2_92 = arith.constant 2 : index
    %c2_93 = arith.constant 2 : index
    %c0_94 = arith.constant 0 : index
    %c0_95 = arith.constant 0 : index
    %70 = vector.load %arg4[%c0_91, %c2_92, %c2_93, %c0_94, %c0_95] : memref<1x3x3x8x8xbf16, #tpu.memory_space<vmem>>, vector<1x1x1x8x8xbf16>
    %71 = vector.shape_cast %70 : vector<1x1x1x8x8xbf16> to vector<8x8xbf16>
    %72 = vector.shape_cast %71 : vector<8x8xbf16> to vector<1x8x8xbf16>
    %73 = vector.broadcast %72 : vector<1x8x8xbf16> to vector<8x8x8xbf16>
    "tpu.trace_start"() <{level = 10 : i32, message = "hwc,hco->hwo"}> : () -> ()
    %cst_96 = arith.constant dense<0.000000e+00> : vector<8x8x8xf32>
    %74 = tpu.matmul %69, %73, %cst_96 {dimension_numbers = #tpu.dot_dimension_numbers<[2], [1], [1], [2], [0, 0, 0, 1, 1, 2], [0], [0]>} : vector<8x8x8xbf16>, vector<8x8x8xbf16>, vector<8x8x8xf32> -> vector<8x8x8xf32>
    "tpu.trace_stop"() : () -> ()
    %75 = arith.addf %67, %74 : vector<8x8x8xf32>
    %c0_97 = arith.constant 0 : index
    %c0_98 = arith.constant 0 : index
    %c0_99 = arith.constant 0 : index
    %76 = vector.load %arg7[%c0_97, %c0_98, %c0_99] : memref<8x8x8xf32, #tpu.memory_space<vmem>>, vector<8x8x8xf32>
    %77 = arith.addf %76, %75 : vector<8x8x8xf32>
    %c0_100 = arith.constant 0 : index
    %c0_101 = arith.constant 0 : index
    %c0_102 = arith.constant 0 : index
    %78 = vector.load %arg7[%c0_100, %c0_101, %c0_102] : memref<8x8x8xf32, #tpu.memory_space<vmem>>, vector<8x8x8xf32>
    tpu.vector_store %arg7[%c0_100, %c0_101, %c0_102], %77 {strides = array<i32>} : memref<8x8x8xf32, #tpu.memory_space<vmem>>, vector<8x8x8xf32>,
    %c2_i32 = arith.constant 2 : i32
    %79 = arith.cmpi eq, %arg2, %c2_i32 : i32
    %80 = arith.extui %79 : i1 to i32
    %c0_i32_103 = arith.constant 0 : i32
    %81 = arith.cmpi ne, %80, %c0_i32_103 : i32
    scf.if %81 {
      %c0_104 = arith.constant 0 : index
      %c0_105 = arith.constant 0 : index
      %c0_106 = arith.constant 0 : index
      %82 = vector.load %arg7[%c0_104, %c0_105, %c0_106] : memref<8x8x8xf32, #tpu.memory_space<vmem>>, vector<8x8x8xf32>
      %cst_107 = arith.constant 0.000000e+00 : f32
      %83 = vector.broadcast %cst_107 : f32 to vector<8x8x8xf32>
      %84 = arith.maximumf %82, %83 : vector<8x8x8xf32>
      %c0_108 = arith.constant 0 : index
      %c0_109 = arith.constant 0 : index
      %c0_110 = arith.constant 0 : index
      %c0_111 = arith.constant 0 : index
      %c0_112 = arith.constant 0 : index
      %85 = vector.load %arg6[%c0_108, %c0_109, %c0_110, %c0_111, %c0_112] : memref<1x1x8x8x8xf32, #tpu.memory_space<vmem>>, vector<1x1x8x8x8xf32>
      %86 = vector.shape_cast %85 : vector<1x1x8x8x8xf32> to vector<8x8x8xf32>
      %87 = vector.shape_cast %84 : vector<8x8x8xf32> to vector<1x1x8x8x8xf32>
      tpu.vector_store %arg6[%c0_108, %c0_109, %c0_110, %c0_111, %c0_112], %87 {strides = array<i32>} : memref<1x1x8x8x8xf32, #tpu.memory_space<vmem>>, vector<1x1x8x8x8xf32>,
    } else {
    }
    return
  }
  func.func @transform_0(%arg0: i32, %arg1: i32, %arg2: i32) -> (i32, i32, i32, i32, i32) {
    %c1_i32 = arith.constant 1 : i32
    %0 = arith.muli %arg1, %c1_i32 : i32
    %1 = arith.addi %0, %arg2 : i32
    %c0_i32 = arith.constant 0 : i32
    %c0_i32_0 = arith.constant 0 : i32
    %c0_i32_1 = arith.constant 0 : i32
    %c0_i32_2 = arith.constant 0 : i32
    return %arg0, %1, %c0_i32, %c0_i32_0, %c0_i32_1 : i32, i32, i32, i32, i32
  }
  func.func @transform_1(%arg0: i32, %arg1: i32, %arg2: i32) -> (i32, i32, i32, i32, i32) {
    %c0_i32 = arith.constant 0 : i32
    %c0_i32_0 = arith.constant 0 : i32
    %c0_i32_1 = arith.constant 0 : i32
    %c0_i32_2 = arith.constant 0 : i32
    %c0_i32_3 = arith.constant 0 : i32
    return %arg2, %c0_i32, %c0_i32_0, %c0_i32_1, %c0_i32_2 : i32, i32, i32, i32, i32
  }
  func.func @transform_2(%arg0: i32, %arg1: i32, %arg2: i32) -> (i32, i32, i32) {
    %c0_i32 = arith.constant 0 : i32
    %c0_i32_0 = arith.constant 0 : i32
    %c0_i32_1 = arith.constant 0 : i32
    %c0_i32_2 = arith.constant 0 : i32
    return %c0_i32, %c0_i32_0, %c0_i32_1 : i32, i32, i32
  }
  func.func @transform_3(%arg0: i32, %arg1: i32, %arg2: i32) -> (i32, i32, i32, i32, i32) {
    %c0_i32 = arith.constant 0 : i32
    %c0_i32_0 = arith.constant 0 : i32
    %c0_i32_1 = arith.constant 0 : i32
    %c0_i32_2 = arith.constant 0 : i32
    return %arg0, %arg1, %c0_i32, %c0_i32_0, %c0_i32_1 : i32, i32, i32, i32, i32
  }
}

module attributes {stable_mosaic.version = 11 : i64} {
  func.func @_conv_kernel(%arg0: i32, %arg1: i32, %arg2: i32, %arg3: memref<1x1x10x10x8xbf16, #tpu.memory_space<vmem>>, %arg4: memref<1x3x3x8x8xbf16, #tpu.memory_space<vmem>>, %arg5: memref<1x1x8xf32, #tpu.memory_space<vmem>>, %arg6: memref<1x1x8x8x8xf32, #tpu.memory_space<vmem>>, %arg7: memref<1x1x8x8x8xf32, #tpu.memory_space<vmem>>, %arg8: memref<8x8x8xf32, #tpu.memory_space<vmem>>) attributes {dimension_semantics = [#tpu.dimension_semantics<parallel>, #tpu.dimension_semantics<parallel>, #tpu.dimension_semantics<arbitrary>], iteration_bounds = array<i64: 2, 8, 3>, scalar_prefetch = 0 : i64, scratch_operands = 1 : i64, tpu.core_type = #tpu.core_type<tc>, window_params = [{transform_indices = @transform_0, window_bounds = array<i64: 1, 1, 10, 10, 8>}, {transform_indices = @transform_1, window_bounds = array<i64: 1, 3, 3, 8, 8>}, {pipeline_mode = #tpu.pipeline_mode<synchronous>, transform_indices = @transform_2, window_bounds = array<i64: 1, 1, 8>}, {transform_indices = @transform_3, window_bounds = array<i64: 1, 1, 8, 8, 8>}, {transform_indices = @transform_4, window_bounds = array<i64: 1, 1, 8, 8, 8>}]} {
    %c0_i32 = arith.constant 0 : i32
    %0 = arith.cmpi eq, %arg2, %c0_i32 : i32
    %1 = arith.extui %0 : i1 to i32
    %c0_i32_0 = arith.constant 0 : i32
    %2 = arith.cmpi ne, %1, %c0_i32_0 : i32
    scf.if %2 {
      %c0_104 = arith.constant 0 : index
      %c0_105 = arith.constant 0 : index
      %c0_106 = arith.constant 0 : index
      %c0_107 = arith.constant 0 : index
      %c0_108 = arith.constant 0 : index
      %82 = vector.load %arg6[%c0_104, %c0_105, %c0_106, %c0_107, %c0_108] : memref<1x1x8x8x8xf32, #tpu.memory_space<vmem>>, vector<1x1x8x8x8xf32>
      %83 = vector.shape_cast %82 : vector<1x1x8x8x8xf32> to vector<8x8x8xf32>
      %c0_109 = arith.constant 0 : index
      %c0_110 = arith.constant 0 : index
      %c0_111 = arith.constant 0 : index
      %84 = vector.load %arg5[%c0_109, %c0_110, %c0_111] : memref<1x1x8xf32, #tpu.memory_space<vmem>>, vector<1x1x8xf32>
      %85 = vector.broadcast %84 : vector<1x1x8xf32> to vector<8x8x8xf32>
      %86 = arith.addf %83, %85 : vector<8x8x8xf32>
      %c0_112 = arith.constant 0 : index
      %c0_113 = arith.constant 0 : index
      %c0_114 = arith.constant 0 : index
      %87 = vector.load %arg8[%c0_112, %c0_113, %c0_114] : memref<8x8x8xf32, #tpu.memory_space<vmem>>, vector<8x8x8xf32>
      tpu.vector_store %arg8[%c0_112, %c0_113, %c0_114], %86 {strides = array<i32>} : memref<8x8x8xf32, #tpu.memory_space<vmem>>, vector<8x8x8xf32>,
    } else {
    }
    %cst = arith.constant 0.000000e+00 : f32
    %3 = vector.broadcast %cst : f32 to vector<8x8x8xf32>
    %c0 = arith.constant 0 : index
    %c0_1 = arith.constant 0 : index
    %c0_2 = arith.constant 0 : index
    %c0_3 = arith.constant 0 : index
    %c0_4 = arith.constant 0 : index
    %4 = vector.load %arg3[%c0, %c0_1, %c0_2, %c0_3, %c0_4] : memref<1x1x10x10x8xbf16, #tpu.memory_space<vmem>>, vector<1x1x8x8x8xbf16>
    %5 = vector.shape_cast %4 : vector<1x1x8x8x8xbf16> to vector<8x8x8xbf16>
    %c0_5 = arith.constant 0 : index
    %c0_6 = arith.constant 0 : index
    %c0_7 = arith.constant 0 : index
    %c0_8 = arith.constant 0 : index
    %c0_9 = arith.constant 0 : index
    %6 = vector.load %arg4[%c0_5, %c0_6, %c0_7, %c0_8, %c0_9] : memref<1x3x3x8x8xbf16, #tpu.memory_space<vmem>>, vector<1x1x1x8x8xbf16>
    %7 = vector.shape_cast %6 : vector<1x1x1x8x8xbf16> to vector<8x8xbf16>
    %8 = vector.shape_cast %7 : vector<8x8xbf16> to vector<1x8x8xbf16>
    %9 = vector.broadcast %8 : vector<1x8x8xbf16> to vector<8x8x8xbf16>
    "tpu.trace_start"() <{level = 10 : i32, message = "hwc,hco->hwo"}> : () -> ()
    %cst_10 = arith.constant dense<0.000000e+00> : vector<8x8x8xf32>
    %10 = tpu.matmul %5, %9, %cst_10 {dimension_numbers = #tpu.dot_dimension_numbers<[2], [1], [1], [2], [0, 0, 0, 1, 1, 2], [0], [0]>} : vector<8x8x8xbf16>, vector<8x8x8xbf16>, vector<8x8x8xf32> -> vector<8x8x8xf32>
    "tpu.trace_stop"() : () -> ()
    %11 = arith.addf %3, %10 : vector<8x8x8xf32>
    %c0_11 = arith.constant 0 : index
    %c0_12 = arith.constant 0 : index
    %c0_13 = arith.constant 0 : index
    %c1 = arith.constant 1 : index
    %c0_14 = arith.constant 0 : index
    %12 = vector.load %arg3[%c0_11, %c0_12, %c0_13, %c1, %c0_14] : memref<1x1x10x10x8xbf16, #tpu.memory_space<vmem>>, vector<1x1x8x8x8xbf16>
    %13 = vector.shape_cast %12 : vector<1x1x8x8x8xbf16> to vector<8x8x8xbf16>
    %c0_15 = arith.constant 0 : index
    %c0_16 = arith.constant 0 : index
    %c1_17 = arith.constant 1 : index
    %c0_18 = arith.constant 0 : index
    %c0_19 = arith.constant 0 : index
    %14 = vector.load %arg4[%c0_15, %c0_16, %c1_17, %c0_18, %c0_19] : memref<1x3x3x8x8xbf16, #tpu.memory_space<vmem>>, vector<1x1x1x8x8xbf16>
    %15 = vector.shape_cast %14 : vector<1x1x1x8x8xbf16> to vector<8x8xbf16>
    %16 = vector.shape_cast %15 : vector<8x8xbf16> to vector<1x8x8xbf16>
    %17 = vector.broadcast %16 : vector<1x8x8xbf16> to vector<8x8x8xbf16>
    "tpu.trace_start"() <{level = 10 : i32, message = "hwc,hco->hwo"}> : () -> ()
    %cst_20 = arith.constant dense<0.000000e+00> : vector<8x8x8xf32>
    %18 = tpu.matmul %13, %17, %cst_20 {dimension_numbers = #tpu.dot_dimension_numbers<[2], [1], [1], [2], [0, 0, 0, 1, 1, 2], [0], [0]>} : vector<8x8x8xbf16>, vector<8x8x8xbf16>, vector<8x8x8xf32> -> vector<8x8x8xf32>
    "tpu.trace_stop"() : () -> ()
    %19 = arith.addf %11, %18 : vector<8x8x8xf32>
    %c0_21 = arith.constant 0 : index
    %c0_22 = arith.constant 0 : index
    %c0_23 = arith.constant 0 : index
    %c2 = arith.constant 2 : index
    %c0_24 = arith.constant 0 : index
    %20 = vector.load %arg3[%c0_21, %c0_22, %c0_23, %c2, %c0_24] : memref<1x1x10x10x8xbf16, #tpu.memory_space<vmem>>, vector<1x1x8x8x8xbf16>
    %21 = vector.shape_cast %20 : vector<1x1x8x8x8xbf16> to vector<8x8x8xbf16>
    %c0_25 = arith.constant 0 : index
    %c0_26 = arith.constant 0 : index
    %c2_27 = arith.constant 2 : index
    %c0_28 = arith.constant 0 : index
    %c0_29 = arith.constant 0 : index
    %22 = vector.load %arg4[%c0_25, %c0_26, %c2_27, %c0_28, %c0_29] : memref<1x3x3x8x8xbf16, #tpu.memory_space<vmem>>, vector<1x1x1x8x8xbf16>
    %23 = vector.shape_cast %22 : vector<1x1x1x8x8xbf16> to vector<8x8xbf16>
    %24 = vector.shape_cast %23 : vector<8x8xbf16> to vector<1x8x8xbf16>
    %25 = vector.broadcast %24 : vector<1x8x8xbf16> to vector<8x8x8xbf16>
    "tpu.trace_start"() <{level = 10 : i32, message = "hwc,hco->hwo"}> : () -> ()
    %cst_30 = arith.constant dense<0.000000e+00> : vector<8x8x8xf32>
    %26 = tpu.matmul %21, %25, %cst_30 {dimension_numbers = #tpu.dot_dimension_numbers<[2], [1], [1], [2], [0, 0, 0, 1, 1, 2], [0], [0]>} : vector<8x8x8xbf16>, vector<8x8x8xbf16>, vector<8x8x8xf32> -> vector<8x8x8xf32>
    "tpu.trace_stop"() : () -> ()
    %27 = arith.addf %19, %26 : vector<8x8x8xf32>
    %c0_31 = arith.constant 0 : index
    %c0_32 = arith.constant 0 : index
    %c1_33 = arith.constant 1 : index
    %c0_34 = arith.constant 0 : index
    %c0_35 = arith.constant 0 : index
    %28 = vector.load %arg3[%c0_31, %c0_32, %c1_33, %c0_34, %c0_35] : memref<1x1x10x10x8xbf16, #tpu.memory_space<vmem>>, vector<1x1x8x8x8xbf16>
    %29 = vector.shape_cast %28 : vector<1x1x8x8x8xbf16> to vector<8x8x8xbf16>
    %c0_36 = arith.constant 0 : index
    %c1_37 = arith.constant 1 : index
    %c0_38 = arith.constant 0 : index
    %c0_39 = arith.constant 0 : index
    %c0_40 = arith.constant 0 : index
    %30 = vector.load %arg4[%c0_36, %c1_37, %c0_38, %c0_39, %c0_40] : memref<1x3x3x8x8xbf16, #tpu.memory_space<vmem>>, vector<1x1x1x8x8xbf16>
    %31 = vector.shape_cast %30 : vector<1x1x1x8x8xbf16> to vector<8x8xbf16>
    %32 = vector.shape_cast %31 : vector<8x8xbf16> to vector<1x8x8xbf16>
    %33 = vector.broadcast %32 : vector<1x8x8xbf16> to vector<8x8x8xbf16>
    "tpu.trace_start"() <{level = 10 : i32, message = "hwc,hco->hwo"}> : () -> ()
    %cst_41 = arith.constant dense<0.000000e+00> : vector<8x8x8xf32>
    %34 = tpu.matmul %29, %33, %cst_41 {dimension_numbers = #tpu.dot_dimension_numbers<[2], [1], [1], [2], [0, 0, 0, 1, 1, 2], [0], [0]>} : vector<8x8x8xbf16>, vector<8x8x8xbf16>, vector<8x8x8xf32> -> vector<8x8x8xf32>
    "tpu.trace_stop"() : () -> ()
    %35 = arith.addf %27, %34 : vector<8x8x8xf32>
    %c0_42 = arith.constant 0 : index
    %c0_43 = arith.constant 0 : index
    %c1_44 = arith.constant 1 : index
    %c1_45 = arith.constant 1 : index
    %c0_46 = arith.constant 0 : index
    %36 = vector.load %arg3[%c0_42, %c0_43, %c1_44, %c1_45, %c0_46] : memref<1x1x10x10x8xbf16, #tpu.memory_space<vmem>>, vector<1x1x8x8x8xbf16>
    %37 = vector.shape_cast %36 : vector<1x1x8x8x8xbf16> to vector<8x8x8xbf16>
    %c0_47 = arith.constant 0 : index
    %c1_48 = arith.constant 1 : index
    %c1_49 = arith.constant 1 : index
    %c0_50 = arith.constant 0 : index
    %c0_51 = arith.constant 0 : index
    %38 = vector.load %arg4[%c0_47, %c1_48, %c1_49, %c0_50, %c0_51] : memref<1x3x3x8x8xbf16, #tpu.memory_space<vmem>>, vector<1x1x1x8x8xbf16>
    %39 = vector.shape_cast %38 : vector<1x1x1x8x8xbf16> to vector<8x8xbf16>
    %40 = vector.shape_cast %39 : vector<8x8xbf16> to vector<1x8x8xbf16>
    %41 = vector.broadcast %40 : vector<1x8x8xbf16> to vector<8x8x8xbf16>
    "tpu.trace_start"() <{level = 10 : i32, message = "hwc,hco->hwo"}> : () -> ()
    %cst_52 = arith.constant dense<0.000000e+00> : vector<8x8x8xf32>
    %42 = tpu.matmul %37, %41, %cst_52 {dimension_numbers = #tpu.dot_dimension_numbers<[2], [1], [1], [2], [0, 0, 0, 1, 1, 2], [0], [0]>} : vector<8x8x8xbf16>, vector<8x8x8xbf16>, vector<8x8x8xf32> -> vector<8x8x8xf32>
    "tpu.trace_stop"() : () -> ()
    %43 = arith.addf %35, %42 : vector<8x8x8xf32>
    %c0_53 = arith.constant 0 : index
    %c0_54 = arith.constant 0 : index
    %c1_55 = arith.constant 1 : index
    %c2_56 = arith.constant 2 : index
    %c0_57 = arith.constant 0 : index
    %44 = vector.load %arg3[%c0_53, %c0_54, %c1_55, %c2_56, %c0_57] : memref<1x1x10x10x8xbf16, #tpu.memory_space<vmem>>, vector<1x1x8x8x8xbf16>
    %45 = vector.shape_cast %44 : vector<1x1x8x8x8xbf16> to vector<8x8x8xbf16>
    %c0_58 = arith.constant 0 : index
    %c1_59 = arith.constant 1 : index
    %c2_60 = arith.constant 2 : index
    %c0_61 = arith.constant 0 : index
    %c0_62 = arith.constant 0 : index
    %46 = vector.load %arg4[%c0_58, %c1_59, %c2_60, %c0_61, %c0_62] : memref<1x3x3x8x8xbf16, #tpu.memory_space<vmem>>, vector<1x1x1x8x8xbf16>
    %47 = vector.shape_cast %46 : vector<1x1x1x8x8xbf16> to vector<8x8xbf16>
    %48 = vector.shape_cast %47 : vector<8x8xbf16> to vector<1x8x8xbf16>
    %49 = vector.broadcast %48 : vector<1x8x8xbf16> to vector<8x8x8xbf16>
    "tpu.trace_start"() <{level = 10 : i32, message = "hwc,hco->hwo"}> : () -> ()
    %cst_63 = arith.constant dense<0.000000e+00> : vector<8x8x8xf32>
    %50 = tpu.matmul %45, %49, %cst_63 {dimension_numbers = #tpu.dot_dimension_numbers<[2], [1], [1], [2], [0, 0, 0, 1, 1, 2], [0], [0]>} : vector<8x8x8xbf16>, vector<8x8x8xbf16>, vector<8x8x8xf32> -> vector<8x8x8xf32>
    "tpu.trace_stop"() : () -> ()
    %51 = arith.addf %43, %50 : vector<8x8x8xf32>
    %c0_64 = arith.constant 0 : index
    %c0_65 = arith.constant 0 : index
    %c2_66 = arith.constant 2 : index
    %c0_67 = arith.constant 0 : index
    %c0_68 = arith.constant 0 : index
    %52 = vector.load %arg3[%c0_64, %c0_65, %c2_66, %c0_67, %c0_68] : memref<1x1x10x10x8xbf16, #tpu.memory_space<vmem>>, vector<1x1x8x8x8xbf16>
    %53 = vector.shape_cast %52 : vector<1x1x8x8x8xbf16> to vector<8x8x8xbf16>
    %c0_69 = arith.constant 0 : index
    %c2_70 = arith.constant 2 : index
    %c0_71 = arith.constant 0 : index
    %c0_72 = arith.constant 0 : index
    %c0_73 = arith.constant 0 : index
    %54 = vector.load %arg4[%c0_69, %c2_70, %c0_71, %c0_72, %c0_73] : memref<1x3x3x8x8xbf16, #tpu.memory_space<vmem>>, vector<1x1x1x8x8xbf16>
    %55 = vector.shape_cast %54 : vector<1x1x1x8x8xbf16> to vector<8x8xbf16>
    %56 = vector.shape_cast %55 : vector<8x8xbf16> to vector<1x8x8xbf16>
    %57 = vector.broadcast %56 : vector<1x8x8xbf16> to vector<8x8x8xbf16>
    "tpu.trace_start"() <{level = 10 : i32, message = "hwc,hco->hwo"}> : () -> ()
    %cst_74 = arith.constant dense<0.000000e+00> : vector<8x8x8xf32>
    %58 = tpu.matmul %53, %57, %cst_74 {dimension_numbers = #tpu.dot_dimension_numbers<[2], [1], [1], [2], [0, 0, 0, 1, 1, 2], [0], [0]>} : vector<8x8x8xbf16>, vector<8x8x8xbf16>, vector<8x8x8xf32> -> vector<8x8x8xf32>
    "tpu.trace_stop"() : () -> ()
    %59 = arith.addf %51, %58 : vector<8x8x8xf32>
    %c0_75 = arith.constant 0 : index
    %c0_76 = arith.constant 0 : index
    %c2_77 = arith.constant 2 : index
    %c1_78 = arith.constant 1 : index
    %c0_79 = arith.constant 0 : index
    %60 = vector.load %arg3[%c0_75, %c0_76, %c2_77, %c1_78, %c0_79] : memref<1x1x10x10x8xbf16, #tpu.memory_space<vmem>>, vector<1x1x8x8x8xbf16>
    %61 = vector.shape_cast %60 : vector<1x1x8x8x8xbf16> to vector<8x8x8xbf16>
    %c0_80 = arith.constant 0 : index
    %c2_81 = arith.constant 2 : index
    %c1_82 = arith.constant 1 : index
    %c0_83 = arith.constant 0 : index
    %c0_84 = arith.constant 0 : index
    %62 = vector.load %arg4[%c0_80, %c2_81, %c1_82, %c0_83, %c0_84] : memref<1x3x3x8x8xbf16, #tpu.memory_space<vmem>>, vector<1x1x1x8x8xbf16>
    %63 = vector.shape_cast %62 : vector<1x1x1x8x8xbf16> to vector<8x8xbf16>
    %64 = vector.shape_cast %63 : vector<8x8xbf16> to vector<1x8x8xbf16>
    %65 = vector.broadcast %64 : vector<1x8x8xbf16> to vector<8x8x8xbf16>
    "tpu.trace_start"() <{level = 10 : i32, message = "hwc,hco->hwo"}> : () -> ()
    %cst_85 = arith.constant dense<0.000000e+00> : vector<8x8x8xf32>
    %66 = tpu.matmul %61, %65, %cst_85 {dimension_numbers = #tpu.dot_dimension_numbers<[2], [1], [1], [2], [0, 0, 0, 1, 1, 2], [0], [0]>} : vector<8x8x8xbf16>, vector<8x8x8xbf16>, vector<8x8x8xf32> -> vector<8x8x8xf32>
    "tpu.trace_stop"() : () -> ()
    %67 = arith.addf %59, %66 : vector<8x8x8xf32>
    %c0_86 = arith.constant 0 : index
    %c0_87 = arith.constant 0 : index
    %c2_88 = arith.constant 2 : index
    %c2_89 = arith.constant 2 : index
    %c0_90 = arith.constant 0 : index
    %68 = vector.load %arg3[%c0_86, %c0_87, %c2_88, %c2_89, %c0_90] : memref<1x1x10x10x8xbf16, #tpu.memory_space<vmem>>, vector<1x1x8x8x8xbf16>
    %69 = vector.shape_cast %68 : vector<1x1x8x8x8xbf16> to vector<8x8x8xbf16>
    %c0_91 = arith.constant 0 : index
    %c2_92 = arith.constant 2 : index
    %c2_93 = arith.constant 2 : index
    %c0_94 = arith.constant 0 : index
    %c0_95 = arith.constant 0 : index
    %70 = vector.load %arg4[%c0_91, %c2_92, %c2_93, %c0_94, %c0_95] : memref<1x3x3x8x8xbf16, #tpu.memory_space<vmem>>, vector<1x1x1x8x8xbf16>
    %71 = vector.shape_cast %70 : vector<1x1x1x8x8xbf16> to vector<8x8xbf16>
    %72 = vector.shape_cast %71 : vector<8x8xbf16> to vector<1x8x8xbf16>
    %73 = vector.broadcast %72 : vector<1x8x8xbf16> to vector<8x8x8xbf16>
    "tpu.trace_start"() <{level = 10 : i32, message = "hwc,hco->hwo"}> : () -> ()
    %cst_96 = arith.constant dense<0.000000e+00> : vector<8x8x8xf32>
    %74 = tpu.matmul %69, %73, %cst_96 {dimension_numbers = #tpu.dot_dimension_numbers<[2], [1], [1], [2], [0, 0, 0, 1, 1, 2], [0], [0]>} : vector<8x8x8xbf16>, vector<8x8x8xbf16>, vector<8x8x8xf32> -> vector<8x8x8xf32>
    "tpu.trace_stop"() : () -> ()
    %75 = arith.addf %67, %74 : vector<8x8x8xf32>
    %c0_97 = arith.constant 0 : index
    %c0_98 = arith.constant 0 : index
    %c0_99 = arith.constant 0 : index
    %76 = vector.load %arg8[%c0_97, %c0_98, %c0_99] : memref<8x8x8xf32, #tpu.memory_space<vmem>>, vector<8x8x8xf32>
    %77 = arith.addf %76, %75 : vector<8x8x8xf32>
    %c0_100 = arith.constant 0 : index
    %c0_101 = arith.constant 0 : index
    %c0_102 = arith.constant 0 : index
    %78 = vector.load %arg8[%c0_100, %c0_101, %c0_102] : memref<8x8x8xf32, #tpu.memory_space<vmem>>, vector<8x8x8xf32>
    tpu.vector_store %arg8[%c0_100, %c0_101, %c0_102], %77 {strides = array<i32>} : memref<8x8x8xf32, #tpu.memory_space<vmem>>, vector<8x8x8xf32>,
    %c2_i32 = arith.constant 2 : i32
    %79 = arith.cmpi eq, %arg2, %c2_i32 : i32
    %80 = arith.extui %79 : i1 to i32
    %c0_i32_103 = arith.constant 0 : i32
    %81 = arith.cmpi ne, %80, %c0_i32_103 : i32
    scf.if %81 {
      %c0_104 = arith.constant 0 : index
      %c0_105 = arith.constant 0 : index
      %c0_106 = arith.constant 0 : index
      %82 = vector.load %arg8[%c0_104, %c0_105, %c0_106] : memref<8x8x8xf32, #tpu.memory_space<vmem>>, vector<8x8x8xf32>
      %c0_107 = arith.constant 0 : index
      %c0_108 = arith.constant 0 : index
      %c0_109 = arith.constant 0 : index
      %c0_110 = arith.constant 0 : index
      %c0_111 = arith.constant 0 : index
      %83 = vector.load %arg7[%c0_107, %c0_108, %c0_109, %c0_110, %c0_111] : memref<1x1x8x8x8xf32, #tpu.memory_space<vmem>>, vector<1x1x8x8x8xf32>
      %84 = vector.shape_cast %83 : vector<1x1x8x8x8xf32> to vector<8x8x8xf32>
      %85 = vector.shape_cast %82 : vector<8x8x8xf32> to vector<1x1x8x8x8xf32>
      tpu.vector_store %arg7[%c0_107, %c0_108, %c0_109, %c0_110, %c0_111], %85 {strides = array<i32>} : memref<1x1x8x8x8xf32, #tpu.memory_space<vmem>>, vector<1x1x8x8x8xf32>,
    } else {
    }
    return
  }
  func.func @transform_0(%arg0: i32, %arg1: i32, %arg2: i32) -> (i32, i32, i32, i32, i32) {
    %c1_i32 = arith.constant 1 : i32
    %0 = arith.muli %arg1, %c1_i32 : i32
    %1 = arith.addi %0, %arg2 : i32
    %c0_i32 = arith.constant 0 : i32
    %c0_i32_0 = arith.constant 0 : i32
    %c0_i32_1 = arith.constant 0 : i32
    %c0_i32_2 = arith.constant 0 : i32
    return %arg0, %1, %c0_i32, %c0_i32_0, %c0_i32_1 : i32, i32, i32, i32, i32
  }
  func.func @transform_1(%arg0: i32, %arg1: i32, %arg2: i32) -> (i32, i32, i32, i32, i32) {
    %c0_i32 = arith.constant 0 : i32
    %c0_i32_0 = arith.constant 0 : i32
    %c0_i32_1 = arith.constant 0 : i32
    %c0_i32_2 = arith.constant 0 : i32
    %c0_i32_3 = arith.constant 0 : i32
    return %arg2, %c0_i32, %c0_i32_0, %c0_i32_1, %c0_i32_2 : i32, i32, i32, i32, i32
  }
  func.func @transform_2(%arg0: i32, %arg1: i32, %arg2: i32) -> (i32, i32, i32) {
    %c0_i32 = arith.constant 0 : i32
    %c0_i32_0 = arith.constant 0 : i32
    %c0_i32_1 = arith.constant 0 : i32
    %c0_i32_2 = arith.constant 0 : i32
    return %c0_i32, %c0_i32_0, %c0_i32_1 : i32, i32, i32
  }
  func.func @transform_3(%arg0: i32, %arg1: i32, %arg2: i32) -> (i32, i32, i32, i32, i32) {
    %c0_i32 = arith.constant 0 : i32
    %c0_i32_0 = arith.constant 0 : i32
    %c0_i32_1 = arith.constant 0 : i32
    %c0_i32_2 = arith.constant 0 : i32
    return %arg0, %arg1, %c0_i32, %c0_i32_0, %c0_i32_1 : i32, i32, i32, i32, i32
  }
  func.func @transform_4(%arg0: i32, %arg1: i32, %arg2: i32) -> (i32, i32, i32, i32, i32) {
    %c0_i32 = arith.constant 0 : i32
    %c0_i32_0 = arith.constant 0 : i32
    %c0_i32_1 = arith.constant 0 : i32
    %c0_i32_2 = arith.constant 0 : i32
    return %arg0, %arg1, %c0_i32, %c0_i32_0, %c0_i32_1 : i32, i32, i32, i32, i32
  }
}

</mosaic_0001>

<bundles_post_ra>
// kernel: _lambda_.3
= control target key start
LH: loop header
LB: loop body
LE: loop exit
PB: predicated region body
PF: predicated region fallthrough
CT: control target
= control target key end

     0   :  { %s5158_s12 = smov 0   ;;  %s5160_s13 = smov 0   ;;  %s5725_s0 = inlined_call_operand.vmem [shape: bf16[2,10,10,10,4], index: 0, kind: input, shape index: {}]   ;;  %s5726_s1 = inlined_call_operand.vmem [shape: bf16[3,3,3,4,8], index: 1, kind: input, shape index: {}]   ;;  %s5727_s2 = inlined_call_operand.vmem [shape: f32[1,1,8], index: 2, kind: input, shape index: {}]   ;;  %s5728_s3 = inlined_call_operand.vmem [shape: f32[2,8,8,8,8], index: 3, kind: output, shape index: {}]  }
   0x1   :  { %s5162_s14 = smov 0   ;;  %s5164_s15 = smov 0  }
   0x2   :  { %s5166_s16 = smov 0   ;;  %s5168_s17 = smov 0  }
   0x3   :  { %s5170_s18 = smov 0  }
   0x4 LB: > { %s25_s19 = sadd.s32 1, %s5122_s15  ;;  %s28_s20 = sadd.s32 1, %s5126_s16  ;;  %s5134_s18 = sphi %s5170_s18, %s13_s18   ;;  %s5130_s17 = sphi %s5168_s17, %s5734_s17   ;;  %s5126_s16 = sphi %s5166_s16, %s5733_s16   ;;  %s5122_s15 = sphi %s5164_s15, %s5732_s15   ;;  %s5118_s14 = sphi %s5162_s14, %s5731_s14   ;;  %s5114_s13 = sphi %s5160_s13, %s5730_s13   ;;  %s5110_s12 = sphi %s5158_s12, %s5729_s12  }
   0x5   : > { %p26_p0 = scmp.ge.s32.totalorder %s25_s19, 3  ;;  %p4176_p1 = scmp.ge.s32.totalorder %s5134_s18, 1 }
   0x6   : > { %p178_p2 = scmp.lt.s32.totalorder %s5134_s18, 49  ;;  %s32_s21 = sadd.s32 1, %s5130_s17 }
   0x7   : > { %s5736_s19 = smov (%p26_p0, %s25_s19), 0  ;;  %s5738_s20 = smov (!%p26_p0, %s28_s20), %s5126_s16 }
   0x8   : > { %p179_p3 = pnand %p4176_p1, %p178_p2  ;;  %p30_p4 = scmp.ge.s32.totalorder %s5738_s20, 8 }
   0x9   : > { %s216_s22 = sadd.s32 (!%p179_p3), %s5110_s12, %s5114_s13  ;;  %p217_p6 = scmp.lt.s32.totalorder (!%p179_p3), %s5118_s14, 1 }
   0xa   : > { %s5740_s20 = smov (%p30_p4, %s5738_s20), 0  ;;  %s5742_s21 = smov (!%p30_p4, %s32_s21), %s5130_s17 }
   0xb   : > { %p34_p5 = scmp.ge.s32.totalorder %s5742_s21, 2  ;;  %182 = sbr.rel (%p179_p3) target bundleno = 546 (0x222), region = 32 }
   0xc   : > { %p219_p7 = scmp.lt.s32.totalorder (!%p179_p3), %s216_s22, 9  ;;  %p227_p8 = scmp.lt.s32.totalorder (!%p179_p3), %s5110_s12, 2 }
   0xd   : > { %s5744_s21 = smov (%p34_p5, %s5742_s21), 0  ;;  %p234_p9 = scmp.lt.s32.totalorder (!%p179_p3), %s5114_s13, 7 }
   0xe   : > { %p4182_p10 = scmp.ne.s32.totalorder (!%p179_p3), %s5110_s12, 0 }
  0x12   : > { %s5746_s14 = smov (!%p217_p6, %s5118_s14), 1  ;;  %s5748_s22 = smov (!%p219_p7, %s216_s22), 9 }
  0x13   : > { %s4972_s23 = smul.u32 200, %s5746_s14  ;;  %s4180_s8 = sshll.u32 %s5746_s14, 6  ;;  %v4183_v0 = vld [vmem:[%s5727_s2] ss:$0 sm:$0xff] (!%p4182_p10)  ;;  %vm253_vm0 = vcmask (!%p4182_p10), 64512  }
  0x14   : > { %s4971_s24 = smul.u32 20, %s5748_s22  ;;  %s5750_s13 = smov (!%p234_p9, %s5114_s13), 7  ;;  %254 = vst.msk [vmem:[#allocation2] sm:$0xff] (!%p4182_p10), %vm253_vm0, %v4183_v0  ;;  %255 = vst.msk [vmem:[#allocation2 + $0x8] sm:$0xff] (!%p4182_p10), %vm253_vm0, %v4183_v0 }
  0x15   : > { %s228_s25 = scalar_select %p227_p8, %s5110_s12, 2 }
  0x16   : > { %s223_s26 = sadd.s32 %s4972_s23, %s4971_s24  ;;  %s4179_s9 = sshll.u32 %s5750_s13, 3  ;;  %256 = vst.msk [vmem:[#allocation2 + $0x10] sm:$0xff] (!%p4182_p10), %vm253_vm0, %v4183_v0  ;;  %257 = vst.msk [vmem:[#allocation2 + $0x18] sm:$0xff] (!%p4182_p10), %vm253_vm0, %v4183_v0 }
  0x17   : > { %s4177_s27 = sshll.u32 %s223_s26, 2  ;;  %s4973_s28 = smul.u32 18, %s228_s25  ;;  %258 = vst.msk [vmem:[#allocation2 + $0x20] sm:$0xff] (!%p4182_p10), %vm253_vm0, %v4183_v0  ;;  %259 = vst.msk [vmem:[#allocation2 + $0x28] sm:$0xff] (!%p4182_p10), %vm253_vm0, %v4183_v0 }
  0x18   : > { %s5212_s4 = scalar_lea.vmem %s5725_s0, %s4177_s27  ;;  %s238_s10 = sadd.s32 %s4180_s8, %s4179_s9  ;;  %260 = vst.msk [vmem:[#allocation2 + $0x30] sm:$0xff] (!%p4182_p10), %vm253_vm0, %v4183_v0  ;;  %261 = vst.msk [vmem:[#allocation2 + $0x38] sm:$0xff] (!%p4182_p10), %vm253_vm0, %v4183_v0 }
  0x19   : > { %s5217_s7 = scalar_lea.vmem %s5726_s1, %s4973_s28  ;;  %s4181_s11 = sshll.u32 %s238_s10, 3 }
  0x1a   : > { %s5223_s24 = scalar_lea.vmem %s5728_s3, %s4181_s11  ;;  %245 = sbr.rel (%p4182_p10) target bundleno = 33 (0x21), region = 36 }
  0x21 PF: > { %v4184_v1 = vld [vmem:[%s5217_s7 + $0x2] sm:$0x3]  ;;  %vm305_vm1 = vcmask 1041408   ;;  %v5136_v2 = vmov 0.0   ;;  %vm5137_vm2 = vmmov 0   ;;  %vm301_vm3 = vcmask 31744  }
  0x22   : > { %4539 = vmatprep.subr.bf16.mxu0 %v5136_v2  ;;  %4545 = vmatprep.subr.bf16.mxu1 %v5136_v2  ;;  %v5233_v3 = vsel %vm305_vm1, %v4184_v1, 0  ;;  %v5032_v4 = vld [vmem:[%s5212_s4] sm:$0x1f]   ;;  %v5033_v5 = vld [vmem:[%s5212_s4 + $0x8] sm:$0x1f]   ;;  %vm4030_vm4 = vcmask 64512  }
  0x23   : > { %4540 = vmatpush3.bf16.msra.mxu0 %v5233_v3  ;;  %4546 = vmatpush3.bf16.msra.mxu1 %v5233_v3  ;;  %v295_v6 = vshrl.u32 %v5032_v4, 16  ;;  %v297_v7 = vshll.u32 %v5032_v4, 16  ;;  %v5034_v8 = vld [vmem:[%s5212_s4 + $0x10] sm:$0x1f]   ;;  %v355_v9 = vshrl.u32 %v5033_v5, 16  ;;  %v357_v10 = vshll.u32 %v5033_v5, 16 }
  0x24   : > { %4541 = vmatprep.mubr.msk.bf16.mxu0 %vm5137_vm2, %v5136_v2  ;;  %4547 = vmatprep.mubr.msk.bf16.mxu1 %vm5137_vm2, %v5136_v2  ;;  %v5035_v11 = vld [vmem:[%s5212_s4 + $0x18] sm:$0x1f]   ;;  %v412_v13 = vshll.u32 %v5034_v8, 16  ;;  %v410_v18 = vshrl.u32 %v5034_v8, 16  ;;  %v5036_v20 = vld [vmem:[%s5212_s4 + $0x20] sm:$0x1f]  }
  0x25   : > { %4551 = vmatprep.subr.bf16.mxu0 %v5136_v2  ;;  %4557 = vmatprep.subr.bf16.mxu1 %v5136_v2  ;;  %v299_v12 = vrot.slane %v297_v7, 1  ;;  %v359_v14 = vrot.slane %v357_v10, 1  ;;  %v467_v15 = vshll.u32 %v5035_v11, 16  ;;  %v465_v21 = vshrl.u32 %v5035_v11, 16  ;;  %v5037_v23 = vld [vmem:[%s5212_s4 + $0x28] sm:$0x1f]  }
  0x26   : > { %v414_v19 = vrot.slane %v412_v13, 1  ;;  %v522_v25 = vshll.u32 %v5036_v20, 16  ;;  %v577_v27 = vshll.u32 %v5037_v23, 16  ;;  %v5038_v28 = vld [vmem:[%s5212_s4 + $0x30] sm:$0x1f]   ;;  %v520_v29 = vshrl.u32 %v5036_v20, 16 }
  0x27   : > { %v300_v16 = vor.u32 %v299_v12, %v295_v6  ;;  %v360_v17 = vor.u32 %v359_v14, %v355_v9  ;;  %v469_v22 = vrot.slane %v467_v15, 1  ;;  %v575_v31 = vshrl.u32 %v5037_v23, 16  ;;  %v5039_v33 = vld [vmem:[%s5212_s4 + $0x38] sm:$0x1f]   ;;  %v270_v42 = vld [vmem:[%s5217_s7] sm:$0x3] }
  0x28   : > { %v415_v24 = vor.u32 %v414_v19, %v410_v18  ;;  %v524_v30 = vrot.slane %v522_v25, 1  ;;  %v579_v32 = vrot.slane %v577_v27, 1  ;;  %v632_v35 = vshll.u32 %v5038_v28, 16  ;;  %v262_v46 = vld [vmem:[%s5212_s4] sm:$0xf]  ;;  %p4392_p11 = scmp.ne.s32.totalorder %s5110_s12, 2 }
  0x29   : > { %4542 = vmatmul.mubr.msk.bf16.vlgmr.msra.gmra.mrb[0].mxu0 %vm301_vm3, %v300_v16  ;;  %4548 = vmatmul.mubr.msk.bf16.vlgmr.msra.gmra.mrb[0].mxu1 %vm301_vm3, %v360_v17  ;;  %v470_v26 = vor.u32 %v469_v22, %v465_v21  ;;  %v687_v37 = vshll.u32 %v5039_v33, 16  ;;  %v630_v38 = vshrl.u32 %v5038_v28, 16  ;;  %v685_v40 = vshrl.u32 %v5039_v33, 16  ;;  %v263_v47 = vld [vmem:[%s5212_s4 + $0x8] sm:$0xf] }
  0x2a   : > { %4552 = vmatpush3.bf16.msra.mxu0 %v5233_v3  ;;  %4558 = vmatpush3.bf16.msra.mxu1 %v5233_v3  ;;  %v525_v34 = vor.u32 %v524_v30, %v520_v29  ;;  %v580_v36 = vor.u32 %v579_v32, %v575_v31  ;;  %v634_v39 = vrot.slane %v632_v35, 1  ;;  %v738_v45 = vsel %vm305_vm1, %v270_v42, 0  ;;  %v264_v48 = vld [vmem:[%s5212_s4 + $0x10] sm:$0xf]  ;;  %v265_v49 = vld [vmem:[%s5212_s4 + $0x18] sm:$0xf] }
  0x2b   : > { %4553 = vmatprep.mubr.msk.bf16.mxu0 %vm5137_vm2, %v5136_v2  ;;  %4559 = vmatprep.mubr.msk.bf16.mxu1 %vm5137_vm2, %v5136_v2  ;;  %v689_v41 = vrot.slane %v687_v37, 1  ;;  %v266_v50 = vld [vmem:[%s5212_s4 + $0x20] sm:$0xf]  ;;  %v267_v51 = vld [vmem:[%s5212_s4 + $0x28] sm:$0xf] }
  0x2c   : > { %4563 = vmatprep.subr.bf16.mxu0 %v5136_v2  ;;  %4569 = vmatprep.subr.bf16.mxu1 %v5136_v2  ;;  %v635_v43 = vor.u32 %v634_v39, %v630_v38  ;;  %v4209_v52 = vld [vmem:[%s5217_s7 + $0x4] sm:$0x3]  ;;  %v268_v53 = vld [vmem:[%s5212_s4 + $0x30] sm:$0xf]  ;;  %v269_v54 = vld [vmem:[%s5212_s4 + $0x38] sm:$0xf] }
  0x2d   : > { %v690_v44 = vor.u32 %v689_v41, %v685_v40  ;;  %v1109_v55 = vsel %vm305_vm1, %v4209_v52, 0  ;;  %v5040_v56 = vld [vmem:[%s5212_s4] sm:$0x1e]   ;;  %v5041_v57 = vld [vmem:[%s5212_s4 + $0x8] sm:$0x1e]  }
  0x2e   : > { %v1104_v58 = vrot.slane %v5040_v56, 1  ;;  %v1156_v59 = vrot.slane %v5041_v57, 1  ;;  %v5042_v60 = vld [vmem:[%s5212_s4 + $0x10] sm:$0x1e]   ;;  %v5043_v61 = vld [vmem:[%s5212_s4 + $0x18] sm:$0x1e]  }
  0x2f   : > { %v1205_v62 = vrot.slane %v5042_v60, 1  ;;  %v1254_v63 = vrot.slane %v5043_v61, 1  ;;  %v5044_v0 = vld [vmem:[%s5212_s4 + $0x20] sm:$0x1e]   ;;  %v5045_v1 = vld [vmem:[%s5212_s4 + $0x28] sm:$0x1e]  }
  0x30   : > { %v1352_v4 = vrot.slane %v5045_v1, 1  ;;  %v5046_v5 = vld [vmem:[%s5212_s4 + $0x30] sm:$0x1e]   ;;  %v5047_v6 = vld [vmem:[%s5212_s4 + $0x38] sm:$0x1e]  }
  0x31   : > { %4554 = vmatmul.mubr.msk.bf16.vlgmr.msra.gmra.mrb[4].mxu0 %vm301_vm3, %v415_v24  ;;  %4560 = vmatmul.mubr.msk.bf16.vlgmr.msra.gmra.mrb[4].mxu1 %vm301_vm3, %v470_v26  ;;  %v4234_v7 = vld [vmem:[%s5217_s7 + $0x6] sm:$0x3]  ;;  %v1401_v8 = vrot.slane %v5046_v5, 1  ;;  %v1450_v9 = vrot.slane %v5047_v6, 1  ;;  %v4226_v11 = vld [vmem:[%s5212_s4 + $0x8] sm:$0xf] }
  0x32   : > { %4564 = vmatpush3.bf16.msra.mxu0 %v5233_v3  ;;  %4570 = vmatpush3.bf16.msra.mxu1 %v5233_v3  ;;  %v1517_v10 = vsel %vm305_vm1, %v4234_v7, 0  ;;  %v4227_v12 = vld [vmem:[%s5212_s4 + $0x10] sm:$0xf]  ;;  %v4228_v13 = vld [vmem:[%s5212_s4 + $0x18] sm:$0xf] }
  0x33   : > { %4565 = vmatprep.mubr.msk.bf16.mxu0 %vm5137_vm2, %v5136_v2  ;;  %4571 = vmatprep.mubr.msk.bf16.mxu1 %vm5137_vm2, %v5136_v2  ;;  %v4229_v14 = vld [vmem:[%s5212_s4 + $0x20] sm:$0xf]  ;;  %v4230_v15 = vld [vmem:[%s5212_s4 + $0x28] sm:$0xf]  ;;  %v4231_v16 = vld [vmem:[%s5212_s4 + $0x30] sm:$0xf] }
  0x34   : > { %4575 = vmatprep.subr.bf16.mxu0 %v5136_v2  ;;  %4581 = vmatprep.subr.bf16.mxu1 %v5136_v2  ;;  %v5048_v17 = vld [vmem:[%s5212_s4 + $0x8] sm:$0x1f]   ;;  %v5049_v18 = vld [vmem:[%s5212_s4 + $0x10] sm:$0x1f]   ;;  %v4232_v21 = vld [vmem:[%s5212_s4 + $0x38] sm:$0xf] }
  0x35   : > { %v4259_v19 = vld [vmem:[%s5217_s7 + $0x8] sm:$0x3]  ;;  %v1894_v20 = vshll.u32 %v5048_v17, 16  ;;  %v1952_v22 = vshll.u32 %v5049_v18, 16  ;;  %v4233_v23 = vld [vmem:[%s5212_s4 + $0x40] sm:$0xf] }
  0x36   : > { %v1902_v24 = vsel %vm305_vm1, %v4259_v19, 0  ;;  %v1892_v25 = vshrl.u32 %v5048_v17, 16  ;;  %v5050_v27 = vld [vmem:[%s5212_s4 + $0x18] sm:$0x1f]   ;;  %v1950_v28 = vshrl.u32 %v5049_v18, 16 }
  0x37   : > { %v1896_v26 = vrot.slane %v1894_v20, 1  ;;  %v1954_v29 = vrot.slane %v1952_v22, 1  ;;  %v5051_v30 = vld [vmem:[%s5212_s4 + $0x20] sm:$0x1f]   ;;  %v2007_v32 = vshll.u32 %v5050_v27, 16  ;;  %v2005_v35 = vshrl.u32 %v5050_v27, 16 }
  0x38   : > { %v5052_v37 = vld [vmem:[%s5212_s4 + $0x28] sm:$0x1f]   ;;  %v2060_v38 = vshrl.u32 %v5051_v30, 16  ;;  %v5053_v40 = vld [vmem:[%s5212_s4 + $0x30] sm:$0x1f]  }
  0x39   : > { %4566 = vmatmul.mubr.msk.bf16.vlgmr.msra.gmra.mrb[8].mxu0 %vm301_vm3, %v525_v34  ;;  %4572 = vmatmul.mubr.msk.bf16.vlgmr.msra.gmra.mrb[8].mxu1 %vm301_vm3, %v580_v36  ;;  %v1897_v31 = vor.u32 %v1896_v26, %v1892_v25  ;;  %v1955_v33 = vor.u32 %v1954_v29, %v1950_v28  ;;  %v2062_v34 = vshll.u32 %v5051_v30, 16  ;;  %v2009_v36 = vrot.slane %v2007_v32, 1  ;;  %v5059_v5 = vld [vmem:[%s5212_s4 + $0x20] sm:$0x1e]   ;;  %v4309_v18 = vld [vmem:[%s5212_s4 + $0x10] sm:$0xf] }
  0x3a   : > { %4576 = vmatpush3.bf16.msra.mxu0 %v5233_v3  ;;  %4582 = vmatpush3.bf16.msra.mxu1 %v5233_v3  ;;  %v1303_v3 = vrot.slane %v5044_v0, 1  ;;  %v2117_v42 = vshll.u32 %v5052_v37, 16  ;;  %v5057_v0 = vld [vmem:[%s5212_s4 + $0x10] sm:$0x1e]   ;;  %v2510_v7 = vrot.slane %v5059_v5, 1 }
  0x3b   : > { %4577 = vmatprep.mubr.msk.bf16.mxu0 %vm5137_vm2, %v5136_v2  ;;  %4583 = vmatprep.mubr.msk.bf16.mxu1 %vm5137_vm2, %v5136_v2  ;;  %v2064_v39 = vrot.slane %v2062_v34, 1  ;;  %v2010_v41 = vor.u32 %v2009_v36, %v2005_v35  ;;  %v4310_v19 = vld [vmem:[%s5212_s4 + $0x18] sm:$0xf]  ;;  %v4311_v20 = vld [vmem:[%s5212_s4 + $0x20] sm:$0xf] }
  0x3c   : > { %4587 = vmatprep.subr.bf16.mxu0 %v5136_v2  ;;  %4593 = vmatprep.subr.bf16.mxu1 %v5136_v2  ;;  %v4313_v22 = vld [vmem:[%s5212_s4 + $0x30] sm:$0xf]  ;;  %v5065_v25 = vld [vmem:[%s5212_s4 + $0x18] sm:$0x1f]   ;;  %v4342_v27 = vld [vmem:[%s5217_s7 + $0xe] sm:$0x3] }
  0x3d   : > { %v3208_v34 = vshll.u32 %v5065_v25, 16 }
  0x41   : > { %4578 = vmatmul.mubr.msk.bf16.vlgmr.msra.gmra.mrb[12].mxu0 %vm301_vm3, %v635_v43  ;;  %4584 = vmatmul.mubr.msk.bf16.vlgmr.msra.gmra.mrb[12].mxu1 %vm301_vm3, %v690_v44  ;;  %v2065_v43 = vor.u32 %v2064_v39, %v2060_v38  ;;  %v2172_v44 = vshll.u32 %v5053_v40, 16  ;;  %v5541_v38 = vsel %vm305_vm1, %v4342_v27, 0 }
  0x42   : > { %4588 = vmatpush3.bf16.msra.mxu0 %v738_v45  ;;  %4594 = vmatpush3.bf16.msra.mxu1 %v738_v45 }
  0x43   : > { %4589 = vmatprep.mubr.msk.bf16.mxu0 %vm5137_vm2, %v5136_v2  ;;  %4595 = vmatprep.mubr.msk.bf16.mxu1 %vm5137_vm2, %v5136_v2 }
  0x44   : > { %4599 = vmatprep.subr.bf16.mxu0 %v5136_v2  ;;  %4605 = vmatprep.subr.bf16.mxu1 %v5136_v2 }
  0x49   : > { %4590 = vmatmul.mubr.msk.bf16.vlgmr.msra.gmra.mrb[16].mxu0 %vm301_vm3, %v262_v46  ;;  %4596 = vmatmul.mubr.msk.bf16.vlgmr.msra.gmra.mrb[16].mxu1 %vm301_vm3, %v263_v47  ;;  %v2119_v46 = vrot.slane %v2117_v42, 1  ;;  %v5054_v47 = vld [vmem:[%s5212_s4 + $0x38] sm:$0x1f]   ;;  %v5066_v42 = vld [vmem:[%s5212_s4 + $0x20] sm:$0x1f]  }
  0x4a   : > { %4600 = vmatpush3.bf16.msra.mxu0 %v738_v45  ;;  %4606 = vmatpush3.bf16.msra.mxu1 %v738_v45  ;;  %v2227_v52 = vshll.u32 %v5054_v47, 16 }
  0x4b   : > { %4601 = vmatprep.mubr.msk.bf16.mxu0 %vm5137_vm2, %v5136_v2  ;;  %4607 = vmatprep.mubr.msk.bf16.mxu1 %vm5137_vm2, %v5136_v2 }
  0x4c   : > { %4611 = vmatprep.subr.bf16.mxu0 %v5136_v2  ;;  %4617 = vmatprep.subr.bf16.mxu1 %v5136_v2  ;;  %v2229_v56 = vrot.slane %v2227_v52, 1 }
  0x51   : > { %4602 = vmatmul.mubr.msk.bf16.vlgmr.msra.gmra.mrb[20].mxu0 %vm301_vm3, %v264_v48  ;;  %4608 = vmatmul.mubr.msk.bf16.vlgmr.msra.gmra.mrb[20].mxu1 %vm301_vm3, %v265_v49  ;;  %v2170_v48 = vshrl.u32 %v5053_v40, 16  ;;  %v2174_v49 = vrot.slane %v2172_v44, 1  ;;  %v3210_v44 = vrot.slane %v3208_v34, 1 }
  0x52   : > { %4612 = vmatpush3.bf16.msra.mxu0 %v738_v45  ;;  %4618 = vmatpush3.bf16.msra.mxu1 %v738_v45 }
  0x53   : > { %4613 = vmatprep.mubr.msk.bf16.mxu0 %vm5137_vm2, %v5136_v2  ;;  %4619 = vmatprep.mubr.msk.bf16.mxu1 %vm5137_vm2, %v5136_v2 }
  0x54   : > { %4623 = vmatprep.subr.bf16.mxu0 %v5136_v2  ;;  %4629 = vmatprep.subr.bf16.mxu1 %v5136_v2 }
  0x59   : > { %4614 = vmatmul.mubr.msk.bf16.vlgmr.msra.gmra.mrb[24].mxu0 %vm301_vm3, %v266_v50  ;;  %4620 = vmatmul.mubr.msk.bf16.vlgmr.msra.gmra.mrb[24].mxu1 %vm301_vm3, %v267_v51  ;;  %v5055_v50 = vld [vmem:[%s5212_s4 + $0x40] sm:$0x1f]  }
  0x5a   : > { %4624 = vmatpush3.bf16.msra.mxu0 %v738_v45  ;;  %4630 = vmatpush3.bf16.msra.mxu1 %v738_v45  ;;  %v2115_v45 = vshrl.u32 %v5052_v37, 16  ;;  %v2280_v57 = vshrl.u32 %v5055_v50, 16  ;;  %v4316_v37 = vld [vmem:[%s5212_s4 + $0x48] sm:$0xf] }
  0x5b   : > { %4625 = vmatprep.mubr.msk.bf16.mxu0 %vm5137_vm2, %v5136_v2  ;;  %4631 = vmatprep.mubr.msk.bf16.mxu1 %vm5137_vm2, %v5136_v2 }
  0x5c   : > { %4635 = vmatprep.subr.bf16.mxu0 %v5136_v2  ;;  %4641 = vmatprep.subr.bf16.mxu1 %v5136_v2  ;;  %v2120_v51 = vor.u32 %v2119_v46, %v2115_v45  ;;  %v5067_v45 = vld [vmem:[%s5212_s4 + $0x28] sm:$0x1f]  }
  0x61   : > { %4626 = vmatmul.mubr.msk.bf16.vlgmr.msra.gmra.mrb[28].mxu0 %vm301_vm3, %v268_v53  ;;  %4632 = vmatmul.mubr.msk.bf16.vlgmr.msra.gmra.mrb[28].mxu1 %vm301_vm3, %v269_v54  ;;  %v2175_v53 = vor.u32 %v2174_v49, %v2170_v48  ;;  %v2282_v54 = vshll.u32 %v5055_v50, 16  ;;  %v3263_v50 = vshll.u32 %v5066_v42, 16 }
  0x62   : > { %4636 = vmatpush3.bf16.msra.mxu0 %v1109_v55  ;;  %4642 = vmatpush3.bf16.msra.mxu1 %v1109_v55 }
  0x63   : > { %4637 = vmatprep.mubr.msk.bf16.mxu0 %vm5137_vm2, %v5136_v2  ;;  %4643 = vmatprep.mubr.msk.bf16.mxu1 %vm5137_vm2, %v5136_v2 }
  0x64   : > { %4647 = vmatprep.subr.bf16.mxu0 %v5136_v2  ;;  %4653 = vmatprep.subr.bf16.mxu1 %v5136_v2 }
  0x69   : > { %4638 = vmatmul.mubr.msk.bf16.vlgmr.msra.gmra.mrb[32].mxu0 %vm301_vm3, %v1104_v58  ;;  %4644 = vmatmul.mubr.msk.bf16.vlgmr.msra.gmra.mrb[32].mxu1 %vm301_vm3, %v1156_v59  ;;  %v2284_v58 = vrot.slane %v2282_v54, 1  ;;  %v4292_v59 = vld [vmem:[%s5217_s7 + $0xa] sm:$0x3]  ;;  %v3318_v54 = vshll.u32 %v5067_v45, 16 }
  0x6a   : > { %4648 = vmatpush3.bf16.msra.mxu0 %v1109_v55  ;;  %4654 = vmatpush3.bf16.msra.mxu1 %v1109_v55 }
  0x6b   : > { %4649 = vmatprep.mubr.msk.bf16.mxu0 %vm5137_vm2, %v5136_v2  ;;  %4655 = vmatprep.mubr.msk.bf16.mxu1 %vm5137_vm2, %v5136_v2  ;;  %v2285_v61 = vor.u32 %v2284_v58, %v2280_v57  ;;  %v3261_v58 = vshrl.u32 %v5066_v42, 16 }
  0x6c   : > { %4659 = vmatprep.subr.bf16.mxu0 %v5136_v2  ;;  %4665 = vmatprep.subr.bf16.mxu1 %v5136_v2 }
  0x71   : > { %4650 = vmatmul.mubr.msk.bf16.vlgmr.msra.gmra.mrb[36].mxu0 %vm301_vm3, %v1205_v62  ;;  %4656 = vmatmul.mubr.msk.bf16.vlgmr.msra.gmra.mrb[36].mxu1 %vm301_vm3, %v1254_v63  ;;  %v2365_v62 = vsel %vm305_vm1, %v4292_v59, 0  ;;  %v5056_v63 = vld [vmem:[%s5212_s4 + $0x8] sm:$0x1e]   ;;  %v3265_v59 = vrot.slane %v3263_v50, 1 }
  0x72   : > { %4660 = vmatpush3.bf16.msra.mxu0 %v1109_v55  ;;  %4666 = vmatpush3.bf16.msra.mxu1 %v1109_v55  ;;  %v2360_v1 = vrot.slane %v5056_v63, 1  ;;  %v5069_v63 = vld [vmem:[%s5212_s4 + $0x38] sm:$0x1f]  }
  0x73   : > { %4661 = vmatprep.mubr.msk.bf16.mxu0 %vm5137_vm2, %v5136_v2  ;;  %4667 = vmatprep.mubr.msk.bf16.mxu1 %vm5137_vm2, %v5136_v2 }
  0x74   : > { %4671 = vmatprep.subr.bf16.mxu0 %v5136_v2  ;;  %4677 = vmatprep.subr.bf16.mxu1 %v5136_v2 }
  0x79   : > { %4662 = vmatmul.mubr.msk.bf16.vlgmr.msra.gmra.mrb[40].mxu0 %vm301_vm3, %v1303_v3  ;;  %4668 = vmatmul.mubr.msk.bf16.vlgmr.msra.gmra.mrb[40].mxu1 %vm301_vm3, %v1352_v4  ;;  %v2412_v3 = vrot.slane %v5057_v0, 1  ;;  %v5058_v4 = vld [vmem:[%s5212_s4 + $0x18] sm:$0x1e]  }
  0x7a   : > { %4672 = vmatpush3.bf16.msra.mxu0 %v1109_v55  ;;  %4678 = vmatpush3.bf16.msra.mxu1 %v1109_v55  ;;  %v2225_v55 = vshrl.u32 %v5054_v47, 16  ;;  %v2461_v6 = vrot.slane %v5058_v4, 1  ;;  %v3266_v4 = vor.u32 %v3265_v59, %v3261_v58 }
  0x7b   : > { %4673 = vmatprep.mubr.msk.bf16.mxu0 %vm5137_vm2, %v5136_v2  ;;  %4679 = vmatprep.mubr.msk.bf16.mxu1 %vm5137_vm2, %v5136_v2 }
  0x7c   : > { %4683 = vmatprep.subr.bf16.mxu0 %v5136_v2  ;;  %4689 = vmatprep.subr.bf16.mxu1 %v5136_v2  ;;  %v2230_v60 = vor.u32 %v2229_v56, %v2225_v55 }
  0x81   : > { %4674 = vmatmul.mubr.msk.bf16.vlgmr.msra.gmra.mrb[44].mxu0 %vm301_vm3, %v1401_v8  ;;  %4680 = vmatmul.mubr.msk.bf16.vlgmr.msra.gmra.mrb[44].mxu1 %vm301_vm3, %v1450_v9  ;;  %v5060_v8 = vld [vmem:[%s5212_s4 + $0x28] sm:$0x1e]   ;;  %v5061_v9 = vld [vmem:[%s5212_s4 + $0x30] sm:$0x1e]  }
  0x82   : > { %4684 = vmatpush3.bf16.msra.mxu0 %v1517_v10  ;;  %4690 = vmatpush3.bf16.msra.mxu1 %v1517_v10 }
  0x83   : > { %4685 = vmatprep.mubr.msk.bf16.mxu0 %vm5137_vm2, %v5136_v2  ;;  %4691 = vmatprep.mubr.msk.bf16.mxu1 %vm5137_vm2, %v5136_v2 }
  0x84   : > { %4695 = vmatprep.subr.bf16.mxu0 %v5136_v2  ;;  %4701 = vmatprep.subr.bf16.mxu1 %v5136_v2 }
  0x89   : > { %4686 = vmatmul.mubr.msk.bf16.vlgmr.msra.gmra.mrb[48].mxu0 %vm301_vm3, %v4226_v11  ;;  %4692 = vmatmul.mubr.msk.bf16.vlgmr.msra.gmra.mrb[48].mxu1 %vm301_vm3, %v4227_v12  ;;  %v2608_v11 = vrot.slane %v5061_v9, 1  ;;  %v5062_v12 = vld [vmem:[%s5212_s4 + $0x38] sm:$0x1e]   ;;  %v3428_v9 = vshll.u32 %v5069_v63, 16 }
  0x8a   : > { %4696 = vmatpush3.bf16.msra.mxu0 %v1517_v10  ;;  %4702 = vmatpush3.bf16.msra.mxu1 %v1517_v10 }
  0x8b   : > { %4697 = vmatprep.mubr.msk.bf16.mxu0 %vm5137_vm2, %v5136_v2  ;;  %4703 = vmatprep.mubr.msk.bf16.mxu1 %vm5137_vm2, %v5136_v2 }
  0x8c   : > { %4707 = vmatprep.subr.bf16.mxu0 %v5136_v2  ;;  %4713 = vmatprep.subr.bf16.mxu1 %v5136_v2 }
  0x91   : > { %4698 = vmatmul.mubr.msk.bf16.vlgmr.msra.gmra.mrb[52].mxu0 %vm301_vm3, %v4228_v13  ;;  %4704 = vmatmul.mubr.msk.bf16.vlgmr.msra.gmra.mrb[52].mxu1 %vm301_vm3, %v4229_v14  ;;  %v5063_v13 = vld [vmem:[%s5212_s4 + $0x40] sm:$0x1e]   ;;  %v4317_v14 = vld [vmem:[%s5217_s7 + $0xc] sm:$0x3] }
  0x92   : > { %4708 = vmatpush3.bf16.msra.mxu0 %v1517_v10  ;;  %4714 = vmatpush3.bf16.msra.mxu1 %v1517_v10  ;;  %v2773_v17 = vsel %vm305_vm1, %v4317_v14, 0 }
  0x93   : > { %4709 = vmatprep.mubr.msk.bf16.mxu0 %vm5137_vm2, %v5136_v2  ;;  %4715 = vmatprep.mubr.msk.bf16.mxu1 %vm5137_vm2, %v5136_v2 }
  0x94   : > { %4719 = vmatprep.subr.bf16.mxu0 %v5136_v2  ;;  %4725 = vmatprep.subr.bf16.mxu1 %v5136_v2 }
  0x99   : > { %4710 = vmatmul.mubr.msk.bf16.vlgmr.msra.gmra.mrb[56].mxu0 %vm301_vm3, %v4230_v15  ;;  %4716 = vmatmul.mubr.msk.bf16.vlgmr.msra.gmra.mrb[56].mxu1 %vm301_vm3, %v4231_v16  ;;  %v2657_v15 = vrot.slane %v5062_v12, 1  ;;  %v2706_v16 = vrot.slane %v5063_v13, 1 }
  0x9a   : > { %4720 = vmatpush3.bf16.msra.mxu0 %v1517_v10  ;;  %4726 = vmatpush3.bf16.msra.mxu1 %v1517_v10  ;;  %v2559_v10 = vrot.slane %v5060_v8, 1 }
  0x9b   : > { %4721 = vmatprep.mubr.msk.bf16.mxu0 %vm5137_vm2, %v5136_v2  ;;  %4727 = vmatprep.mubr.msk.bf16.mxu1 %vm5137_vm2, %v5136_v2 }
  0x9c   : > { %4731 = vmatprep.subr.bf16.mxu0 %v5136_v2  ;;  %4737 = vmatprep.subr.bf16.mxu1 %v5136_v2 }
  0xa1   : > { %4722 = vmatmul.mubr.msk.bf16.vlgmr.msra.gmra.mrb[60].mxu0 %vm301_vm3, %v4232_v21  ;;  %4728 = vmatmul.mubr.msk.bf16.vlgmr.msra.gmra.mrb[60].mxu1 %vm301_vm3, %v4233_v23  ;;  %v4312_v21 = vld [vmem:[%s5212_s4 + $0x28] sm:$0xf]  ;;  %v4314_v23 = vld [vmem:[%s5212_s4 + $0x38] sm:$0xf] }
  0xa2   : > { %4732 = vmatpush3.bf16.msra.mxu0 %v1902_v24  ;;  %4738 = vmatpush3.bf16.msra.mxu1 %v1902_v24 }
  0xa3   : > { %4733 = vmatprep.mubr.msk.bf16.mxu0 %vm5137_vm2, %v5136_v2  ;;  %4739 = vmatprep.mubr.msk.bf16.mxu1 %vm5137_vm2, %v5136_v2 }
  0xa4   : > { %4743 = vmatprep.subr.bf16.mxu0 %v5136_v2  ;;  %4749 = vmatprep.subr.bf16.mxu1 %v5136_v2 }
  0xa9   : > { %4734 = vmatmul.mubr.msk.bf16.vlgmr.msra.gmra.mrb[64].mxu0 %vm301_vm3, %v1897_v31  ;;  %4740 = vmatmul.mubr.msk.bf16.vlgmr.msra.gmra.mrb[64].mxu1 %vm301_vm3, %v1955_v33  ;;  %v4315_v33 = vld [vmem:[%s5212_s4 + $0x40] sm:$0xf] }
  0xaa   : > { %4744 = vmatpush3.bf16.msra.mxu0 %v1902_v24  ;;  %4750 = vmatpush3.bf16.msra.mxu1 %v1902_v24 }
  0xab   : > { %4745 = vmatprep.mubr.msk.bf16.mxu0 %vm5137_vm2, %v5136_v2  ;;  %4751 = vmatprep.mubr.msk.bf16.mxu1 %vm5137_vm2, %v5136_v2 }
  0xac   : > { %4755 = vmatprep.subr.bf16.mxu0 %v5136_v2  ;;  %4761 = vmatprep.subr.bf16.mxu1 %v5136_v2 }
  0xb1   : > { %4746 = vmatmul.mubr.msk.bf16.vlgmr.msra.gmra.mrb[68].mxu0 %vm301_vm3, %v2010_v41  ;;  %4752 = vmatmul.mubr.msk.bf16.vlgmr.msra.gmra.mrb[68].mxu1 %vm301_vm3, %v2065_v43  ;;  %v3206_v43 = vshrl.u32 %v5065_v25, 16 }
  0xb2   : > { %4756 = vmatpush3.bf16.msra.mxu0 %v1902_v24  ;;  %4762 = vmatpush3.bf16.msra.mxu1 %v1902_v24 }
  0xb3   : > { %4757 = vmatprep.mubr.msk.bf16.mxu0 %vm5137_vm2, %v5136_v2  ;;  %4763 = vmatprep.mubr.msk.bf16.mxu1 %vm5137_vm2, %v5136_v2 }
  0xb4   : > { %4767 = vmatprep.subr.bf16.mxu0 %v5136_v2  ;;  %4773 = vmatprep.subr.bf16.mxu1 %v5136_v2 }
  0xb9   : > { %4758 = vmatmul.mubr.msk.bf16.vlgmr.msra.gmra.mrb[72].mxu0 %vm301_vm3, %v2120_v51  ;;  %4764 = vmatmul.mubr.msk.bf16.vlgmr.msra.gmra.mrb[72].mxu1 %vm301_vm3, %v2175_v53  ;;  %v3211_v53 = vor.u32 %v3210_v44, %v3206_v43 }
  0xba   : > { %4768 = vmatpush3.bf16.msra.mxu0 %v1902_v24  ;;  %4774 = vmatpush3.bf16.msra.mxu1 %v1902_v24  ;;  %v5064_v24 = vld [vmem:[%s5212_s4 + $0x10] sm:$0x1f]  }
  0xbb   : > { %4769 = vmatprep.mubr.msk.bf16.mxu0 %vm5137_vm2, %v5136_v2  ;;  %4775 = vmatprep.mubr.msk.bf16.mxu1 %vm5137_vm2, %v5136_v2  ;;  %v3150_v30 = vshll.u32 %v5064_v24, 16  ;;  %v3148_v40 = vshrl.u32 %v5064_v24, 16 }
  0xbc   : > { %4779 = vmatprep.subr.bf16.mxu0 %v5136_v2  ;;  %4785 = vmatprep.subr.bf16.mxu1 %v5136_v2 }
  0xbd   : > { %v3152_v41 = vrot.slane %v3150_v30, 1 }
  0xbf   : > { %v3153_v49 = vor.u32 %v3152_v41, %v3148_v40 }
  0xc1   : > { %4770 = vmatmul.mubr.msk.bf16.vlgmr.msra.gmra.mrb[76].mxu0 %vm301_vm3, %v2230_v60  ;;  %4776 = vmatmul.mubr.msk.bf16.vlgmr.msra.gmra.mrb[76].mxu1 %vm301_vm3, %v2285_v61  ;;  %v5068_v60 = vld [vmem:[%s5212_s4 + $0x30] sm:$0x1f]   ;;  %v3316_v61 = vshrl.u32 %v5067_v45, 16 }
  0xc2   : > { %4780 = vmatpush3.bf16.msra.mxu0 %v2365_v62  ;;  %4786 = vmatpush3.bf16.msra.mxu1 %v2365_v62  ;;  %v3373_v5 = vshll.u32 %v5068_v60, 16  ;;  %v3371_v13 = vshrl.u32 %v5068_v60, 16 }
  0xc3   : > { %4781 = vmatprep.mubr.msk.bf16.mxu0 %vm5137_vm2, %v5136_v2  ;;  %4787 = vmatprep.mubr.msk.bf16.mxu1 %vm5137_vm2, %v5136_v2 }
  0xc4   : > { %4791 = vmatprep.subr.bf16.mxu0 %v5136_v2  ;;  %4797 = vmatprep.subr.bf16.mxu1 %v5136_v2  ;;  %v3375_v14 = vrot.slane %v3373_v5, 1 }
  0xc9   : > { %4782 = vmatmul.mubr.msk.bf16.vlgmr.msra.gmra.mrb[80].mxu0 %vm301_vm3, %v2360_v1  ;;  %4788 = vmatmul.mubr.msk.bf16.vlgmr.msra.gmra.mrb[80].mxu1 %vm301_vm3, %v2412_v3 }
  0xca   : > { %4792 = vmatpush3.bf16.msra.mxu0 %v2365_v62  ;;  %4798 = vmatpush3.bf16.msra.mxu1 %v2365_v62 }
  0xcb   : > { %4793 = vmatprep.mubr.msk.bf16.mxu0 %vm5137_vm2, %v5136_v2  ;;  %4799 = vmatprep.mubr.msk.bf16.mxu1 %vm5137_vm2, %v5136_v2 }
  0xcc   : > { %4803 = vmatprep.subr.bf16.mxu0 %v5136_v2  ;;  %4809 = vmatprep.subr.bf16.mxu1 %v5136_v2 }
  0xd1   : > { %4794 = vmatmul.mubr.msk.bf16.vlgmr.msra.gmra.mrb[84].mxu0 %vm301_vm3, %v2461_v6  ;;  %4800 = vmatmul.mubr.msk.bf16.vlgmr.msra.gmra.mrb[84].mxu1 %vm301_vm3, %v2510_v7 }
  0xd2   : > { %4804 = vmatpush3.bf16.msra.mxu0 %v2365_v62  ;;  %4810 = vmatpush3.bf16.msra.mxu1 %v2365_v62 }
  0xd3   : > { %4805 = vmatprep.mubr.msk.bf16.mxu0 %vm5137_vm2, %v5136_v2  ;;  %4811 = vmatprep.mubr.msk.bf16.mxu1 %vm5137_vm2, %v5136_v2 }
  0xd4   : > { %4815 = vmatprep.subr.bf16.mxu0 %v5136_v2  ;;  %4821 = vmatprep.subr.bf16.mxu1 %v5136_v2 }
  0xd9   : > { %4806 = vmatmul.mubr.msk.bf16.vlgmr.msra.gmra.mrb[88].mxu0 %vm301_vm3, %v2559_v10  ;;  %4812 = vmatmul.mubr.msk.bf16.vlgmr.msra.gmra.mrb[88].mxu1 %vm301_vm3, %v2608_v11 }
  0xda   : > { %4816 = vmatpush3.bf16.msra.mxu0 %v2365_v62  ;;  %4822 = vmatpush3.bf16.msra.mxu1 %v2365_v62  ;;  %v3320_v62 = vrot.slane %v3318_v54, 1 }
  0xdb   : > { %4817 = vmatprep.mubr.msk.bf16.mxu0 %vm5137_vm2, %v5136_v2  ;;  %4823 = vmatprep.mubr.msk.bf16.mxu1 %vm5137_vm2, %v5136_v2 }
  0xdc   : > { %4827 = vmatprep.subr.bf16.mxu0 %v5136_v2  ;;  %4833 = vmatprep.subr.bf16.mxu1 %v5136_v2  ;;  %v3321_v8 = vor.u32 %v3320_v62, %v3316_v61 }
  0xe1   : > { %4818 = vmatmul.mubr.msk.bf16.vlgmr.msra.gmra.mrb[92].mxu0 %vm301_vm3, %v2657_v15  ;;  %4824 = vmatmul.mubr.msk.bf16.vlgmr.msra.gmra.mrb[92].mxu1 %vm301_vm3, %v2706_v16  ;;  %v5070_v15 = vld [vmem:[%s5212_s4 + $0x40] sm:$0x1f]   ;;  %v3426_v16 = vshrl.u32 %v5069_v63, 16 }
  0xe2   : > { %4828 = vmatpush3.bf16.msra.mxu0 %v2773_v17  ;;  %4834 = vmatpush3.bf16.msra.mxu1 %v2773_v17 }
  0xe3   : > { %4829 = vmatprep.mubr.msk.bf16.mxu0 %vm5137_vm2, %v5136_v2  ;;  %4835 = vmatprep.mubr.msk.bf16.mxu1 %vm5137_vm2, %v5136_v2 }
  0xe4   : > { %4839 = vmatprep.subr.bf16.mxu0 %v5136_v2  ;;  %4845 = vmatprep.subr.bf16.mxu1 %v5136_v2 }
  0xe9   : > { %4830 = vmatmul.mubr.msk.bf16.vlgmr.msra.gmra.mrb[96].mxu0 %vm301_vm3, %v4309_v18  ;;  %4836 = vmatmul.mubr.msk.bf16.vlgmr.msra.gmra.mrb[96].mxu1 %vm301_vm3, %v4310_v19  ;;  %v5071_v18 = vld [vmem:[%s5212_s4 + $0x48] sm:$0x1f]  }
  0xea   : > { %4840 = vmatpush3.bf16.msra.mxu0 %v2773_v17  ;;  %4846 = vmatpush3.bf16.msra.mxu1 %v2773_v17 }
  0xeb   : > { %4841 = vmatprep.mubr.msk.bf16.mxu0 %vm5137_vm2, %v5136_v2  ;;  %4847 = vmatprep.mubr.msk.bf16.mxu1 %vm5137_vm2, %v5136_v2 }
  0xec   : > { %4851 = vmatprep.subr.bf16.mxu0 %v5136_v2  ;;  %4857 = vmatprep.subr.bf16.mxu1 %v5136_v2 }
  0xf1   : > { %4842 = vmatmul.mubr.msk.bf16.vlgmr.msra.gmra.mrb[100].mxu0 %vm301_vm3, %v4311_v20  ;;  %4848 = vmatmul.mubr.msk.bf16.vlgmr.msra.gmra.mrb[100].mxu1 %vm301_vm3, %v4312_v21 }
  0xf2   : > { %4852 = vmatpush3.bf16.msra.mxu0 %v2773_v17  ;;  %4858 = vmatpush3.bf16.msra.mxu1 %v2773_v17 }
  0xf3   : > { %4853 = vmatprep.mubr.msk.bf16.mxu0 %vm5137_vm2, %v5136_v2  ;;  %4859 = vmatprep.mubr.msk.bf16.mxu1 %vm5137_vm2, %v5136_v2 }
  0xf4   : > { %4863 = vmatprep.subr.bf16.mxu0 %v5136_v2  ;;  %4869 = vmatprep.subr.bf16.mxu1 %v5136_v2 }
  0xf9   : > { %4854 = vmatmul.mubr.msk.bf16.vlgmr.msra.gmra.mrb[104].mxu0 %vm301_vm3, %v4313_v22  ;;  %4860 = vmatmul.mubr.msk.bf16.vlgmr.msra.gmra.mrb[104].mxu1 %vm301_vm3, %v4314_v23  ;;  %v3376_v22 = vor.u32 %v3375_v14, %v3371_v13  ;;  %v3483_v23 = vshll.u32 %v5070_v15, 16 }
  0xfa   : > { %4864 = vmatpush3.bf16.msra.mxu0 %v2773_v17  ;;  %4870 = vmatpush3.bf16.msra.mxu1 %v2773_v17  ;;  %v3430_v17 = vrot.slane %v3428_v9, 1 }
  0xfb   : > { %4865 = vmatprep.mubr.msk.bf16.mxu0 %vm5137_vm2, %v5136_v2  ;;  %4871 = vmatprep.mubr.msk.bf16.mxu1 %vm5137_vm2, %v5136_v2  ;;  %v3485_v34 = vrot.slane %v3483_v23, 1 }
  0xfc   : > { %v5529_v26 = vpop.f32.mrb[0].mxu0  ;;  %4875 = vmatprep.subr.bf16.mxu0 %v5136_v2  ;;  %v5535_v28 = vpop.f32.mrb[0].mxu1  ;;  %4881 = vmatprep.subr.bf16.mxu1 %v5136_v2  ;;  %v3431_v27 = vor.u32 %v3430_v17, %v3426_v16  ;;  %v5076_v16 = vld [vmem:[%s5212_s4 + $0x30] sm:$0x1e]  }
  0xfd   : > { %v4543_v29 = vpop.f32.mrb[1].mxu0  ;;  %v4549_v31 = vpop.f32.mrb[1].mxu1 }
  0xfe   : > { %v346_v32 = vpop.f32.mrb[2].mxu0  ;;  %v401_v35 = vpop.f32.mrb[2].mxu1  ;;  %v3538_v29 = vshll.u32 %v5071_v18, 16 }
  0xff   : > { %v4544_v36 = vpop.f32.mrb[3].mxu0  ;;  %v4550_v39 = vpop.f32.mrb[3].mxu1  ;;  %v3536_v35 = vshrl.u32 %v5071_v18, 16 }
 0x100   : > { %v3540_v36 = vrot.slane %v3538_v29, 1  ;;  %v4375_v39 = vld [vmem:[%s5217_s7 + $0x10] sm:$0x3] }
 0x101   : > { %4866 = vmatmul.mubr.msk.bf16.vlgmr.msra.gmra.mrb[108].mxu0 %vm301_vm3, %v4315_v33  ;;  %4872 = vmatmul.mubr.msk.bf16.vlgmr.msra.gmra.mrb[108].mxu1 %vm301_vm3, %v4316_v37  ;;  %v3481_v33 = vshrl.u32 %v5070_v15, 16 }
 0x102   : > { %4876 = vmatpush3.bf16.msra.mxu0 %v5541_v38  ;;  %4882 = vmatpush3.bf16.msra.mxu1 %v5541_v38 }
 0x103   : > { %4877 = vmatprep.mubr.msk.bf16.mxu0 %vm5137_vm2, %v5136_v2  ;;  %4883 = vmatprep.mubr.msk.bf16.mxu1 %vm5137_vm2, %v5136_v2 }
 0x104   : > { %v5551_v46 = vpop.f32.mrb[4].mxu0  ;;  %4887 = vmatprep.subr.bf16.mxu0 %v5136_v2  ;;  %v5556_v47 = vpop.f32.mrb[4].mxu1  ;;  %4893 = vmatprep.subr.bf16.mxu1 %v5136_v2 }
 0x105   : > { %v4555_v48 = vpop.f32.mrb[5].mxu0  ;;  %v4561_v51 = vpop.f32.mrb[5].mxu1 }
 0x106   : > { %v456_v52 = vpop.f32.mrb[6].mxu0  ;;  %v511_v55 = vpop.f32.mrb[6].mxu1  ;;  %v3541_v48 = vor.u32 %v3540_v36, %v3536_v35  ;;  %v5609_v51 = vsel %vm305_vm1, %v4375_v39, 0 }
 0x107   : > { %v4556_v56 = vpop.f32.mrb[7].mxu0  ;;  %v4562_v57 = vpop.f32.mrb[7].mxu1 }
 0x109   : > { %4878 = vmatmul.mubr.msk.bf16.vlgmr.msra.gmra.mrb[112].mxu0 %vm301_vm3, %v3153_v49  ;;  %4884 = vmatmul.mubr.msk.bf16.vlgmr.msra.gmra.mrb[112].mxu1 %vm301_vm3, %v3211_v53  ;;  %v5073_v53 = vld [vmem:[%s5212_s4 + $0x18] sm:$0x1e]  }
 0x10a   : > { %4888 = vmatpush3.bf16.msra.mxu0 %v5541_v38  ;;  %4894 = vmatpush3.bf16.msra.mxu1 %v5541_v38  ;;  %v3668_v61 = vrot.slane %v5073_v53, 1 }
 0x10b   : > { %4889 = vmatprep.mubr.msk.bf16.mxu0 %vm5137_vm2, %v5136_v2  ;;  %4895 = vmatprep.mubr.msk.bf16.mxu1 %vm5137_vm2, %v5136_v2 }
 0x10c   : > { %v5567_v0 = vpop.f32.mrb[8].mxu0  ;;  %4899 = vmatprep.subr.bf16.mxu0 %v5136_v2  ;;  %v5572_v1 = vpop.f32.mrb[8].mxu1  ;;  %4905 = vmatprep.subr.bf16.mxu1 %v5136_v2 }
 0x10d   : > { %v4567_v3 = vpop.f32.mrb[9].mxu0  ;;  %v4573_v6 = vpop.f32.mrb[9].mxu1 }
 0x10e   : > { %v566_v7 = vpop.f32.mrb[10].mxu0  ;;  %v621_v10 = vpop.f32.mrb[10].mxu1 }
 0x10f   : > { %v4568_v11 = vpop.f32.mrb[11].mxu0  ;;  %v4574_v12 = vpop.f32.mrb[11].mxu1 }
 0x111   : > { %4890 = vmatmul.mubr.msk.bf16.vlgmr.msra.gmra.mrb[116].mxu0 %vm301_vm3, %v3266_v4  ;;  %4896 = vmatmul.mubr.msk.bf16.vlgmr.msra.gmra.mrb[116].mxu1 %vm301_vm3, %v3321_v8  ;;  %v5074_v4 = vld [vmem:[%s5212_s4 + $0x20] sm:$0x1e]  }
 0x112   : > { %4900 = vmatpush3.bf16.msra.mxu0 %v5541_v38  ;;  %4906 = vmatpush3.bf16.msra.mxu1 %v5541_v38  ;;  %v3717_v8 = vrot.slane %v5074_v4, 1 }
 0x113   : > { %4901 = vmatprep.mubr.msk.bf16.mxu0 %vm5137_vm2, %v5136_v2  ;;  %4907 = vmatprep.mubr.msk.bf16.mxu1 %vm5137_vm2, %v5136_v2 }
 0x114   : > { %v5583_v19 = vpop.f32.mrb[12].mxu0  ;;  %4911 = vmatprep.subr.bf16.mxu0 %v5136_v2  ;;  %v5588_v20 = vpop.f32.mrb[12].mxu1  ;;  %4917 = vmatprep.subr.bf16.mxu1 %v5136_v2 }
 0x115   : > { %v4579_v21 = vpop.f32.mrb[13].mxu0  ;;  %v4585_v24 = vpop.f32.mrb[13].mxu1 }
 0x116   : > { %v676_v25 = vpop.f32.mrb[14].mxu0  ;;  %v731_v30 = vpop.f32.mrb[14].mxu1 }
 0x117   : > { %v4580_v31 = vpop.f32.mrb[15].mxu0  ;;  %v4586_v32 = vpop.f32.mrb[15].mxu1 }
 0x118   : > { %v5078_v32 = vld [vmem:[%s5212_s4 + $0x40] sm:$0x1e]  }
 0x119   : > { %4902 = vmatmul.mubr.msk.bf16.vlgmr.msra.gmra.mrb[120].mxu0 %vm301_vm3, %v3376_v22  ;;  %4908 = vmatmul.mubr.msk.bf16.vlgmr.msra.gmra.mrb[120].mxu1 %vm301_vm3, %v3431_v27  ;;  %v3815_v22 = vrot.slane %v5076_v16, 1  ;;  %v3913_v36 = vrot.slane %v5078_v32, 1 }
 0x11a   : > { %4912 = vmatpush3.bf16.msra.mxu0 %v5541_v38  ;;  %4918 = vmatpush3.bf16.msra.mxu1 %v5541_v38  ;;  %v3486_v38 = vor.u32 %v3485_v34, %v3481_v33 }
 0x11b   : > { %4913 = vmatprep.mubr.msk.bf16.mxu0 %vm5137_vm2, %v5136_v2  ;;  %4919 = vmatprep.mubr.msk.bf16.mxu1 %vm5137_vm2, %v5136_v2 }
 0x11c   : > { %v774_v37 = vpop.f32.mrb[16].mxu0  ;;  %4923 = vmatprep.subr.bf16.mxu0 %v5136_v2  ;;  %v817_v41 = vpop.f32.mrb[16].mxu1  ;;  %4929 = vmatprep.subr.bf16.mxu1 %v5136_v2 }
 0x11d   : > { %v5602_v40 = vadd.f32 %v774_v37, %v5529_v26  ;;  %v4591_v42 = vpop.f32.mrb[17].mxu0  ;;  %v5606_v43 = vadd.f32 %v817_v41, %v5535_v28  ;;  %v4597_v44 = vpop.f32.mrb[17].mxu1  ;;  %v5072_v26 = vld [vmem:[%s5212_s4 + $0x10] sm:$0x1e]  }
 0x11e   : > { %v777_v45 = vpop.f32.mrb[18].mxu0  ;;  %v820_v49 = vpop.f32.mrb[18].mxu1  ;;  %v3616_v57 = vrot.slane %v5072_v26, 1 }
 0x11f   : > { %v4592_v50 = vpop.f32.mrb[19].mxu0  ;;  %v4598_v52 = vpop.f32.mrb[19].mxu1 }
 0x121   : > { %4914 = vmatmul.mubr.msk.bf16.vlgmr.msra.gmra.mrb[124].mxu0 %vm301_vm3, %v3486_v38  ;;  %4920 = vmatmul.mubr.msk.bf16.vlgmr.msra.gmra.mrb[124].mxu1 %vm301_vm3, %v3541_v48 }
 0x122   : > { %4924 = vmatpush3.bf16.msra.mxu0 %v5609_v51  ;;  %4930 = vmatpush3.bf16.msra.mxu1 %v5609_v51 }
 0x123   : > { %4925 = vmatprep.mubr.msk.bf16.mxu0 %vm5137_vm2, %v5136_v2  ;;  %4931 = vmatprep.mubr.msk.bf16.mxu1 %vm5137_vm2, %v5136_v2 }
 0x124   : > { %v860_v28 = vpop.f32.mrb[20].mxu0  ;;  %4935 = vmatprep.subr.bf16.mxu0 %v5136_v2  ;;  %v903_v55 = vpop.f32.mrb[20].mxu1  ;;  %4941 = vmatprep.subr.bf16.mxu1 %v5136_v2 }
 0x125   : > { %v5623_v54 = vadd.f32 %v860_v28, %v5551_v46  ;;  %v4603_v56 = vpop.f32.mrb[21].mxu0  ;;  %v5627_v58 = vadd.f32 %v903_v55, %v5556_v47  ;;  %v4609_v59 = vpop.f32.mrb[21].mxu1  ;;  %v5075_v46 = vld [vmem:[%s5212_s4 + $0x28] sm:$0x1e]  }
 0x126   : > { %v863_v60 = vpop.f32.mrb[22].mxu0  ;;  %v906_v62 = vpop.f32.mrb[22].mxu1  ;;  %v3766_v12 = vrot.slane %v5075_v46, 1 }
 0x127   : > { %v4604_v63 = vpop.f32.mrb[23].mxu0  ;;  %v4610_v3 = vpop.f32.mrb[23].mxu1 }
 0x129   : > { %4926 = vmatmul.mubr.msk.bf16.vlgmr.msra.gmra.mrb[128].mxu0 %vm301_vm3, %v3616_v57  ;;  %4932 = vmatmul.mubr.msk.bf16.vlgmr.msra.gmra.mrb[128].mxu1 %vm301_vm3, %v3668_v61 }
 0x12a   : > { %4936 = vmatpush3.bf16.msra.mxu0 %v5609_v51  ;;  %4942 = vmatpush3.bf16.msra.mxu1 %v5609_v51 }
 0x12b   : > { %4937 = vmatprep.mubr.msk.bf16.mxu0 %vm5137_vm2, %v5136_v2  ;;  %4943 = vmatprep.mubr.msk.bf16.mxu1 %vm5137_vm2, %v5136_v2 }
 0x12c   : > { %v946_v47 = vpop.f32.mrb[24].mxu0  ;;  %4947 = vmatprep.subr.bf16.mxu0 %v5136_v2  ;;  %v989_v6 = vpop.f32.mrb[24].mxu1  ;;  %4953 = vmatprep.subr.bf16.mxu1 %v5136_v2 }
 0x12d   : > { %v5641_v5 = vadd.f32 %v946_v47, %v5567_v0  ;;  %v4615_v7 = vpop.f32.mrb[25].mxu0  ;;  %v5645_v9 = vadd.f32 %v989_v6, %v5572_v1  ;;  %v4621_v10 = vpop.f32.mrb[25].mxu1  ;;  %v5077_v0 = vld [vmem:[%s5212_s4 + $0x38] sm:$0x1e]  }
 0x12e   : > { %v949_v11 = vpop.f32.mrb[26].mxu0  ;;  %v992_v13 = vpop.f32.mrb[26].mxu1  ;;  %v3864_v27 = vrot.slane %v5077_v0, 1 }
 0x12f   : > { %v4616_v14 = vpop.f32.mrb[27].mxu0  ;;  %v4622_v15 = vpop.f32.mrb[27].mxu1 }
 0x131   : > { %4938 = vmatmul.mubr.msk.bf16.vlgmr.msra.gmra.mrb[132].mxu0 %vm301_vm3, %v3717_v8  ;;  %4944 = vmatmul.mubr.msk.bf16.vlgmr.msra.gmra.mrb[132].mxu1 %vm301_vm3, %v3766_v12 }
 0x132   : > { %4948 = vmatpush3.bf16.msra.mxu0 %v5609_v51  ;;  %4954 = vmatpush3.bf16.msra.mxu1 %v5609_v51 }
 0x133   : > { %4949 = vmatprep.mubr.msk.bf16.mxu0 %vm5137_vm2, %v5136_v2  ;;  %4955 = vmatprep.mubr.msk.bf16.mxu1 %vm5137_vm2, %v5136_v2 }
 0x134   : > { %v1032_v1 = vpop.f32.mrb[28].mxu0  ;;  %4959 = vmatprep.subr.bf16.mxu0 %v5136_v2  ;;  %v1075_v18 = vpop.f32.mrb[28].mxu1  ;;  %4965 = vmatprep.subr.bf16.mxu1 %v5136_v2 }
 0x135   : > { %v1033_v17 = vadd.f32 %v1032_v1, %v5583_v19  ;;  %v4627_v21 = vpop.f32.mrb[29].mxu0  ;;  %v1076_v23 = vadd.f32 %v1075_v18, %v5588_v20  ;;  %v4633_v24 = vpop.f32.mrb[29].mxu1  ;;  %v5079_v19 = vld [vmem:[%s5212_s4 + $0x48] sm:$0x1e]  }
 0x136   : > { %v1035_v25 = vpop.f32.mrb[30].mxu0  ;;  %v1078_v29 = vpop.f32.mrb[30].mxu1  ;;  %v3962_v42 = vrot.slane %v5079_v19, 1 }
 0x137   : > { %v4628_v30 = vpop.f32.mrb[31].mxu0  ;;  %v4634_v31 = vpop.f32.mrb[31].mxu1 }
 0x139   : > { %4950 = vmatmul.mubr.msk.bf16.vlgmr.msra.gmra.mrb[136].mxu0 %vm301_vm3, %v3815_v22  ;;  %4956 = vmatmul.mubr.msk.bf16.vlgmr.msra.gmra.mrb[136].mxu1 %vm301_vm3, %v3864_v27 }
 0x13a   : > { %4960 = vmatpush3.bf16.msra.mxu0 %v5609_v51  ;;  %4966 = vmatpush3.bf16.msra.mxu1 %v5609_v51 }
 0x13b   : > { %4961 = vmatprep.mubr.msk.bf16.mxu0 %vm5137_vm2, %v5136_v2  ;;  %4967 = vmatprep.mubr.msk.bf16.mxu1 %vm5137_vm2, %v5136_v2 }
 0x13c   : > { %v1145_v20 = vpop.f32.mrb[32].mxu0  ;;  %v1194_v34 = vpop.f32.mrb[32].mxu1 }
 0x13d   : > { %v1494_v33 = vadd.f32 %v1145_v20, %v5602_v40  ;;  %v4639_v35 = vpop.f32.mrb[33].mxu0  ;;  %v1495_v37 = vadd.f32 %v1194_v34, %v5606_v43  ;;  %v4645_v39 = vpop.f32.mrb[33].mxu1 }
 0x13e   : > { %v1148_v41 = vpop.f32.mrb[34].mxu0  ;;  %v1197_v38 = vpop.f32.mrb[34].mxu1 }
 0x13f   : > { %v4640_v44 = vpop.f32.mrb[35].mxu0  ;;  %v4646_v45 = vpop.f32.mrb[35].mxu1 }
 0x141   : > { %4962 = vmatmul.mubr.msk.bf16.vlgmr.msra.gmra.mrb[140].mxu0 %vm301_vm3, %v3913_v36  ;;  %4968 = vmatmul.mubr.msk.bf16.vlgmr.msra.gmra.mrb[140].mxu1 %vm301_vm3, %v3962_v42 }
 0x144   : > { %v1243_v48 = vpop.f32.mrb[36].mxu0  ;;  %v1292_v49 = vpop.f32.mrb[36].mxu1 }
 0x145   : > { %v1496_v2 = vadd.f32 %v1243_v48, %v5623_v54  ;;  %v4651_v40 = vpop.f32.mrb[37].mxu0  ;;  %v1497_v50 = vadd.f32 %v1292_v49, %v5627_v58  ;;  %v4657_v51 = vpop.f32.mrb[37].mxu1 }
 0x146   : > { %v1246_v52 = vpop.f32.mrb[38].mxu0  ;;  %v1295_v43 = vpop.f32.mrb[38].mxu1 }
 0x147   : > { %v4652_v26 = vpop.f32.mrb[39].mxu0  ;;  %v4658_v53 = vpop.f32.mrb[39].mxu1 }
 0x14c   : > { %v1341_v28 = vpop.f32.mrb[40].mxu0  ;;  %v1390_v56 = vpop.f32.mrb[40].mxu1 }
 0x14d   : > { %v1498_v55 = vadd.f32 %v1341_v28, %v5641_v5  ;;  %v4663_v57 = vpop.f32.mrb[41].mxu0  ;;  %v1499_v59 = vadd.f32 %v1390_v56, %v5645_v9  ;;  %v4669_v60 = vpop.f32.mrb[41].mxu1 }
 0x14e   : > { %v1344_v61 = vpop.f32.mrb[42].mxu0  ;;  %v1393_v62 = vpop.f32.mrb[42].mxu1 }
 0x14f   : > { %v4664_v54 = vpop.f32.mrb[43].mxu0  ;;  %v4670_v63 = vpop.f32.mrb[43].mxu1 }
 0x154   : > { %v1439_v3 = vpop.f32.mrb[44].mxu0  ;;  %v1488_v58 = vpop.f32.mrb[44].mxu1 }
 0x155   : > { %v1500_v4 = vadd.f32 %v1439_v3, %v1033_v17  ;;  %v4675_v46 = vpop.f32.mrb[45].mxu0  ;;  %v1501_v47 = vadd.f32 %v1488_v58, %v1076_v23  ;;  %v4681_v6 = vpop.f32.mrb[45].mxu1 }
 0x156   : > { %v1442_v7 = vpop.f32.mrb[46].mxu0  ;;  %v1491_v8 = vpop.f32.mrb[46].mxu1 }
 0x157   : > { %v4676_v10 = vpop.f32.mrb[47].mxu0  ;;  %v4682_v11 = vpop.f32.mrb[47].mxu1 }
 0x15c   : > { %v1553_v5 = vpop.f32.mrb[48].mxu0  ;;  %v1596_v13 = vpop.f32.mrb[48].mxu1 }
 0x15d   : > { %v1860_v12 = vadd.f32 %v1553_v5, %v1494_v33  ;;  %v4687_v14 = vpop.f32.mrb[49].mxu0  ;;  %v1861_v9 = vadd.f32 %v1596_v13, %v1495_v37  ;;  %v4693_v15 = vpop.f32.mrb[49].mxu1 }
 0x15e   : > { %v1556_v16 = vpop.f32.mrb[50].mxu0  ;;  %v1599_v0 = vpop.f32.mrb[50].mxu1 }
 0x15f   : > { %v4688_v1 = vpop.f32.mrb[51].mxu0  ;;  %v4694_v18 = vpop.f32.mrb[51].mxu1 }
 0x164   : > { %v1639_v21 = vpop.f32.mrb[52].mxu0  ;;  %v1682_v22 = vpop.f32.mrb[52].mxu1 }
 0x165   : > { %v1862_v17 = vadd.f32 %v1639_v21, %v1496_v2  ;;  %v4699_v24 = vpop.f32.mrb[53].mxu0  ;;  %v1863_v23 = vadd.f32 %v1682_v22, %v1497_v50  ;;  %v4705_v25 = vpop.f32.mrb[53].mxu1 }
 0x166   : > { %v1642_v27 = vpop.f32.mrb[54].mxu0  ;;  %v1685_v29 = vpop.f32.mrb[54].mxu1 }
 0x167   : > { %v4700_v30 = vpop.f32.mrb[55].mxu0  ;;  %v4706_v31 = vpop.f32.mrb[55].mxu1 }
 0x16c   : > { %v1725_v32 = vpop.f32.mrb[56].mxu0  ;;  %v1768_v20 = vpop.f32.mrb[56].mxu1 }
 0x16d   : > { %v1864_v19 = vadd.f32 %v1725_v32, %v1498_v55  ;;  %v4711_v33 = vpop.f32.mrb[57].mxu0  ;;  %v1865_v34 = vadd.f32 %v1768_v20, %v1499_v59  ;;  %v4717_v35 = vpop.f32.mrb[57].mxu1 }
 0x16e   : > { %v1728_v36 = vpop.f32.mrb[58].mxu0  ;;  %v1771_v37 = vpop.f32.mrb[58].mxu1 }
 0x16f   : > { %v4712_v39 = vpop.f32.mrb[59].mxu0  ;;  %v4718_v41 = vpop.f32.mrb[59].mxu1 }
 0x174   : > { %v1811_v42 = vpop.f32.mrb[60].mxu0  ;;  %v1854_v44 = vpop.f32.mrb[60].mxu1 }
 0x175   : > { %v1866_v38 = vadd.f32 %v1811_v42, %v1500_v4  ;;  %v4723_v45 = vpop.f32.mrb[61].mxu0  ;;  %v1867_v48 = vadd.f32 %v1854_v44, %v1501_v47  ;;  %v4729_v2 = vpop.f32.mrb[61].mxu1 }
 0x176   : > { %v1814_v49 = vpop.f32.mrb[62].mxu0  ;;  %v1857_v40 = vpop.f32.mrb[62].mxu1 }
 0x177   : > { %v4724_v50 = vpop.f32.mrb[63].mxu0  ;;  %v4730_v51 = vpop.f32.mrb[63].mxu1 }
 0x17c   : > { %v1938_v52 = vpop.f32.mrb[64].mxu0  ;;  %v1993_v26 = vpop.f32.mrb[64].mxu1 }
 0x17d   : > { %v2329_v43 = vadd.f32 %v1938_v52, %v1860_v12  ;;  %v4735_v53 = vpop.f32.mrb[65].mxu0  ;;  %v2330_v28 = vadd.f32 %v1993_v26, %v1861_v9  ;;  %v4741_v55 = vpop.f32.mrb[65].mxu1 }
 0x17e   : > { %v1941_v56 = vpop.f32.mrb[66].mxu0  ;;  %v1996_v57 = vpop.f32.mrb[66].mxu1 }
 0x17f   : > { %v4736_v59 = vpop.f32.mrb[67].mxu0  ;;  %v4742_v60 = vpop.f32.mrb[67].mxu1 }
 0x184   : > { %v2048_v61 = vpop.f32.mrb[68].mxu0  ;;  %v2103_v54 = vpop.f32.mrb[68].mxu1 }
 0x185   : > { %v2331_v62 = vadd.f32 %v2048_v61, %v1862_v17  ;;  %v4747_v63 = vpop.f32.mrb[69].mxu0  ;;  %v2332_v3 = vadd.f32 %v2103_v54, %v1863_v23  ;;  %v4753_v4 = vpop.f32.mrb[69].mxu1 }
 0x186   : > { %v2051_v58 = vpop.f32.mrb[70].mxu0  ;;  %v2106_v46 = vpop.f32.mrb[70].mxu1 }
 0x187   : > { %v4748_v47 = vpop.f32.mrb[71].mxu0  ;;  %v4754_v6 = vpop.f32.mrb[71].mxu1 }
 0x18c   : > { %v2158_v7 = vpop.f32.mrb[72].mxu0  ;;  %v2213_v10 = vpop.f32.mrb[72].mxu1 }
 0x18d   : > { %v2333_v8 = vadd.f32 %v2158_v7, %v1864_v19  ;;  %v4759_v11 = vpop.f32.mrb[73].mxu0  ;;  %v2334_v5 = vadd.f32 %v2213_v10, %v1865_v34  ;;  %v4765_v12 = vpop.f32.mrb[73].mxu1 }
 0x18e   : > { %v2161_v13 = vpop.f32.mrb[74].mxu0  ;;  %v2216_v14 = vpop.f32.mrb[74].mxu1 }
 0x18f   : > { %v4760_v9 = vpop.f32.mrb[75].mxu0  ;;  %v4766_v15 = vpop.f32.mrb[75].mxu1 }
 0x194   : > { %v2268_v16 = vpop.f32.mrb[76].mxu0  ;;  %v2323_v1 = vpop.f32.mrb[76].mxu1 }
 0x195   : > { %v2335_v0 = vadd.f32 %v2268_v16, %v1866_v38  ;;  %v4771_v18 = vpop.f32.mrb[77].mxu0  ;;  %v2336_v21 = vadd.f32 %v2323_v1, %v1867_v48  ;;  %v4777_v17 = vpop.f32.mrb[77].mxu1 }
 0x196   : > { %v2271_v22 = vpop.f32.mrb[78].mxu0  ;;  %v2326_v24 = vpop.f32.mrb[78].mxu1 }
 0x197   : > { %v4772_v23 = vpop.f32.mrb[79].mxu0  ;;  %v4778_v25 = vpop.f32.mrb[79].mxu1 }
 0x19c   : > { %v2401_v27 = vpop.f32.mrb[80].mxu0  ;;  %v2450_v30 = vpop.f32.mrb[80].mxu1 }
 0x19d   : > { %v2750_v29 = vadd.f32 %v2401_v27, %v2329_v43  ;;  %v4783_v31 = vpop.f32.mrb[81].mxu0  ;;  %v2751_v32 = vadd.f32 %v2450_v30, %v2330_v28  ;;  %v4789_v19 = vpop.f32.mrb[81].mxu1 }
 0x19e   : > { %v2404_v20 = vpop.f32.mrb[82].mxu0  ;;  %v2453_v33 = vpop.f32.mrb[82].mxu1 }
 0x19f   : > { %v4784_v34 = vpop.f32.mrb[83].mxu0  ;;  %v4790_v35 = vpop.f32.mrb[83].mxu1 }
 0x1a4   : > { %v2499_v36 = vpop.f32.mrb[84].mxu0  ;;  %v2548_v39 = vpop.f32.mrb[84].mxu1 }
 0x1a5   : > { %v2752_v37 = vadd.f32 %v2499_v36, %v2331_v62  ;;  %v4795_v41 = vpop.f32.mrb[85].mxu0  ;;  %v2753_v42 = vadd.f32 %v2548_v39, %v2332_v3  ;;  %v4801_v38 = vpop.f32.mrb[85].mxu1 }
 0x1a6   : > { %v2502_v44 = vpop.f32.mrb[86].mxu0  ;;  %v2551_v45 = vpop.f32.mrb[86].mxu1 }
 0x1a7   : > { %v4796_v48 = vpop.f32.mrb[87].mxu0  ;;  %v4802_v2 = vpop.f32.mrb[87].mxu1 }
 0x1ac   : > { %v2597_v49 = vpop.f32.mrb[88].mxu0  ;;  %v2646_v50 = vpop.f32.mrb[88].mxu1 }
 0x1ad   : > { %v2754_v40 = vadd.f32 %v2597_v49, %v2333_v8  ;;  %v4807_v51 = vpop.f32.mrb[89].mxu0  ;;  %v2755_v52 = vadd.f32 %v2646_v50, %v2334_v5  ;;  %v4813_v43 = vpop.f32.mrb[89].mxu1 }
 0x1ae   : > { %v2600_v26 = vpop.f32.mrb[90].mxu0  ;;  %v2649_v53 = vpop.f32.mrb[90].mxu1 }
 0x1af   : > { %v4808_v28 = vpop.f32.mrb[91].mxu0  ;;  %v4814_v55 = vpop.f32.mrb[91].mxu1 }
 0x1b4   : > { %v2695_v56 = vpop.f32.mrb[92].mxu0  ;;  %v2744_v59 = vpop.f32.mrb[92].mxu1 }
 0x1b5   : > { %v2756_v57 = vadd.f32 %v2695_v56, %v2335_v0  ;;  %v4819_v60 = vpop.f32.mrb[93].mxu0  ;;  %v2757_v61 = vadd.f32 %v2744_v59, %v2336_v21  ;;  %v4825_v62 = vpop.f32.mrb[93].mxu1 }
 0x1b6   : > { %v2698_v54 = vpop.f32.mrb[94].mxu0  ;;  %v2747_v63 = vpop.f32.mrb[94].mxu1 }
 0x1b7   : > { %v4820_v3 = vpop.f32.mrb[95].mxu0  ;;  %v4826_v4 = vpop.f32.mrb[95].mxu1 }
 0x1bc   : > { %v2809_v58 = vpop.f32.mrb[96].mxu0  ;;  %v2852_v47 = vpop.f32.mrb[96].mxu1 }
 0x1bd   : > { %v3116_v46 = vadd.f32 %v2809_v58, %v2750_v29  ;;  %v4831_v6 = vpop.f32.mrb[97].mxu0  ;;  %v3117_v7 = vadd.f32 %v2852_v47, %v2751_v32  ;;  %v4837_v8 = vpop.f32.mrb[97].mxu1 }
 0x1be   : > { %v2812_v10 = vpop.f32.mrb[98].mxu0  ;;  %v2855_v11 = vpop.f32.mrb[98].mxu1 }
 0x1bf   : > { %v4832_v5 = vpop.f32.mrb[99].mxu0  ;;  %v4838_v12 = vpop.f32.mrb[99].mxu1 }
 0x1c4   : > { %v2895_v13 = vpop.f32.mrb[100].mxu0  ;;  %v2938_v9 = vpop.f32.mrb[100].mxu1 }
 0x1c5   : > { %v3118_v14 = vadd.f32 %v2895_v13, %v2752_v37  ;;  %v4843_v15 = vpop.f32.mrb[101].mxu0  ;;  %v3119_v16 = vadd.f32 %v2938_v9, %v2753_v42  ;;  %v4849_v0 = vpop.f32.mrb[101].mxu1 }
 0x1c6   : > { %v2898_v1 = vpop.f32.mrb[102].mxu0  ;;  %v2941_v18 = vpop.f32.mrb[102].mxu1 }
 0x1c7   : > { %v4844_v21 = vpop.f32.mrb[103].mxu0  ;;  %v4850_v17 = vpop.f32.mrb[103].mxu1  ;;  %v4014_v18 = vld [vmem:[#allocation2] sm:$0xff] }
 0x1cc   : > { %v2981_v22 = vpop.f32.mrb[104].mxu0  ;;  %v3024_v23 = vpop.f32.mrb[104].mxu1 }
 0x1cd   : > { %v3120_v24 = vadd.f32 %v2981_v22, %v2754_v40  ;;  %v4855_v25 = vpop.f32.mrb[105].mxu0  ;;  %v3121_v27 = vadd.f32 %v3024_v23, %v2755_v52  ;;  %v4861_v29 = vpop.f32.mrb[105].mxu1  ;;  %v4015_v22 = vld [vmem:[#allocation2 + $0x8] sm:$0xff] }
 0x1ce   : > { %v2984_v30 = vpop.f32.mrb[106].mxu0  ;;  %v3027_v31 = vpop.f32.mrb[106].mxu1 }
 0x1cf   : > { %v4856_v32 = vpop.f32.mrb[107].mxu0  ;;  %v4862_v19 = vpop.f32.mrb[107].mxu1 }
 0x1d4   : > { %v3067_v20 = vpop.f32.mrb[108].mxu0  ;;  %v3110_v34 = vpop.f32.mrb[108].mxu1 }
 0x1d5   : > { %v3122_v33 = vadd.f32 %v3067_v20, %v2756_v57  ;;  %v4867_v35 = vpop.f32.mrb[109].mxu0  ;;  %v3123_v36 = vadd.f32 %v3110_v34, %v2757_v61  ;;  %v4873_v37 = vpop.f32.mrb[109].mxu1 }
 0x1d6   : > { %v3070_v39 = vpop.f32.mrb[110].mxu0  ;;  %v3113_v41 = vpop.f32.mrb[110].mxu1 }
 0x1d7   : > { %v4868_v42 = vpop.f32.mrb[111].mxu0  ;;  %v4874_v38 = vpop.f32.mrb[111].mxu1 }
 0x1dc   : > { %v3194_v44 = vpop.f32.mrb[112].mxu0  ;;  %v3249_v48 = vpop.f32.mrb[112].mxu1 }
 0x1dd   : > { %v3585_v45 = vadd.f32 %v3194_v44, %v3116_v46  ;;  %v4879_v2 = vpop.f32.mrb[113].mxu0  ;;  %v3586_v49 = vadd.f32 %v3249_v48, %v3117_v7  ;;  %v4885_v40 = vpop.f32.mrb[113].mxu1 }
 0x1de   : > { %v3197_v50 = vpop.f32.mrb[114].mxu0  ;;  %v3252_v51 = vpop.f32.mrb[114].mxu1  ;;  %v4018_v40 = vld [vmem:[#allocation2 + $0x20] sm:$0xff] }
 0x1df   : > { %v4880_v52 = vpop.f32.mrb[115].mxu0  ;;  %v4886_v43 = vpop.f32.mrb[115].mxu1 }
 0x1e0   : > { %v4019_v52 = vld [vmem:[#allocation2 + $0x28] sm:$0xff] }
 0x1e4   : > { %v3304_v26 = vpop.f32.mrb[116].mxu0  ;;  %v3359_v28 = vpop.f32.mrb[116].mxu1 }
 0x1e5   : > { %v3587_v53 = vadd.f32 %v3304_v26, %v3118_v14  ;;  %v4891_v55 = vpop.f32.mrb[117].mxu0  ;;  %v3588_v56 = vadd.f32 %v3359_v28, %v3119_v16  ;;  %v4897_v57 = vpop.f32.mrb[117].mxu1 }
 0x1e6   : > { %v3307_v59 = vpop.f32.mrb[118].mxu0  ;;  %v3362_v60 = vpop.f32.mrb[118].mxu1 }
 0x1e7   : > { %v4892_v61 = vpop.f32.mrb[119].mxu0  ;;  %v4898_v62 = vpop.f32.mrb[119].mxu1 }
 0x1e8   : > { %v4020_v62 = vld [vmem:[#allocation2 + $0x30] sm:$0xff] }
 0x1ec   : > { %v3414_v54 = vpop.f32.mrb[120].mxu0  ;;  %v3469_v3 = vpop.f32.mrb[120].mxu1 }
 0x1ed   : > { %v3589_v63 = vadd.f32 %v3414_v54, %v3120_v24  ;;  %v4903_v4 = vpop.f32.mrb[121].mxu0  ;;  %v3590_v58 = vadd.f32 %v3469_v3, %v3121_v27  ;;  %v4909_v46 = vpop.f32.mrb[121].mxu1 }
 0x1ee   : > { %v3417_v47 = vpop.f32.mrb[122].mxu0  ;;  %v3472_v6 = vpop.f32.mrb[122].mxu1 }
 0x1ef   : > { %v4904_v7 = vpop.f32.mrb[123].mxu0  ;;  %v4910_v8 = vpop.f32.mrb[123].mxu1 }
 0x1f4   : > { %v3524_v10 = vpop.f32.mrb[124].mxu0  ;;  %v3579_v5 = vpop.f32.mrb[124].mxu1 }
 0x1f5   : > { %v3591_v11 = vadd.f32 %v3524_v10, %v3122_v33  ;;  %v4915_v12 = vpop.f32.mrb[125].mxu0  ;;  %v3592_v13 = vadd.f32 %v3579_v5, %v3123_v36  ;;  %v4921_v14 = vpop.f32.mrb[125].mxu1  ;;  %v4016_v33 = vld [vmem:[#allocation2 + $0x10] sm:$0xff]  ;;  %v4017_v36 = vld [vmem:[#allocation2 + $0x18] sm:$0xff] }
 0x1f6   : > { %v3527_v9 = vpop.f32.mrb[126].mxu0  ;;  %v3582_v15 = vpop.f32.mrb[126].mxu1 }
 0x1f7   : > { %v4916_v16 = vpop.f32.mrb[127].mxu0  ;;  %v4922_v0 = vpop.f32.mrb[127].mxu1 }
 0x1fc   : > { %v3657_v1 = vpop.f32.mrb[128].mxu0  ;;  %v3706_v17 = vpop.f32.mrb[128].mxu1 }
 0x1fd   : > { %v4006_v21 = vadd.f32 %v3657_v1, %v3585_v45  ;;  %v4927_v24 = vpop.f32.mrb[129].mxu0  ;;  %v4007_v23 = vadd.f32 %v3706_v17, %v3586_v49  ;;  %v4933_v25 = vpop.f32.mrb[129].mxu1 }
 0x1fe   : > { %v3660_v27 = vpop.f32.mrb[130].mxu0  ;;  %v3709_v30 = vpop.f32.mrb[130].mxu1 }
 0x1ff   : > { %v4022_v29 = vadd.f32 %v4014_v18, %v4006_v21  ;;  %v4928_v31 = vpop.f32.mrb[131].mxu0  ;;  %v4023_v32 = vadd.f32 %v4015_v22, %v4007_v23  ;;  %v4934_v19 = vpop.f32.mrb[131].mxu1 }
 0x201   : > { %4031 = vst.msk [vmem:[#allocation2] sm:$0xff] %vm4030_vm4, %v4022_v29  ;;  %4032 = vst.msk [vmem:[#allocation2 + $0x8] sm:$0xff] %vm4030_vm4, %v4023_v32 }
 0x204   : > { %v3755_v20 = vpop.f32.mrb[132].mxu0  ;;  %v3804_v35 = vpop.f32.mrb[132].mxu1 }
 0x205   : > { %v4008_v34 = vadd.f32 %v3755_v20, %v3587_v53  ;;  %v4939_v37 = vpop.f32.mrb[133].mxu0  ;;  %v4009_v39 = vadd.f32 %v3804_v35, %v3588_v56  ;;  %v4945_v41 = vpop.f32.mrb[133].mxu1 }
 0x206   : > { %v3758_v42 = vpop.f32.mrb[134].mxu0  ;;  %v3807_v44 = vpop.f32.mrb[134].mxu1 }
 0x207   : > { %v4024_v38 = vadd.f32 %v4016_v33, %v4008_v34  ;;  %v4940_v45 = vpop.f32.mrb[135].mxu0  ;;  %v4025_v48 = vadd.f32 %v4017_v36, %v4009_v39  ;;  %v4946_v2 = vpop.f32.mrb[135].mxu1 }
 0x208   : > { %v4043_v12 = vld [vmem:[#allocation2] sm:$0xff] (!%p4392_p11) }
 0x209   : > { %4033 = vst.msk [vmem:[#allocation2 + $0x10] sm:$0xff] %vm4030_vm4, %v4024_v38  ;;  %4034 = vst.msk [vmem:[#allocation2 + $0x18] sm:$0xff] %vm4030_vm4, %v4025_v48 }
 0x20a   : > { %4051 = vst.msk [vmem:[%s5223_s24] sm:$0xff] (!%p4392_p11), %vm4030_vm4, %v4043_v12 }
 0x20c   : > { %v3853_v49 = vpop.f32.mrb[136].mxu0  ;;  %v3902_v51 = vpop.f32.mrb[136].mxu1 }
 0x20d   : > { %v4010_v50 = vadd.f32 %v3853_v49, %v3589_v63  ;;  %v4951_v43 = vpop.f32.mrb[137].mxu0  ;;  %v4011_v26 = vadd.f32 %v3902_v51, %v3590_v58  ;;  %v4957_v53 = vpop.f32.mrb[137].mxu1  ;;  %v4021_v63 = vld [vmem:[#allocation2 + $0x38] sm:$0xff] }
 0x20e   : > { %v3856_v28 = vpop.f32.mrb[138].mxu0  ;;  %v3905_v56 = vpop.f32.mrb[138].mxu1 }
 0x20f   : > { %v4026_v55 = vadd.f32 %v4018_v40, %v4010_v50  ;;  %v4952_v57 = vpop.f32.mrb[139].mxu0  ;;  %v4027_v59 = vadd.f32 %v4019_v52, %v4011_v26  ;;  %v4958_v60 = vpop.f32.mrb[139].mxu1 }
 0x210   : > { %v4046_v14 = vld [vmem:[#allocation2 + $0x18] sm:$0xff] (!%p4392_p11) }
 0x211   : > { %4035 = vst.msk [vmem:[#allocation2 + $0x20] sm:$0xff] %vm4030_vm4, %v4026_v55  ;;  %4036 = vst.msk [vmem:[#allocation2 + $0x28] sm:$0xff] %vm4030_vm4, %v4027_v59 }
 0x212   : > { %4054 = vst.msk [vmem:[%s5223_s24 + $0x18] sm:$0xff] (!%p4392_p11), %vm4030_vm4, %v4046_v14 }
 0x213   : > { %4042 = sbr.rel (%p4392_p11) target bundleno = 546 (0x222), region = 40 }
 0x214   : > { %v3951_v61 = vpop.f32.mrb[140].mxu0  ;;  %v4000_v3 = vpop.f32.mrb[140].mxu1 }
 0x215   : > { %v4012_v54 = vadd.f32 %v3951_v61, %v3591_v11  ;;  %v4963_v4 = vpop.f32.mrb[141].mxu0  ;;  %v4013_v46 = vadd.f32 %v4000_v3, %v3592_v13  ;;  %v4969_v47 = vpop.f32.mrb[141].mxu1  ;;  %v4044_v11 = vld [vmem:[#allocation2 + $0x8] sm:$0xff] (!%p4392_p11)  ;;  %v4045_v13 = vld [vmem:[#allocation2 + $0x10] sm:$0xff] (!%p4392_p11) }
 0x216   : > { %v3954_v58 = vpop.f32.mrb[142].mxu0  ;;  %v4003_v7 = vpop.f32.mrb[142].mxu1  ;;  %4052 = vst.msk [vmem:[%s5223_s24 + $0x8] sm:$0xff] (!%p4392_p11), %vm4030_vm4, %v4044_v11  ;;  %4053 = vst.msk [vmem:[%s5223_s24 + $0x10] sm:$0xff] (!%p4392_p11), %vm4030_vm4, %v4045_v13 }
 0x217   : > { %v4028_v6 = vadd.f32 %v4020_v62, %v4012_v54  ;;  %v4964_v8 = vpop.f32.mrb[143].mxu0  ;;  %v4029_v10 = vadd.f32 %v4021_v63, %v4013_v46  ;;  %v4970_v5 = vpop.f32.mrb[143].mxu1 }
 0x218   : > { %v4047_v9 = vld [vmem:[#allocation2 + $0x20] sm:$0xff] (!%p4392_p11)  ;;  %v4048_v15 = vld [vmem:[#allocation2 + $0x28] sm:$0xff] (!%p4392_p11) }
 0x219   : > { %4037 = vst.msk [vmem:[#allocation2 + $0x30] sm:$0xff] %vm4030_vm4, %v4028_v6  ;;  %4038 = vst.msk [vmem:[#allocation2 + $0x38] sm:$0xff] %vm4030_vm4, %v4029_v10 }
 0x21a   : > { %4055 = vst.msk [vmem:[%s5223_s24 + $0x20] sm:$0xff] %vm4030_vm4, %v4047_v9  ;;  %4056 = vst.msk [vmem:[%s5223_s24 + $0x28] sm:$0xff] %vm4030_vm4, %v4048_v15 }
 0x220   : > { %v4049_v16 = vld [vmem:[#allocation2 + $0x30] sm:$0xff]  ;;  %v4050_v0 = vld [vmem:[#allocation2 + $0x38] sm:$0xff] }
 0x221   : > { %4057 = vst.msk [vmem:[%s5223_s24 + $0x30] sm:$0xff] %vm4030_vm4, %v4049_v16  ;;  %4058 = vst.msk [vmem:[%s5223_s24 + $0x38] sm:$0xff] %vm4030_vm4, %v4050_v0 }
 0x222 PF: > { %s13_s18 = sadd.s32 1, %s5134_s18   ;;  %s5729_s12 = smov %s5122_s15 }
 0x223   : > { %p10_p12 = scmp.ge.s32.totalorder %s13_s18, 50   ;;  %s5730_s13 = smov %s5126_s16 }
 0x224   : > { %s5731_s14 = smov %s5130_s17  ;;  %s5732_s15 = smov %s5736_s19 }
 0x225   : > { %s5733_s16 = smov %s5740_s20  ;;  %s5734_s17 = smov %s5744_s21 }
 0x226   :  { %12 = sbr.rel (!%p10_p12) target bundleno = 4 (0x4), region = 83 }

// kernel: _lambda_.4
= control target key start
LH: loop header
LB: loop body
LE: loop exit
PB: predicated region body
PF: predicated region fallthrough
CT: control target
= control target key end

     0   :  { %s5165_s12 = smov 0   ;;  %s5167_s13 = smov 0   ;;  %s5732_s0 = inlined_call_operand.vmem [shape: bf16[2,10,10,10,8], index: 0, kind: input, shape index: {}]   ;;  %s5733_s1 = inlined_call_operand.vmem [shape: bf16[3,3,3,8,8], index: 1, kind: input, shape index: {}]   ;;  %s5734_s2 = inlined_call_operand.vmem [shape: f32[1,1,8], index: 2, kind: input, shape index: {}]   ;;  %s5735_s3 = inlined_call_operand.vmem [shape: f32[2,8,8,8,8], index: 3, kind: output, shape index: {}]  }
   0x1   :  { %s5169_s14 = smov 0   ;;  %s5171_s15 = smov 0  }
   0x2   :  { %s5173_s16 = smov 0   ;;  %s5175_s17 = smov 0  }
   0x3   :  { %s5177_s18 = smov 0  }
   0x4 LB: > { %s25_s19 = sadd.s32 1, %s5129_s15  ;;  %s28_s20 = sadd.s32 1, %s5133_s16  ;;  %s5141_s18 = sphi %s5177_s18, %s13_s18   ;;  %s5137_s17 = sphi %s5175_s17, %s5741_s17   ;;  %s5133_s16 = sphi %s5173_s16, %s5740_s16   ;;  %s5129_s15 = sphi %s5171_s15, %s5739_s15   ;;  %s5125_s14 = sphi %s5169_s14, %s5738_s14   ;;  %s5121_s13 = sphi %s5167_s13, %s5737_s13   ;;  %s5117_s12 = sphi %s5165_s12, %s5736_s12  }
   0x5   : > { %p26_p0 = scmp.ge.s32.totalorder %s25_s19, 3  ;;  %p4183_p1 = scmp.ge.s32.totalorder %s5141_s18, 1 }
   0x6   : > { %p178_p2 = scmp.lt.s32.totalorder %s5141_s18, 49  ;;  %s32_s21 = sadd.s32 1, %s5137_s17 }
   0x7   : > { %s5743_s19 = smov (%p26_p0, %s25_s19), 0  ;;  %s5745_s20 = smov (!%p26_p0, %s28_s20), %s5133_s16 }
   0x8   : > { %p179_p3 = pnand %p4183_p1, %p178_p2  ;;  %p30_p4 = scmp.ge.s32.totalorder %s5745_s20, 8 }
   0x9   : > { %s216_s22 = sadd.s32 (!%p179_p3), %s5117_s12, %s5121_s13  ;;  %p217_p6 = scmp.lt.s32.totalorder (!%p179_p3), %s5125_s14, 1 }
   0xa   : > { %s5747_s20 = smov (%p30_p4, %s5745_s20), 0  ;;  %s5749_s21 = smov (!%p30_p4, %s32_s21), %s5137_s17 }
   0xb   : > { %p34_p5 = scmp.ge.s32.totalorder %s5749_s21, 2  ;;  %182 = sbr.rel (%p179_p3) target bundleno = 548 (0x224), region = 32 }
   0xc   : > { %p219_p7 = scmp.lt.s32.totalorder (!%p179_p3), %s216_s22, 9  ;;  %p227_p8 = scmp.lt.s32.totalorder (!%p179_p3), %s5117_s12, 2 }
   0xd   : > { %s5751_s21 = smov (%p34_p5, %s5749_s21), 0  ;;  %p234_p9 = scmp.lt.s32.totalorder (!%p179_p3), %s5121_s13, 7 }
   0xe   : > { %p4189_p10 = scmp.ne.s32.totalorder (!%p179_p3), %s5117_s12, 0 }
  0x12   : > { %s5753_s14 = smov (!%p217_p6, %s5125_s14), 1  ;;  %s5755_s22 = smov (!%p219_p7, %s216_s22), 9 }
  0x13   : > { %s4979_s23 = smul.u32 200, %s5753_s14  ;;  %s4187_s8 = sshll.u32 %s5753_s14, 6  ;;  %v4190_v0 = vld [vmem:[%s5734_s2] ss:$0 sm:$0xff] (!%p4189_p10)  ;;  %vm253_vm0 = vcmask (!%p4189_p10), 64512  }
  0x14   : > { %s4978_s24 = smul.u32 20, %s5755_s22  ;;  %s5757_s13 = smov (!%p234_p9, %s5121_s13), 7  ;;  %254 = vst.msk [vmem:[#allocation2] sm:$0xff] (!%p4189_p10), %vm253_vm0, %v4190_v0  ;;  %255 = vst.msk [vmem:[#allocation2 + $0x8] sm:$0xff] (!%p4189_p10), %vm253_vm0, %v4190_v0 }
  0x15   : > { %s228_s25 = scalar_select %p227_p8, %s5117_s12, 2 }
  0x16   : > { %s223_s26 = sadd.s32 %s4979_s23, %s4978_s24  ;;  %s4186_s9 = sshll.u32 %s5757_s13, 3  ;;  %256 = vst.msk [vmem:[#allocation2 + $0x10] sm:$0xff] (!%p4189_p10), %vm253_vm0, %v4190_v0  ;;  %257 = vst.msk [vmem:[#allocation2 + $0x18] sm:$0xff] (!%p4189_p10), %vm253_vm0, %v4190_v0 }
  0x17   : > { %s4184_s27 = sshll.u32 %s223_s26, 2  ;;  %s4980_s28 = smul.u32 36, %s228_s25  ;;  %258 = vst.msk [vmem:[#allocation2 + $0x20] sm:$0xff] (!%p4189_p10), %vm253_vm0, %v4190_v0  ;;  %259 = vst.msk [vmem:[#allocation2 + $0x28] sm:$0xff] (!%p4189_p10), %vm253_vm0, %v4190_v0 }
  0x18   : > { %s5219_s4 = scalar_lea.vmem %s5732_s0, %s4184_s27  ;;  %s238_s10 = sadd.s32 %s4187_s8, %s4186_s9  ;;  %260 = vst.msk [vmem:[#allocation2 + $0x30] sm:$0xff] (!%p4189_p10), %vm253_vm0, %v4190_v0  ;;  %261 = vst.msk [vmem:[#allocation2 + $0x38] sm:$0xff] (!%p4189_p10), %vm253_vm0, %v4190_v0 }
  0x19   : > { %s5224_s7 = scalar_lea.vmem %s5733_s1, %s4980_s28  ;;  %s4188_s11 = sshll.u32 %s238_s10, 3 }
  0x1a   : > { %s5230_s24 = scalar_lea.vmem %s5735_s3, %s4188_s11  ;;  %245 = sbr.rel (%p4189_p10) target bundleno = 33 (0x21), region = 36 }
  0x21 PF: > { %v4191_v1 = vld [vmem:[%s5224_s7 + $0x4] sm:$0xf]  ;;  %vm305_vm1 = vcmask 1043456   ;;  %v5143_v2 = vmov 0.0   ;;  %vm5144_vm2 = vmmov 0   ;;  %vm301_vm3 = vcmask 64512  }
  0x22   : > { %4546 = vmatprep.subr.bf16.mxu0 %v5143_v2  ;;  %4552 = vmatprep.subr.bf16.mxu1 %v5143_v2  ;;  %v5240_v3 = vsel %vm305_vm1, %v4191_v1, 0  ;;  %v5039_v4 = vld [vmem:[%s5219_s4] sm:$0x1f]   ;;  %v5040_v5 = vld [vmem:[%s5219_s4 + $0x8] sm:$0x1f]   ;;  %p4399_p11 = scmp.ne.s32.totalorder %s5117_s12, 2 }
  0x23   : > { %4547 = vmatpush3.bf16.msra.mxu0 %v5240_v3  ;;  %4553 = vmatpush3.bf16.msra.mxu1 %v5240_v3  ;;  %v295_v6 = vshrl.u32 %v5039_v4, 16  ;;  %v297_v7 = vshll.u32 %v5039_v4, 16  ;;  %v5041_v8 = vld [vmem:[%s5219_s4 + $0x10] sm:$0x1f]   ;;  %v355_v9 = vshrl.u32 %v5040_v5, 16  ;;  %v357_v10 = vshll.u32 %v5040_v5, 16 }
  0x24   : > { %4548 = vmatprep.mubr.msk.bf16.mxu0 %vm5144_vm2, %v5143_v2  ;;  %4554 = vmatprep.mubr.msk.bf16.mxu1 %vm5144_vm2, %v5143_v2  ;;  %v5042_v11 = vld [vmem:[%s5219_s4 + $0x18] sm:$0x1f]   ;;  %v412_v13 = vshll.u32 %v5041_v8, 16  ;;  %v410_v18 = vshrl.u32 %v5041_v8, 16  ;;  %v5043_v20 = vld [vmem:[%s5219_s4 + $0x20] sm:$0x1f]  }
  0x25   : > { %4558 = vmatprep.subr.bf16.mxu0 %v5143_v2  ;;  %4564 = vmatprep.subr.bf16.mxu1 %v5143_v2  ;;  %v299_v12 = vrot.slane %v297_v7, 1  ;;  %v359_v14 = vrot.slane %v357_v10, 1  ;;  %v467_v15 = vshll.u32 %v5042_v11, 16  ;;  %v465_v21 = vshrl.u32 %v5042_v11, 16  ;;  %v5044_v23 = vld [vmem:[%s5219_s4 + $0x28] sm:$0x1f]  }
  0x26   : > { %v414_v19 = vrot.slane %v412_v13, 1  ;;  %v522_v25 = vshll.u32 %v5043_v20, 16  ;;  %v577_v27 = vshll.u32 %v5044_v23, 16  ;;  %v5045_v28 = vld [vmem:[%s5219_s4 + $0x30] sm:$0x1f]   ;;  %v520_v29 = vshrl.u32 %v5043_v20, 16 }
  0x27   : > { %v300_v16 = vor.u32 %v299_v12, %v295_v6  ;;  %v360_v17 = vor.u32 %v359_v14, %v355_v9  ;;  %v469_v22 = vrot.slane %v467_v15, 1  ;;  %v575_v31 = vshrl.u32 %v5044_v23, 16  ;;  %v5046_v33 = vld [vmem:[%s5219_s4 + $0x38] sm:$0x1f]   ;;  %v270_v42 = vld [vmem:[%s5224_s7] sm:$0xf] }
  0x28   : > { %v415_v24 = vor.u32 %v414_v19, %v410_v18  ;;  %v524_v30 = vrot.slane %v522_v25, 1  ;;  %v579_v32 = vrot.slane %v577_v27, 1  ;;  %v632_v35 = vshll.u32 %v5045_v28, 16  ;;  %v262_v46 = vld [vmem:[%s5219_s4] sm:$0xf] }
  0x29   : > { %4549 = vmatmul.mubr.msk.bf16.vlgmr.msra.gmra.mrb[0].mxu0 %vm301_vm3, %v300_v16  ;;  %4555 = vmatmul.mubr.msk.bf16.vlgmr.msra.gmra.mrb[0].mxu1 %vm301_vm3, %v360_v17  ;;  %v470_v26 = vor.u32 %v469_v22, %v465_v21  ;;  %v687_v37 = vshll.u32 %v5046_v33, 16  ;;  %v630_v38 = vshrl.u32 %v5045_v28, 16  ;;  %v685_v40 = vshrl.u32 %v5046_v33, 16  ;;  %v263_v47 = vld [vmem:[%s5219_s4 + $0x8] sm:$0xf] }
  0x2a   : > { %4559 = vmatpush3.bf16.msra.mxu0 %v5240_v3  ;;  %4565 = vmatpush3.bf16.msra.mxu1 %v5240_v3  ;;  %v525_v34 = vor.u32 %v524_v30, %v520_v29  ;;  %v580_v36 = vor.u32 %v579_v32, %v575_v31  ;;  %v634_v39 = vrot.slane %v632_v35, 1  ;;  %v738_v45 = vsel %vm305_vm1, %v270_v42, 0  ;;  %v264_v48 = vld [vmem:[%s5219_s4 + $0x10] sm:$0xf]  ;;  %v265_v49 = vld [vmem:[%s5219_s4 + $0x18] sm:$0xf] }
  0x2b   : > { %4560 = vmatprep.mubr.msk.bf16.mxu0 %vm5144_vm2, %v5143_v2  ;;  %4566 = vmatprep.mubr.msk.bf16.mxu1 %vm5144_vm2, %v5143_v2  ;;  %v689_v41 = vrot.slane %v687_v37, 1  ;;  %v266_v50 = vld [vmem:[%s5219_s4 + $0x20] sm:$0xf]  ;;  %v267_v51 = vld [vmem:[%s5219_s4 + $0x28] sm:$0xf] }
  0x2c   : > { %4570 = vmatprep.subr.bf16.mxu0 %v5143_v2  ;;  %4576 = vmatprep.subr.bf16.mxu1 %v5143_v2  ;;  %v635_v43 = vor.u32 %v634_v39, %v630_v38  ;;  %v4216_v52 = vld [vmem:[%s5224_s7 + $0x8] sm:$0xf]  ;;  %v268_v53 = vld [vmem:[%s5219_s4 + $0x30] sm:$0xf]  ;;  %v269_v54 = vld [vmem:[%s5219_s4 + $0x38] sm:$0xf] }
  0x2d   : > { %v690_v44 = vor.u32 %v689_v41, %v685_v40  ;;  %v1109_v55 = vsel %vm305_vm1, %v4216_v52, 0  ;;  %v5047_v56 = vld [vmem:[%s5219_s4] sm:$0x1e]   ;;  %v5048_v57 = vld [vmem:[%s5219_s4 + $0x8] sm:$0x1e]  }
  0x2e   : > { %v1104_v58 = vrot.slane %v5047_v56, 1  ;;  %v1156_v59 = vrot.slane %v5048_v57, 1  ;;  %v5049_v60 = vld [vmem:[%s5219_s4 + $0x10] sm:$0x1e]   ;;  %v5050_v61 = vld [vmem:[%s5219_s4 + $0x18] sm:$0x1e]  }
  0x2f   : > { %v1205_v62 = vrot.slane %v5049_v60, 1  ;;  %v1254_v63 = vrot.slane %v5050_v61, 1  ;;  %v5051_v0 = vld [vmem:[%s5219_s4 + $0x20] sm:$0x1e]   ;;  %v5052_v1 = vld [vmem:[%s5219_s4 + $0x28] sm:$0x1e]  }
  0x30   : > { %v1352_v4 = vrot.slane %v5052_v1, 1  ;;  %v5053_v5 = vld [vmem:[%s5219_s4 + $0x30] sm:$0x1e]   ;;  %v5054_v6 = vld [vmem:[%s5219_s4 + $0x38] sm:$0x1e]  }
  0x31   : > { %4561 = vmatmul.mubr.msk.bf16.vlgmr.msra.gmra.mrb[4].mxu0 %vm301_vm3, %v415_v24  ;;  %4567 = vmatmul.mubr.msk.bf16.vlgmr.msra.gmra.mrb[4].mxu1 %vm301_vm3, %v470_v26  ;;  %v4241_v7 = vld [vmem:[%s5224_s7 + $0xc] sm:$0xf]  ;;  %v1401_v8 = vrot.slane %v5053_v5, 1  ;;  %v1450_v9 = vrot.slane %v5054_v6, 1  ;;  %v4233_v11 = vld [vmem:[%s5219_s4 + $0x8] sm:$0xf] }
  0x32   : > { %4571 = vmatpush3.bf16.msra.mxu0 %v5240_v3  ;;  %4577 = vmatpush3.bf16.msra.mxu1 %v5240_v3  ;;  %v1517_v10 = vsel %vm305_vm1, %v4241_v7, 0  ;;  %v4234_v12 = vld [vmem:[%s5219_s4 + $0x10] sm:$0xf]  ;;  %v4235_v13 = vld [vmem:[%s5219_s4 + $0x18] sm:$0xf] }
  0x33   : > { %4572 = vmatprep.mubr.msk.bf16.mxu0 %vm5144_vm2, %v5143_v2  ;;  %4578 = vmatprep.mubr.msk.bf16.mxu1 %vm5144_vm2, %v5143_v2  ;;  %v4236_v14 = vld [vmem:[%s5219_s4 + $0x20] sm:$0xf]  ;;  %v4237_v15 = vld [vmem:[%s5219_s4 + $0x28] sm:$0xf]  ;;  %v4238_v16 = vld [vmem:[%s5219_s4 + $0x30] sm:$0xf] }
  0x34   : > { %4582 = vmatprep.subr.bf16.mxu0 %v5143_v2  ;;  %4588 = vmatprep.subr.bf16.mxu1 %v5143_v2  ;;  %v5055_v17 = vld [vmem:[%s5219_s4 + $0x8] sm:$0x1f]   ;;  %v5056_v18 = vld [vmem:[%s5219_s4 + $0x10] sm:$0x1f]   ;;  %v4239_v21 = vld [vmem:[%s5219_s4 + $0x38] sm:$0xf] }
  0x35   : > { %v4266_v19 = vld [vmem:[%s5224_s7 + $0x10] sm:$0xf]  ;;  %v1894_v20 = vshll.u32 %v5055_v17, 16  ;;  %v1952_v22 = vshll.u32 %v5056_v18, 16  ;;  %v4240_v23 = vld [vmem:[%s5219_s4 + $0x40] sm:$0xf] }
  0x36   : > { %v1902_v24 = vsel %vm305_vm1, %v4266_v19, 0  ;;  %v1892_v25 = vshrl.u32 %v5055_v17, 16  ;;  %v5057_v27 = vld [vmem:[%s5219_s4 + $0x18] sm:$0x1f]   ;;  %v1950_v28 = vshrl.u32 %v5056_v18, 16 }
  0x37   : > { %v1896_v26 = vrot.slane %v1894_v20, 1  ;;  %v1954_v29 = vrot.slane %v1952_v22, 1  ;;  %v5058_v30 = vld [vmem:[%s5219_s4 + $0x20] sm:$0x1f]   ;;  %v2007_v32 = vshll.u32 %v5057_v27, 16  ;;  %v2005_v35 = vshrl.u32 %v5057_v27, 16 }
  0x38   : > { %v5059_v37 = vld [vmem:[%s5219_s4 + $0x28] sm:$0x1f]   ;;  %v2060_v38 = vshrl.u32 %v5058_v30, 16  ;;  %v5060_v40 = vld [vmem:[%s5219_s4 + $0x30] sm:$0x1f]  }
  0x39   : > { %4573 = vmatmul.mubr.msk.bf16.vlgmr.msra.gmra.mrb[8].mxu0 %vm301_vm3, %v525_v34  ;;  %4579 = vmatmul.mubr.msk.bf16.vlgmr.msra.gmra.mrb[8].mxu1 %vm301_vm3, %v580_v36  ;;  %v1897_v31 = vor.u32 %v1896_v26, %v1892_v25  ;;  %v1955_v33 = vor.u32 %v1954_v29, %v1950_v28  ;;  %v2062_v34 = vshll.u32 %v5058_v30, 16  ;;  %v2009_v36 = vrot.slane %v2007_v32, 1  ;;  %v5066_v5 = vld [vmem:[%s5219_s4 + $0x20] sm:$0x1e]   ;;  %v4316_v18 = vld [vmem:[%s5219_s4 + $0x10] sm:$0xf] }
  0x3a   : > { %4583 = vmatpush3.bf16.msra.mxu0 %v5240_v3  ;;  %4589 = vmatpush3.bf16.msra.mxu1 %v5240_v3  ;;  %v1303_v3 = vrot.slane %v5051_v0, 1  ;;  %v2117_v42 = vshll.u32 %v5059_v37, 16  ;;  %v5064_v0 = vld [vmem:[%s5219_s4 + $0x10] sm:$0x1e]   ;;  %v2510_v7 = vrot.slane %v5066_v5, 1 }
  0x3b   : > { %4584 = vmatprep.mubr.msk.bf16.mxu0 %vm5144_vm2, %v5143_v2  ;;  %4590 = vmatprep.mubr.msk.bf16.mxu1 %vm5144_vm2, %v5143_v2  ;;  %v2064_v39 = vrot.slane %v2062_v34, 1  ;;  %v2010_v41 = vor.u32 %v2009_v36, %v2005_v35  ;;  %v4317_v19 = vld [vmem:[%s5219_s4 + $0x18] sm:$0xf]  ;;  %v4318_v20 = vld [vmem:[%s5219_s4 + $0x20] sm:$0xf] }
  0x3c   : > { %4594 = vmatprep.subr.bf16.mxu0 %v5143_v2  ;;  %4600 = vmatprep.subr.bf16.mxu1 %v5143_v2  ;;  %v4320_v22 = vld [vmem:[%s5219_s4 + $0x30] sm:$0xf]  ;;  %v5072_v25 = vld [vmem:[%s5219_s4 + $0x18] sm:$0x1f]  }
  0x3d   : > { %v4349_v27 = vld [vmem:[%s5224_s7 + $0x1c] sm:$0xf]  ;;  %v3208_v34 = vshll.u32 %v5072_v25, 16 }
  0x41   : > { %4585 = vmatmul.mubr.msk.bf16.vlgmr.msra.gmra.mrb[12].mxu0 %vm301_vm3, %v635_v43  ;;  %4591 = vmatmul.mubr.msk.bf16.vlgmr.msra.gmra.mrb[12].mxu1 %vm301_vm3, %v690_v44  ;;  %v2065_v43 = vor.u32 %v2064_v39, %v2060_v38  ;;  %v2172_v44 = vshll.u32 %v5060_v40, 16  ;;  %v5548_v38 = vsel %vm305_vm1, %v4349_v27, 0 }
  0x42   : > { %4595 = vmatpush3.bf16.msra.mxu0 %v738_v45  ;;  %4601 = vmatpush3.bf16.msra.mxu1 %v738_v45 }
  0x43   : > { %4596 = vmatprep.mubr.msk.bf16.mxu0 %vm5144_vm2, %v5143_v2  ;;  %4602 = vmatprep.mubr.msk.bf16.mxu1 %vm5144_vm2, %v5143_v2 }
  0x44   : > { %4606 = vmatprep.subr.bf16.mxu0 %v5143_v2  ;;  %4612 = vmatprep.subr.bf16.mxu1 %v5143_v2 }
  0x49   : > { %4597 = vmatmul.mubr.msk.bf16.vlgmr.msra.gmra.mrb[16].mxu0 %vm301_vm3, %v262_v46  ;;  %4603 = vmatmul.mubr.msk.bf16.vlgmr.msra.gmra.mrb[16].mxu1 %vm301_vm3, %v263_v47  ;;  %v2119_v46 = vrot.slane %v2117_v42, 1  ;;  %v5061_v47 = vld [vmem:[%s5219_s4 + $0x38] sm:$0x1f]   ;;  %v5073_v42 = vld [vmem:[%s5219_s4 + $0x20] sm:$0x1f]  }
  0x4a   : > { %4607 = vmatpush3.bf16.msra.mxu0 %v738_v45  ;;  %4613 = vmatpush3.bf16.msra.mxu1 %v738_v45  ;;  %v2227_v52 = vshll.u32 %v5061_v47, 16 }
  0x4b   : > { %4608 = vmatprep.mubr.msk.bf16.mxu0 %vm5144_vm2, %v5143_v2  ;;  %4614 = vmatprep.mubr.msk.bf16.mxu1 %vm5144_vm2, %v5143_v2 }
  0x4c   : > { %4618 = vmatprep.subr.bf16.mxu0 %v5143_v2  ;;  %4624 = vmatprep.subr.bf16.mxu1 %v5143_v2  ;;  %v2229_v56 = vrot.slane %v2227_v52, 1 }
  0x51   : > { %4609 = vmatmul.mubr.msk.bf16.vlgmr.msra.gmra.mrb[20].mxu0 %vm301_vm3, %v264_v48  ;;  %4615 = vmatmul.mubr.msk.bf16.vlgmr.msra.gmra.mrb[20].mxu1 %vm301_vm3, %v265_v49  ;;  %v2170_v48 = vshrl.u32 %v5060_v40, 16  ;;  %v2174_v49 = vrot.slane %v2172_v44, 1  ;;  %v3210_v44 = vrot.slane %v3208_v34, 1 }
  0x52   : > { %4619 = vmatpush3.bf16.msra.mxu0 %v738_v45  ;;  %4625 = vmatpush3.bf16.msra.mxu1 %v738_v45 }
  0x53   : > { %4620 = vmatprep.mubr.msk.bf16.mxu0 %vm5144_vm2, %v5143_v2  ;;  %4626 = vmatprep.mubr.msk.bf16.mxu1 %vm5144_vm2, %v5143_v2 }
  0x54   : > { %4630 = vmatprep.subr.bf16.mxu0 %v5143_v2  ;;  %4636 = vmatprep.subr.bf16.mxu1 %v5143_v2 }
  0x59   : > { %4621 = vmatmul.mubr.msk.bf16.vlgmr.msra.gmra.mrb[24].mxu0 %vm301_vm3, %v266_v50  ;;  %4627 = vmatmul.mubr.msk.bf16.vlgmr.msra.gmra.mrb[24].mxu1 %vm301_vm3, %v267_v51  ;;  %v5062_v50 = vld [vmem:[%s5219_s4 + $0x40] sm:$0x1f]  }
  0x5a   : > { %4631 = vmatpush3.bf16.msra.mxu0 %v738_v45  ;;  %4637 = vmatpush3.bf16.msra.mxu1 %v738_v45  ;;  %v2115_v45 = vshrl.u32 %v5059_v37, 16  ;;  %v2280_v57 = vshrl.u32 %v5062_v50, 16  ;;  %v4323_v37 = vld [vmem:[%s5219_s4 + $0x48] sm:$0xf] }
  0x5b   : > { %4632 = vmatprep.mubr.msk.bf16.mxu0 %vm5144_vm2, %v5143_v2  ;;  %4638 = vmatprep.mubr.msk.bf16.mxu1 %vm5144_vm2, %v5143_v2 }
  0x5c   : > { %4642 = vmatprep.subr.bf16.mxu0 %v5143_v2  ;;  %4648 = vmatprep.subr.bf16.mxu1 %v5143_v2  ;;  %v2120_v51 = vor.u32 %v2119_v46, %v2115_v45  ;;  %v5074_v45 = vld [vmem:[%s5219_s4 + $0x28] sm:$0x1f]  }
  0x61   : > { %4633 = vmatmul.mubr.msk.bf16.vlgmr.msra.gmra.mrb[28].mxu0 %vm301_vm3, %v268_v53  ;;  %4639 = vmatmul.mubr.msk.bf16.vlgmr.msra.gmra.mrb[28].mxu1 %vm301_vm3, %v269_v54  ;;  %v2175_v53 = vor.u32 %v2174_v49, %v2170_v48  ;;  %v2282_v54 = vshll.u32 %v5062_v50, 16  ;;  %v3263_v50 = vshll.u32 %v5073_v42, 16 }
  0x62   : > { %4643 = vmatpush3.bf16.msra.mxu0 %v1109_v55  ;;  %4649 = vmatpush3.bf16.msra.mxu1 %v1109_v55 }
  0x63   : > { %4644 = vmatprep.mubr.msk.bf16.mxu0 %vm5144_vm2, %v5143_v2  ;;  %4650 = vmatprep.mubr.msk.bf16.mxu1 %vm5144_vm2, %v5143_v2 }
  0x64   : > { %4654 = vmatprep.subr.bf16.mxu0 %v5143_v2  ;;  %4660 = vmatprep.subr.bf16.mxu1 %v5143_v2 }
  0x69   : > { %4645 = vmatmul.mubr.msk.bf16.vlgmr.msra.gmra.mrb[32].mxu0 %vm301_vm3, %v1104_v58  ;;  %4651 = vmatmul.mubr.msk.bf16.vlgmr.msra.gmra.mrb[32].mxu1 %vm301_vm3, %v1156_v59  ;;  %v2284_v58 = vrot.slane %v2282_v54, 1  ;;  %v4299_v59 = vld [vmem:[%s5224_s7 + $0x14] sm:$0xf]  ;;  %v3318_v54 = vshll.u32 %v5074_v45, 16 }
  0x6a   : > { %4655 = vmatpush3.bf16.msra.mxu0 %v1109_v55  ;;  %4661 = vmatpush3.bf16.msra.mxu1 %v1109_v55 }
  0x6b   : > { %4656 = vmatprep.mubr.msk.bf16.mxu0 %vm5144_vm2, %v5143_v2  ;;  %4662 = vmatprep.mubr.msk.bf16.mxu1 %vm5144_vm2, %v5143_v2  ;;  %v2285_v61 = vor.u32 %v2284_v58, %v2280_v57  ;;  %v3261_v58 = vshrl.u32 %v5073_v42, 16 }
  0x6c   : > { %4666 = vmatprep.subr.bf16.mxu0 %v5143_v2  ;;  %4672 = vmatprep.subr.bf16.mxu1 %v5143_v2 }
  0x71   : > { %4657 = vmatmul.mubr.msk.bf16.vlgmr.msra.gmra.mrb[36].mxu0 %vm301_vm3, %v1205_v62  ;;  %4663 = vmatmul.mubr.msk.bf16.vlgmr.msra.gmra.mrb[36].mxu1 %vm301_vm3, %v1254_v63  ;;  %v2365_v62 = vsel %vm305_vm1, %v4299_v59, 0  ;;  %v5063_v63 = vld [vmem:[%s5219_s4 + $0x8] sm:$0x1e]   ;;  %v3265_v59 = vrot.slane %v3263_v50, 1 }
  0x72   : > { %4667 = vmatpush3.bf16.msra.mxu0 %v1109_v55  ;;  %4673 = vmatpush3.bf16.msra.mxu1 %v1109_v55  ;;  %v2360_v1 = vrot.slane %v5063_v63, 1  ;;  %v5076_v63 = vld [vmem:[%s5219_s4 + $0x38] sm:$0x1f]  }
  0x73   : > { %4668 = vmatprep.mubr.msk.bf16.mxu0 %vm5144_vm2, %v5143_v2  ;;  %4674 = vmatprep.mubr.msk.bf16.mxu1 %vm5144_vm2, %v5143_v2 }
  0x74   : > { %4678 = vmatprep.subr.bf16.mxu0 %v5143_v2  ;;  %4684 = vmatprep.subr.bf16.mxu1 %v5143_v2 }
  0x79   : > { %4669 = vmatmul.mubr.msk.bf16.vlgmr.msra.gmra.mrb[40].mxu0 %vm301_vm3, %v1303_v3  ;;  %4675 = vmatmul.mubr.msk.bf16.vlgmr.msra.gmra.mrb[40].mxu1 %vm301_vm3, %v1352_v4  ;;  %v2412_v3 = vrot.slane %v5064_v0, 1  ;;  %v5065_v4 = vld [vmem:[%s5219_s4 + $0x18] sm:$0x1e]  }
  0x7a   : > { %4679 = vmatpush3.bf16.msra.mxu0 %v1109_v55  ;;  %4685 = vmatpush3.bf16.msra.mxu1 %v1109_v55  ;;  %v2225_v55 = vshrl.u32 %v5061_v47, 16  ;;  %v2461_v6 = vrot.slane %v5065_v4, 1  ;;  %v3266_v4 = vor.u32 %v3265_v59, %v3261_v58 }
  0x7b   : > { %4680 = vmatprep.mubr.msk.bf16.mxu0 %vm5144_vm2, %v5143_v2  ;;  %4686 = vmatprep.mubr.msk.bf16.mxu1 %vm5144_vm2, %v5143_v2 }
  0x7c   : > { %4690 = vmatprep.subr.bf16.mxu0 %v5143_v2  ;;  %4696 = vmatprep.subr.bf16.mxu1 %v5143_v2  ;;  %v2230_v60 = vor.u32 %v2229_v56, %v2225_v55 }
  0x81   : > { %4681 = vmatmul.mubr.msk.bf16.vlgmr.msra.gmra.mrb[44].mxu0 %vm301_vm3, %v1401_v8  ;;  %4687 = vmatmul.mubr.msk.bf16.vlgmr.msra.gmra.mrb[44].mxu1 %vm301_vm3, %v1450_v9  ;;  %v5067_v8 = vld [vmem:[%s5219_s4 + $0x28] sm:$0x1e]   ;;  %v5068_v9 = vld [vmem:[%s5219_s4 + $0x30] sm:$0x1e]  }
  0x82   : > { %4691 = vmatpush3.bf16.msra.mxu0 %v1517_v10  ;;  %4697 = vmatpush3.bf16.msra.mxu1 %v1517_v10 }
  0x83   : > { %4692 = vmatprep.mubr.msk.bf16.mxu0 %vm5144_vm2, %v5143_v2  ;;  %4698 = vmatprep.mubr.msk.bf16.mxu1 %vm5144_vm2, %v5143_v2 }
  0x84   : > { %4702 = vmatprep.subr.bf16.mxu0 %v5143_v2  ;;  %4708 = vmatprep.subr.bf16.mxu1 %v5143_v2 }
  0x89   : > { %4693 = vmatmul.mubr.msk.bf16.vlgmr.msra.gmra.mrb[48].mxu0 %vm301_vm3, %v4233_v11  ;;  %4699 = vmatmul.mubr.msk.bf16.vlgmr.msra.gmra.mrb[48].mxu1 %vm301_vm3, %v4234_v12  ;;  %v2608_v11 = vrot.slane %v5068_v9, 1  ;;  %v5069_v12 = vld [vmem:[%s5219_s4 + $0x38] sm:$0x1e]   ;;  %v3428_v9 = vshll.u32 %v5076_v63, 16 }
  0x8a   : > { %4703 = vmatpush3.bf16.msra.mxu0 %v1517_v10  ;;  %4709 = vmatpush3.bf16.msra.mxu1 %v1517_v10 }
  0x8b   : > { %4704 = vmatprep.mubr.msk.bf16.mxu0 %vm5144_vm2, %v5143_v2  ;;  %4710 = vmatprep.mubr.msk.bf16.mxu1 %vm5144_vm2, %v5143_v2 }
  0x8c   : > { %4714 = vmatprep.subr.bf16.mxu0 %v5143_v2  ;;  %4720 = vmatprep.subr.bf16.mxu1 %v5143_v2 }
  0x91   : > { %4705 = vmatmul.mubr.msk.bf16.vlgmr.msra.gmra.mrb[52].mxu0 %vm301_vm3, %v4235_v13  ;;  %4711 = vmatmul.mubr.msk.bf16.vlgmr.msra.gmra.mrb[52].mxu1 %vm301_vm3, %v4236_v14  ;;  %v5070_v13 = vld [vmem:[%s5219_s4 + $0x40] sm:$0x1e]   ;;  %v4324_v14 = vld [vmem:[%s5224_s7 + $0x18] sm:$0xf] }
  0x92   : > { %4715 = vmatpush3.bf16.msra.mxu0 %v1517_v10  ;;  %4721 = vmatpush3.bf16.msra.mxu1 %v1517_v10  ;;  %v2773_v17 = vsel %vm305_vm1, %v4324_v14, 0 }
  0x93   : > { %4716 = vmatprep.mubr.msk.bf16.mxu0 %vm5144_vm2, %v5143_v2  ;;  %4722 = vmatprep.mubr.msk.bf16.mxu1 %vm5144_vm2, %v5143_v2 }
  0x94   : > { %4726 = vmatprep.subr.bf16.mxu0 %v5143_v2  ;;  %4732 = vmatprep.subr.bf16.mxu1 %v5143_v2 }
  0x99   : > { %4717 = vmatmul.mubr.msk.bf16.vlgmr.msra.gmra.mrb[56].mxu0 %vm301_vm3, %v4237_v15  ;;  %4723 = vmatmul.mubr.msk.bf16.vlgmr.msra.gmra.mrb[56].mxu1 %vm301_vm3, %v4238_v16  ;;  %v2657_v15 = vrot.slane %v5069_v12, 1  ;;  %v2706_v16 = vrot.slane %v5070_v13, 1 }
  0x9a   : > { %4727 = vmatpush3.bf16.msra.mxu0 %v1517_v10  ;;  %4733 = vmatpush3.bf16.msra.mxu1 %v1517_v10  ;;  %v2559_v10 = vrot.slane %v5067_v8, 1 }
  0x9b   : > { %4728 = vmatprep.mubr.msk.bf16.mxu0 %vm5144_vm2, %v5143_v2  ;;  %4734 = vmatprep.mubr.msk.bf16.mxu1 %vm5144_vm2, %v5143_v2 }
  0x9c   : > { %4738 = vmatprep.subr.bf16.mxu0 %v5143_v2  ;;  %4744 = vmatprep.subr.bf16.mxu1 %v5143_v2 }
  0xa1   : > { %4729 = vmatmul.mubr.msk.bf16.vlgmr.msra.gmra.mrb[60].mxu0 %vm301_vm3, %v4239_v21  ;;  %4735 = vmatmul.mubr.msk.bf16.vlgmr.msra.gmra.mrb[60].mxu1 %vm301_vm3, %v4240_v23  ;;  %v4319_v21 = vld [vmem:[%s5219_s4 + $0x28] sm:$0xf]  ;;  %v4321_v23 = vld [vmem:[%s5219_s4 + $0x38] sm:$0xf] }
  0xa2   : > { %4739 = vmatpush3.bf16.msra.mxu0 %v1902_v24  ;;  %4745 = vmatpush3.bf16.msra.mxu1 %v1902_v24 }
  0xa3   : > { %4740 = vmatprep.mubr.msk.bf16.mxu0 %vm5144_vm2, %v5143_v2  ;;  %4746 = vmatprep.mubr.msk.bf16.mxu1 %vm5144_vm2, %v5143_v2 }
  0xa4   : > { %4750 = vmatprep.subr.bf16.mxu0 %v5143_v2  ;;  %4756 = vmatprep.subr.bf16.mxu1 %v5143_v2 }
  0xa9   : > { %4741 = vmatmul.mubr.msk.bf16.vlgmr.msra.gmra.mrb[64].mxu0 %vm301_vm3, %v1897_v31  ;;  %4747 = vmatmul.mubr.msk.bf16.vlgmr.msra.gmra.mrb[64].mxu1 %vm301_vm3, %v1955_v33  ;;  %v4322_v33 = vld [vmem:[%s5219_s4 + $0x40] sm:$0xf] }
  0xaa   : > { %4751 = vmatpush3.bf16.msra.mxu0 %v1902_v24  ;;  %4757 = vmatpush3.bf16.msra.mxu1 %v1902_v24 }
  0xab   : > { %4752 = vmatprep.mubr.msk.bf16.mxu0 %vm5144_vm2, %v5143_v2  ;;  %4758 = vmatprep.mubr.msk.bf16.mxu1 %vm5144_vm2, %v5143_v2 }
  0xac   : > { %4762 = vmatprep.subr.bf16.mxu0 %v5143_v2  ;;  %4768 = vmatprep.subr.bf16.mxu1 %v5143_v2 }
  0xb1   : > { %4753 = vmatmul.mubr.msk.bf16.vlgmr.msra.gmra.mrb[68].mxu0 %vm301_vm3, %v2010_v41  ;;  %4759 = vmatmul.mubr.msk.bf16.vlgmr.msra.gmra.mrb[68].mxu1 %vm301_vm3, %v2065_v43  ;;  %v3206_v43 = vshrl.u32 %v5072_v25, 16 }
  0xb2   : > { %4763 = vmatpush3.bf16.msra.mxu0 %v1902_v24  ;;  %4769 = vmatpush3.bf16.msra.mxu1 %v1902_v24 }
  0xb3   : > { %4764 = vmatprep.mubr.msk.bf16.mxu0 %vm5144_vm2, %v5143_v2  ;;  %4770 = vmatprep.mubr.msk.bf16.mxu1 %vm5144_vm2, %v5143_v2 }
  0xb4   : > { %4774 = vmatprep.subr.bf16.mxu0 %v5143_v2  ;;  %4780 = vmatprep.subr.bf16.mxu1 %v5143_v2 }
  0xb9   : > { %4765 = vmatmul.mubr.msk.bf16.vlgmr.msra.gmra.mrb[72].mxu0 %vm301_vm3, %v2120_v51  ;;  %4771 = vmatmul.mubr.msk.bf16.vlgmr.msra.gmra.mrb[72].mxu1 %vm301_vm3, %v2175_v53  ;;  %v3211_v53 = vor.u32 %v3210_v44, %v3206_v43 }
  0xba   : > { %4775 = vmatpush3.bf16.msra.mxu0 %v1902_v24  ;;  %4781 = vmatpush3.bf16.msra.mxu1 %v1902_v24  ;;  %v5071_v24 = vld [vmem:[%s5219_s4 + $0x10] sm:$0x1f]  }
  0xbb   : > { %4776 = vmatprep.mubr.msk.bf16.mxu0 %vm5144_vm2, %v5143_v2  ;;  %4782 = vmatprep.mubr.msk.bf16.mxu1 %vm5144_vm2, %v5143_v2  ;;  %v3150_v30 = vshll.u32 %v5071_v24, 16  ;;  %v3148_v40 = vshrl.u32 %v5071_v24, 16 }
  0xbc   : > { %4786 = vmatprep.subr.bf16.mxu0 %v5143_v2  ;;  %4792 = vmatprep.subr.bf16.mxu1 %v5143_v2 }
  0xbd   : > { %v3152_v41 = vrot.slane %v3150_v30, 1 }
  0xbf   : > { %v3153_v49 = vor.u32 %v3152_v41, %v3148_v40 }
  0xc1   : > { %4777 = vmatmul.mubr.msk.bf16.vlgmr.msra.gmra.mrb[76].mxu0 %vm301_vm3, %v2230_v60  ;;  %4783 = vmatmul.mubr.msk.bf16.vlgmr.msra.gmra.mrb[76].mxu1 %vm301_vm3, %v2285_v61  ;;  %v5075_v60 = vld [vmem:[%s5219_s4 + $0x30] sm:$0x1f]   ;;  %v3316_v61 = vshrl.u32 %v5074_v45, 16 }
  0xc2   : > { %4787 = vmatpush3.bf16.msra.mxu0 %v2365_v62  ;;  %4793 = vmatpush3.bf16.msra.mxu1 %v2365_v62  ;;  %v3373_v5 = vshll.u32 %v5075_v60, 16  ;;  %v3371_v13 = vshrl.u32 %v5075_v60, 16 }
  0xc3   : > { %4788 = vmatprep.mubr.msk.bf16.mxu0 %vm5144_vm2, %v5143_v2  ;;  %4794 = vmatprep.mubr.msk.bf16.mxu1 %vm5144_vm2, %v5143_v2 }
  0xc4   : > { %4798 = vmatprep.subr.bf16.mxu0 %v5143_v2  ;;  %4804 = vmatprep.subr.bf16.mxu1 %v5143_v2  ;;  %v3375_v14 = vrot.slane %v3373_v5, 1 }
  0xc9   : > { %4789 = vmatmul.mubr.msk.bf16.vlgmr.msra.gmra.mrb[80].mxu0 %vm301_vm3, %v2360_v1  ;;  %4795 = vmatmul.mubr.msk.bf16.vlgmr.msra.gmra.mrb[80].mxu1 %vm301_vm3, %v2412_v3 }
  0xca   : > { %4799 = vmatpush3.bf16.msra.mxu0 %v2365_v62  ;;  %4805 = vmatpush3.bf16.msra.mxu1 %v2365_v62 }
  0xcb   : > { %4800 = vmatprep.mubr.msk.bf16.mxu0 %vm5144_vm2, %v5143_v2  ;;  %4806 = vmatprep.mubr.msk.bf16.mxu1 %vm5144_vm2, %v5143_v2 }
  0xcc   : > { %4810 = vmatprep.subr.bf16.mxu0 %v5143_v2  ;;  %4816 = vmatprep.subr.bf16.mxu1 %v5143_v2 }
  0xd1   : > { %4801 = vmatmul.mubr.msk.bf16.vlgmr.msra.gmra.mrb[84].mxu0 %vm301_vm3, %v2461_v6  ;;  %4807 = vmatmul.mubr.msk.bf16.vlgmr.msra.gmra.mrb[84].mxu1 %vm301_vm3, %v2510_v7 }
  0xd2   : > { %4811 = vmatpush3.bf16.msra.mxu0 %v2365_v62  ;;  %4817 = vmatpush3.bf16.msra.mxu1 %v2365_v62 }
  0xd3   : > { %4812 = vmatprep.mubr.msk.bf16.mxu0 %vm5144_vm2, %v5143_v2  ;;  %4818 = vmatprep.mubr.msk.bf16.mxu1 %vm5144_vm2, %v5143_v2 }
  0xd4   : > { %4822 = vmatprep.subr.bf16.mxu0 %v5143_v2  ;;  %4828 = vmatprep.subr.bf16.mxu1 %v5143_v2 }
  0xd9   : > { %4813 = vmatmul.mubr.msk.bf16.vlgmr.msra.gmra.mrb[88].mxu0 %vm301_vm3, %v2559_v10  ;;  %4819 = vmatmul.mubr.msk.bf16.vlgmr.msra.gmra.mrb[88].mxu1 %vm301_vm3, %v2608_v11 }
  0xda   : > { %4823 = vmatpush3.bf16.msra.mxu0 %v2365_v62  ;;  %4829 = vmatpush3.bf16.msra.mxu1 %v2365_v62  ;;  %v3320_v62 = vrot.slane %v3318_v54, 1 }
  0xdb   : > { %4824 = vmatprep.mubr.msk.bf16.mxu0 %vm5144_vm2, %v5143_v2  ;;  %4830 = vmatprep.mubr.msk.bf16.mxu1 %vm5144_vm2, %v5143_v2 }
  0xdc   : > { %4834 = vmatprep.subr.bf16.mxu0 %v5143_v2  ;;  %4840 = vmatprep.subr.bf16.mxu1 %v5143_v2  ;;  %v3321_v8 = vor.u32 %v3320_v62, %v3316_v61 }
  0xe1   : > { %4825 = vmatmul.mubr.msk.bf16.vlgmr.msra.gmra.mrb[92].mxu0 %vm301_vm3, %v2657_v15  ;;  %4831 = vmatmul.mubr.msk.bf16.vlgmr.msra.gmra.mrb[92].mxu1 %vm301_vm3, %v2706_v16  ;;  %v5077_v15 = vld [vmem:[%s5219_s4 + $0x40] sm:$0x1f]   ;;  %v3426_v16 = vshrl.u32 %v5076_v63, 16 }
  0xe2   : > { %4835 = vmatpush3.bf16.msra.mxu0 %v2773_v17  ;;  %4841 = vmatpush3.bf16.msra.mxu1 %v2773_v17 }
  0xe3   : > { %4836 = vmatprep.mubr.msk.bf16.mxu0 %vm5144_vm2, %v5143_v2  ;;  %4842 = vmatprep.mubr.msk.bf16.mxu1 %vm5144_vm2, %v5143_v2 }
  0xe4   : > { %4846 = vmatprep.subr.bf16.mxu0 %v5143_v2  ;;  %4852 = vmatprep.subr.bf16.mxu1 %v5143_v2 }
  0xe9   : > { %4837 = vmatmul.mubr.msk.bf16.vlgmr.msra.gmra.mrb[96].mxu0 %vm301_vm3, %v4316_v18  ;;  %4843 = vmatmul.mubr.msk.bf16.vlgmr.msra.gmra.mrb[96].mxu1 %vm301_vm3, %v4317_v19  ;;  %v5078_v18 = vld [vmem:[%s5219_s4 + $0x48] sm:$0x1f]  }
  0xea   : > { %4847 = vmatpush3.bf16.msra.mxu0 %v2773_v17  ;;  %4853 = vmatpush3.bf16.msra.mxu1 %v2773_v17 }
  0xeb   : > { %4848 = vmatprep.mubr.msk.bf16.mxu0 %vm5144_vm2, %v5143_v2  ;;  %4854 = vmatprep.mubr.msk.bf16.mxu1 %vm5144_vm2, %v5143_v2 }
  0xec   : > { %4858 = vmatprep.subr.bf16.mxu0 %v5143_v2  ;;  %4864 = vmatprep.subr.bf16.mxu1 %v5143_v2 }
  0xf1   : > { %4849 = vmatmul.mubr.msk.bf16.vlgmr.msra.gmra.mrb[100].mxu0 %vm301_vm3, %v4318_v20  ;;  %4855 = vmatmul.mubr.msk.bf16.vlgmr.msra.gmra.mrb[100].mxu1 %vm301_vm3, %v4319_v21 }
  0xf2   : > { %4859 = vmatpush3.bf16.msra.mxu0 %v2773_v17  ;;  %4865 = vmatpush3.bf16.msra.mxu1 %v2773_v17 }
  0xf3   : > { %4860 = vmatprep.mubr.msk.bf16.mxu0 %vm5144_vm2, %v5143_v2  ;;  %4866 = vmatprep.mubr.msk.bf16.mxu1 %vm5144_vm2, %v5143_v2 }
  0xf4   : > { %4870 = vmatprep.subr.bf16.mxu0 %v5143_v2  ;;  %4876 = vmatprep.subr.bf16.mxu1 %v5143_v2 }
  0xf9   : > { %4861 = vmatmul.mubr.msk.bf16.vlgmr.msra.gmra.mrb[104].mxu0 %vm301_vm3, %v4320_v22  ;;  %4867 = vmatmul.mubr.msk.bf16.vlgmr.msra.gmra.mrb[104].mxu1 %vm301_vm3, %v4321_v23  ;;  %v3376_v22 = vor.u32 %v3375_v14, %v3371_v13  ;;  %v3483_v23 = vshll.u32 %v5077_v15, 16 }
  0xfa   : > { %4871 = vmatpush3.bf16.msra.mxu0 %v2773_v17  ;;  %4877 = vmatpush3.bf16.msra.mxu1 %v2773_v17  ;;  %v3430_v17 = vrot.slane %v3428_v9, 1 }
  0xfb   : > { %4872 = vmatprep.mubr.msk.bf16.mxu0 %vm5144_vm2, %v5143_v2  ;;  %4878 = vmatprep.mubr.msk.bf16.mxu1 %vm5144_vm2, %v5143_v2  ;;  %v3485_v34 = vrot.slane %v3483_v23, 1 }
  0xfc   : > { %v5536_v26 = vpop.f32.mrb[0].mxu0  ;;  %4882 = vmatprep.subr.bf16.mxu0 %v5143_v2  ;;  %v5542_v28 = vpop.f32.mrb[0].mxu1  ;;  %4888 = vmatprep.subr.bf16.mxu1 %v5143_v2  ;;  %v3431_v27 = vor.u32 %v3430_v17, %v3426_v16  ;;  %v5083_v16 = vld [vmem:[%s5219_s4 + $0x30] sm:$0x1e]  }
  0xfd   : > { %v4550_v29 = vpop.f32.mrb[1].mxu0  ;;  %v4556_v31 = vpop.f32.mrb[1].mxu1 }
  0xfe   : > { %v346_v32 = vpop.f32.mrb[2].mxu0  ;;  %v401_v35 = vpop.f32.mrb[2].mxu1  ;;  %v3538_v29 = vshll.u32 %v5078_v18, 16 }
  0xff   : > { %v4551_v36 = vpop.f32.mrb[3].mxu0  ;;  %v4557_v39 = vpop.f32.mrb[3].mxu1  ;;  %v3536_v35 = vshrl.u32 %v5078_v18, 16 }
 0x100   : > { %v3540_v36 = vrot.slane %v3538_v29, 1  ;;  %v4382_v39 = vld [vmem:[%s5224_s7 + $0x20] sm:$0xf] }
 0x101   : > { %4873 = vmatmul.mubr.msk.bf16.vlgmr.msra.gmra.mrb[108].mxu0 %vm301_vm3, %v4322_v33  ;;  %4879 = vmatmul.mubr.msk.bf16.vlgmr.msra.gmra.mrb[108].mxu1 %vm301_vm3, %v4323_v37  ;;  %v3481_v33 = vshrl.u32 %v5077_v15, 16 }
 0x102   : > { %4883 = vmatpush3.bf16.msra.mxu0 %v5548_v38  ;;  %4889 = vmatpush3.bf16.msra.mxu1 %v5548_v38 }
 0x103   : > { %4884 = vmatprep.mubr.msk.bf16.mxu0 %vm5144_vm2, %v5143_v2  ;;  %4890 = vmatprep.mubr.msk.bf16.mxu1 %vm5144_vm2, %v5143_v2 }
 0x104   : > { %v5558_v46 = vpop.f32.mrb[4].mxu0  ;;  %4894 = vmatprep.subr.bf16.mxu0 %v5143_v2  ;;  %v5563_v47 = vpop.f32.mrb[4].mxu1  ;;  %4900 = vmatprep.subr.bf16.mxu1 %v5143_v2 }
 0x105   : > { %v4562_v48 = vpop.f32.mrb[5].mxu0  ;;  %v4568_v51 = vpop.f32.mrb[5].mxu1 }
 0x106   : > { %v456_v52 = vpop.f32.mrb[6].mxu0  ;;  %v511_v55 = vpop.f32.mrb[6].mxu1  ;;  %v3541_v48 = vor.u32 %v3540_v36, %v3536_v35  ;;  %v5616_v51 = vsel %vm305_vm1, %v4382_v39, 0 }
 0x107   : > { %v4563_v56 = vpop.f32.mrb[7].mxu0  ;;  %v4569_v57 = vpop.f32.mrb[7].mxu1 }
 0x109   : > { %4885 = vmatmul.mubr.msk.bf16.vlgmr.msra.gmra.mrb[112].mxu0 %vm301_vm3, %v3153_v49  ;;  %4891 = vmatmul.mubr.msk.bf16.vlgmr.msra.gmra.mrb[112].mxu1 %vm301_vm3, %v3211_v53  ;;  %v5080_v53 = vld [vmem:[%s5219_s4 + $0x18] sm:$0x1e]  }
 0x10a   : > { %4895 = vmatpush3.bf16.msra.mxu0 %v5548_v38  ;;  %4901 = vmatpush3.bf16.msra.mxu1 %v5548_v38  ;;  %v3668_v61 = vrot.slane %v5080_v53, 1 }
 0x10b   : > { %4896 = vmatprep.mubr.msk.bf16.mxu0 %vm5144_vm2, %v5143_v2  ;;  %4902 = vmatprep.mubr.msk.bf16.mxu1 %vm5144_vm2, %v5143_v2 }
 0x10c   : > { %v5574_v0 = vpop.f32.mrb[8].mxu0  ;;  %4906 = vmatprep.subr.bf16.mxu0 %v5143_v2  ;;  %v5579_v1 = vpop.f32.mrb[8].mxu1  ;;  %4912 = vmatprep.subr.bf16.mxu1 %v5143_v2 }
 0x10d   : > { %v4574_v3 = vpop.f32.mrb[9].mxu0  ;;  %v4580_v6 = vpop.f32.mrb[9].mxu1 }
 0x10e   : > { %v566_v7 = vpop.f32.mrb[10].mxu0  ;;  %v621_v10 = vpop.f32.mrb[10].mxu1 }
 0x10f   : > { %v4575_v11 = vpop.f32.mrb[11].mxu0  ;;  %v4581_v12 = vpop.f32.mrb[11].mxu1 }
 0x111   : > { %4897 = vmatmul.mubr.msk.bf16.vlgmr.msra.gmra.mrb[116].mxu0 %vm301_vm3, %v3266_v4  ;;  %4903 = vmatmul.mubr.msk.bf16.vlgmr.msra.gmra.mrb[116].mxu1 %vm301_vm3, %v3321_v8  ;;  %v5081_v4 = vld [vmem:[%s5219_s4 + $0x20] sm:$0x1e]  }
 0x112   : > { %4907 = vmatpush3.bf16.msra.mxu0 %v5548_v38  ;;  %4913 = vmatpush3.bf16.msra.mxu1 %v5548_v38  ;;  %v3717_v8 = vrot.slane %v5081_v4, 1 }
 0x113   : > { %4908 = vmatprep.mubr.msk.bf16.mxu0 %vm5144_vm2, %v5143_v2  ;;  %4914 = vmatprep.mubr.msk.bf16.mxu1 %vm5144_vm2, %v5143_v2 }
 0x114   : > { %v5590_v19 = vpop.f32.mrb[12].mxu0  ;;  %4918 = vmatprep.subr.bf16.mxu0 %v5143_v2  ;;  %v5595_v20 = vpop.f32.mrb[12].mxu1  ;;  %4924 = vmatprep.subr.bf16.mxu1 %v5143_v2 }
 0x115   : > { %v4586_v21 = vpop.f32.mrb[13].mxu0  ;;  %v4592_v24 = vpop.f32.mrb[13].mxu1 }
 0x116   : > { %v676_v25 = vpop.f32.mrb[14].mxu0  ;;  %v731_v30 = vpop.f32.mrb[14].mxu1 }
 0x117   : > { %v4587_v31 = vpop.f32.mrb[15].mxu0  ;;  %v4593_v32 = vpop.f32.mrb[15].mxu1 }
 0x118   : > { %v5085_v32 = vld [vmem:[%s5219_s4 + $0x40] sm:$0x1e]  }
 0x119   : > { %4909 = vmatmul.mubr.msk.bf16.vlgmr.msra.gmra.mrb[120].mxu0 %vm301_vm3, %v3376_v22  ;;  %4915 = vmatmul.mubr.msk.bf16.vlgmr.msra.gmra.mrb[120].mxu1 %vm301_vm3, %v3431_v27  ;;  %v3815_v22 = vrot.slane %v5083_v16, 1  ;;  %v3913_v36 = vrot.slane %v5085_v32, 1 }
 0x11a   : > { %4919 = vmatpush3.bf16.msra.mxu0 %v5548_v38  ;;  %4925 = vmatpush3.bf16.msra.mxu1 %v5548_v38  ;;  %v3486_v38 = vor.u32 %v3485_v34, %v3481_v33 }
 0x11b   : > { %4920 = vmatprep.mubr.msk.bf16.mxu0 %vm5144_vm2, %v5143_v2  ;;  %4926 = vmatprep.mubr.msk.bf16.mxu1 %vm5144_vm2, %v5143_v2 }
 0x11c   : > { %v774_v37 = vpop.f32.mrb[16].mxu0  ;;  %4930 = vmatprep.subr.bf16.mxu0 %v5143_v2  ;;  %v817_v41 = vpop.f32.mrb[16].mxu1  ;;  %4936 = vmatprep.subr.bf16.mxu1 %v5143_v2 }
 0x11d   : > { %v5609_v40 = vadd.f32 %v774_v37, %v5536_v26  ;;  %v4598_v42 = vpop.f32.mrb[17].mxu0  ;;  %v5613_v43 = vadd.f32 %v817_v41, %v5542_v28  ;;  %v4604_v44 = vpop.f32.mrb[17].mxu1  ;;  %v5079_v26 = vld [vmem:[%s5219_s4 + $0x10] sm:$0x1e]  }
 0x11e   : > { %v777_v45 = vpop.f32.mrb[18].mxu0  ;;  %v820_v49 = vpop.f32.mrb[18].mxu1  ;;  %v3616_v57 = vrot.slane %v5079_v26, 1 }
 0x11f   : > { %v4599_v50 = vpop.f32.mrb[19].mxu0  ;;  %v4605_v52 = vpop.f32.mrb[19].mxu1 }
 0x121   : > { %4921 = vmatmul.mubr.msk.bf16.vlgmr.msra.gmra.mrb[124].mxu0 %vm301_vm3, %v3486_v38  ;;  %4927 = vmatmul.mubr.msk.bf16.vlgmr.msra.gmra.mrb[124].mxu1 %vm301_vm3, %v3541_v48 }
 0x122   : > { %4931 = vmatpush3.bf16.msra.mxu0 %v5616_v51  ;;  %4937 = vmatpush3.bf16.msra.mxu1 %v5616_v51 }
 0x123   : > { %4932 = vmatprep.mubr.msk.bf16.mxu0 %vm5144_vm2, %v5143_v2  ;;  %4938 = vmatprep.mubr.msk.bf16.mxu1 %vm5144_vm2, %v5143_v2 }
 0x124   : > { %v860_v28 = vpop.f32.mrb[20].mxu0  ;;  %4942 = vmatprep.subr.bf16.mxu0 %v5143_v2  ;;  %v903_v55 = vpop.f32.mrb[20].mxu1  ;;  %4948 = vmatprep.subr.bf16.mxu1 %v5143_v2 }
 0x125   : > { %v5630_v54 = vadd.f32 %v860_v28, %v5558_v46  ;;  %v4610_v56 = vpop.f32.mrb[21].mxu0  ;;  %v5634_v58 = vadd.f32 %v903_v55, %v5563_v47  ;;  %v4616_v59 = vpop.f32.mrb[21].mxu1  ;;  %v5082_v46 = vld [vmem:[%s5219_s4 + $0x28] sm:$0x1e]  }
 0x126   : > { %v863_v60 = vpop.f32.mrb[22].mxu0  ;;  %v906_v62 = vpop.f32.mrb[22].mxu1  ;;  %v3766_v12 = vrot.slane %v5082_v46, 1 }
 0x127   : > { %v4611_v63 = vpop.f32.mrb[23].mxu0  ;;  %v4617_v3 = vpop.f32.mrb[23].mxu1 }
 0x129   : > { %4933 = vmatmul.mubr.msk.bf16.vlgmr.msra.gmra.mrb[128].mxu0 %vm301_vm3, %v3616_v57  ;;  %4939 = vmatmul.mubr.msk.bf16.vlgmr.msra.gmra.mrb[128].mxu1 %vm301_vm3, %v3668_v61 }
 0x12a   : > { %4943 = vmatpush3.bf16.msra.mxu0 %v5616_v51  ;;  %4949 = vmatpush3.bf16.msra.mxu1 %v5616_v51 }
 0x12b   : > { %4944 = vmatprep.mubr.msk.bf16.mxu0 %vm5144_vm2, %v5143_v2  ;;  %4950 = vmatprep.mubr.msk.bf16.mxu1 %vm5144_vm2, %v5143_v2 }
 0x12c   : > { %v946_v47 = vpop.f32.mrb[24].mxu0  ;;  %4954 = vmatprep.subr.bf16.mxu0 %v5143_v2  ;;  %v989_v6 = vpop.f32.mrb[24].mxu1  ;;  %4960 = vmatprep.subr.bf16.mxu1 %v5143_v2 }
 0x12d   : > { %v5648_v5 = vadd.f32 %v946_v47, %v5574_v0  ;;  %v4622_v7 = vpop.f32.mrb[25].mxu0  ;;  %v5652_v9 = vadd.f32 %v989_v6, %v5579_v1  ;;  %v4628_v10 = vpop.f32.mrb[25].mxu1  ;;  %v5084_v0 = vld [vmem:[%s5219_s4 + $0x38] sm:$0x1e]  }
 0x12e   : > { %v949_v11 = vpop.f32.mrb[26].mxu0  ;;  %v992_v13 = vpop.f32.mrb[26].mxu1  ;;  %v3864_v27 = vrot.slane %v5084_v0, 1 }
 0x12f   : > { %v4623_v14 = vpop.f32.mrb[27].mxu0  ;;  %v4629_v15 = vpop.f32.mrb[27].mxu1 }
 0x131   : > { %4945 = vmatmul.mubr.msk.bf16.vlgmr.msra.gmra.mrb[132].mxu0 %vm301_vm3, %v3717_v8  ;;  %4951 = vmatmul.mubr.msk.bf16.vlgmr.msra.gmra.mrb[132].mxu1 %vm301_vm3, %v3766_v12 }
 0x132   : > { %4955 = vmatpush3.bf16.msra.mxu0 %v5616_v51  ;;  %4961 = vmatpush3.bf16.msra.mxu1 %v5616_v51 }
 0x133   : > { %4956 = vmatprep.mubr.msk.bf16.mxu0 %vm5144_vm2, %v5143_v2  ;;  %4962 = vmatprep.mubr.msk.bf16.mxu1 %vm5144_vm2, %v5143_v2 }
 0x134   : > { %v1032_v1 = vpop.f32.mrb[28].mxu0  ;;  %4966 = vmatprep.subr.bf16.mxu0 %v5143_v2  ;;  %v1075_v18 = vpop.f32.mrb[28].mxu1  ;;  %4972 = vmatprep.subr.bf16.mxu1 %v5143_v2 }
 0x135   : > { %v1033_v17 = vadd.f32 %v1032_v1, %v5590_v19  ;;  %v4634_v21 = vpop.f32.mrb[29].mxu0  ;;  %v1076_v23 = vadd.f32 %v1075_v18, %v5595_v20  ;;  %v4640_v24 = vpop.f32.mrb[29].mxu1  ;;  %v5086_v19 = vld [vmem:[%s5219_s4 + $0x48] sm:$0x1e]  }
 0x136   : > { %v1035_v25 = vpop.f32.mrb[30].mxu0  ;;  %v1078_v29 = vpop.f32.mrb[30].mxu1  ;;  %v3962_v42 = vrot.slane %v5086_v19, 1 }
 0x137   : > { %v4635_v30 = vpop.f32.mrb[31].mxu0  ;;  %v4641_v31 = vpop.f32.mrb[31].mxu1 }
 0x139   : > { %4957 = vmatmul.mubr.msk.bf16.vlgmr.msra.gmra.mrb[136].mxu0 %vm301_vm3, %v3815_v22  ;;  %4963 = vmatmul.mubr.msk.bf16.vlgmr.msra.gmra.mrb[136].mxu1 %vm301_vm3, %v3864_v27 }
 0x13a   : > { %4967 = vmatpush3.bf16.msra.mxu0 %v5616_v51  ;;  %4973 = vmatpush3.bf16.msra.mxu1 %v5616_v51 }
 0x13b   : > { %4968 = vmatprep.mubr.msk.bf16.mxu0 %vm5144_vm2, %v5143_v2  ;;  %4974 = vmatprep.mubr.msk.bf16.mxu1 %vm5144_vm2, %v5143_v2 }
 0x13c   : > { %v1145_v20 = vpop.f32.mrb[32].mxu0  ;;  %v1194_v34 = vpop.f32.mrb[32].mxu1 }
 0x13d   : > { %v1494_v33 = vadd.f32 %v1145_v20, %v5609_v40  ;;  %v4646_v35 = vpop.f32.mrb[33].mxu0  ;;  %v1495_v37 = vadd.f32 %v1194_v34, %v5613_v43  ;;  %v4652_v39 = vpop.f32.mrb[33].mxu1 }
 0x13e   : > { %v1148_v41 = vpop.f32.mrb[34].mxu0  ;;  %v1197_v38 = vpop.f32.mrb[34].mxu1 }
 0x13f   : > { %v4647_v44 = vpop.f32.mrb[35].mxu0  ;;  %v4653_v45 = vpop.f32.mrb[35].mxu1 }
 0x141   : > { %4969 = vmatmul.mubr.msk.bf16.vlgmr.msra.gmra.mrb[140].mxu0 %vm301_vm3, %v3913_v36  ;;  %4975 = vmatmul.mubr.msk.bf16.vlgmr.msra.gmra.mrb[140].mxu1 %vm301_vm3, %v3962_v42 }
 0x144   : > { %v1243_v48 = vpop.f32.mrb[36].mxu0  ;;  %v1292_v49 = vpop.f32.mrb[36].mxu1 }
 0x145   : > { %v1496_v2 = vadd.f32 %v1243_v48, %v5630_v54  ;;  %v4658_v40 = vpop.f32.mrb[37].mxu0  ;;  %v1497_v50 = vadd.f32 %v1292_v49, %v5634_v58  ;;  %v4664_v51 = vpop.f32.mrb[37].mxu1 }
 0x146   : > { %v1246_v52 = vpop.f32.mrb[38].mxu0  ;;  %v1295_v43 = vpop.f32.mrb[38].mxu1 }
 0x147   : > { %v4659_v26 = vpop.f32.mrb[39].mxu0  ;;  %v4665_v53 = vpop.f32.mrb[39].mxu1 }
 0x14c   : > { %v1341_v28 = vpop.f32.mrb[40].mxu0  ;;  %v1390_v56 = vpop.f32.mrb[40].mxu1 }
 0x14d   : > { %v1498_v55 = vadd.f32 %v1341_v28, %v5648_v5  ;;  %v4670_v57 = vpop.f32.mrb[41].mxu0  ;;  %v1499_v59 = vadd.f32 %v1390_v56, %v5652_v9  ;;  %v4676_v60 = vpop.f32.mrb[41].mxu1 }
 0x14e   : > { %v1344_v61 = vpop.f32.mrb[42].mxu0  ;;  %v1393_v62 = vpop.f32.mrb[42].mxu1 }
 0x14f   : > { %v4671_v54 = vpop.f32.mrb[43].mxu0  ;;  %v4677_v63 = vpop.f32.mrb[43].mxu1 }
 0x154   : > { %v1439_v3 = vpop.f32.mrb[44].mxu0  ;;  %v1488_v58 = vpop.f32.mrb[44].mxu1 }
 0x155   : > { %v1500_v4 = vadd.f32 %v1439_v3, %v1033_v17  ;;  %v4682_v46 = vpop.f32.mrb[45].mxu0  ;;  %v1501_v47 = vadd.f32 %v1488_v58, %v1076_v23  ;;  %v4688_v6 = vpop.f32.mrb[45].mxu1 }
 0x156   : > { %v1442_v7 = vpop.f32.mrb[46].mxu0  ;;  %v1491_v8 = vpop.f32.mrb[46].mxu1 }
 0x157   : > { %v4683_v10 = vpop.f32.mrb[47].mxu0  ;;  %v4689_v11 = vpop.f32.mrb[47].mxu1 }
 0x15c   : > { %v1553_v5 = vpop.f32.mrb[48].mxu0  ;;  %v1596_v13 = vpop.f32.mrb[48].mxu1 }
 0x15d   : > { %v1860_v12 = vadd.f32 %v1553_v5, %v1494_v33  ;;  %v4694_v14 = vpop.f32.mrb[49].mxu0  ;;  %v1861_v9 = vadd.f32 %v1596_v13, %v1495_v37  ;;  %v4700_v15 = vpop.f32.mrb[49].mxu1 }
 0x15e   : > { %v1556_v16 = vpop.f32.mrb[50].mxu0  ;;  %v1599_v0 = vpop.f32.mrb[50].mxu1 }
 0x15f   : > { %v4695_v1 = vpop.f32.mrb[51].mxu0  ;;  %v4701_v18 = vpop.f32.mrb[51].mxu1 }
 0x164   : > { %v1639_v21 = vpop.f32.mrb[52].mxu0  ;;  %v1682_v22 = vpop.f32.mrb[52].mxu1 }
 0x165   : > { %v1862_v17 = vadd.f32 %v1639_v21, %v1496_v2  ;;  %v4706_v24 = vpop.f32.mrb[53].mxu0  ;;  %v1863_v23 = vadd.f32 %v1682_v22, %v1497_v50  ;;  %v4712_v25 = vpop.f32.mrb[53].mxu1 }
 0x166   : > { %v1642_v27 = vpop.f32.mrb[54].mxu0  ;;  %v1685_v29 = vpop.f32.mrb[54].mxu1 }
 0x167   : > { %v4707_v30 = vpop.f32.mrb[55].mxu0  ;;  %v4713_v31 = vpop.f32.mrb[55].mxu1 }
 0x16c   : > { %v1725_v32 = vpop.f32.mrb[56].mxu0  ;;  %v1768_v20 = vpop.f32.mrb[56].mxu1 }
 0x16d   : > { %v1864_v19 = vadd.f32 %v1725_v32, %v1498_v55  ;;  %v4718_v33 = vpop.f32.mrb[57].mxu0  ;;  %v1865_v34 = vadd.f32 %v1768_v20, %v1499_v59  ;;  %v4724_v35 = vpop.f32.mrb[57].mxu1 }
 0x16e   : > { %v1728_v36 = vpop.f32.mrb[58].mxu0  ;;  %v1771_v37 = vpop.f32.mrb[58].mxu1 }
 0x16f   : > { %v4719_v39 = vpop.f32.mrb[59].mxu0  ;;  %v4725_v41 = vpop.f32.mrb[59].mxu1 }
 0x174   : > { %v1811_v42 = vpop.f32.mrb[60].mxu0  ;;  %v1854_v44 = vpop.f32.mrb[60].mxu1 }
 0x175   : > { %v1866_v38 = vadd.f32 %v1811_v42, %v1500_v4  ;;  %v4730_v45 = vpop.f32.mrb[61].mxu0  ;;  %v1867_v48 = vadd.f32 %v1854_v44, %v1501_v47  ;;  %v4736_v2 = vpop.f32.mrb[61].mxu1 }
 0x176   : > { %v1814_v49 = vpop.f32.mrb[62].mxu0  ;;  %v1857_v40 = vpop.f32.mrb[62].mxu1 }
 0x177   : > { %v4731_v50 = vpop.f32.mrb[63].mxu0  ;;  %v4737_v51 = vpop.f32.mrb[63].mxu1 }
 0x17c   : > { %v1938_v52 = vpop.f32.mrb[64].mxu0  ;;  %v1993_v26 = vpop.f32.mrb[64].mxu1 }
 0x17d   : > { %v2329_v43 = vadd.f32 %v1938_v52, %v1860_v12  ;;  %v4742_v53 = vpop.f32.mrb[65].mxu0  ;;  %v2330_v28 = vadd.f32 %v1993_v26, %v1861_v9  ;;  %v4748_v55 = vpop.f32.mrb[65].mxu1 }
 0x17e   : > { %v1941_v56 = vpop.f32.mrb[66].mxu0  ;;  %v1996_v57 = vpop.f32.mrb[66].mxu1 }
 0x17f   : > { %v4743_v59 = vpop.f32.mrb[67].mxu0  ;;  %v4749_v60 = vpop.f32.mrb[67].mxu1 }
 0x184   : > { %v2048_v61 = vpop.f32.mrb[68].mxu0  ;;  %v2103_v54 = vpop.f32.mrb[68].mxu1 }
 0x185   : > { %v2331_v62 = vadd.f32 %v2048_v61, %v1862_v17  ;;  %v4754_v63 = vpop.f32.mrb[69].mxu0  ;;  %v2332_v3 = vadd.f32 %v2103_v54, %v1863_v23  ;;  %v4760_v4 = vpop.f32.mrb[69].mxu1 }
 0x186   : > { %v2051_v58 = vpop.f32.mrb[70].mxu0  ;;  %v2106_v46 = vpop.f32.mrb[70].mxu1 }
 0x187   : > { %v4755_v47 = vpop.f32.mrb[71].mxu0  ;;  %v4761_v6 = vpop.f32.mrb[71].mxu1 }
 0x18c   : > { %v2158_v7 = vpop.f32.mrb[72].mxu0  ;;  %v2213_v10 = vpop.f32.mrb[72].mxu1 }
 0x18d   : > { %v2333_v8 = vadd.f32 %v2158_v7, %v1864_v19  ;;  %v4766_v11 = vpop.f32.mrb[73].mxu0  ;;  %v2334_v5 = vadd.f32 %v2213_v10, %v1865_v34  ;;  %v4772_v12 = vpop.f32.mrb[73].mxu1 }
 0x18e   : > { %v2161_v13 = vpop.f32.mrb[74].mxu0  ;;  %v2216_v14 = vpop.f32.mrb[74].mxu1 }
 0x18f   : > { %v4767_v9 = vpop.f32.mrb[75].mxu0  ;;  %v4773_v15 = vpop.f32.mrb[75].mxu1 }
 0x194   : > { %v2268_v16 = vpop.f32.mrb[76].mxu0  ;;  %v2323_v1 = vpop.f32.mrb[76].mxu1 }
 0x195   : > { %v2335_v0 = vadd.f32 %v2268_v16, %v1866_v38  ;;  %v4778_v18 = vpop.f32.mrb[77].mxu0  ;;  %v2336_v21 = vadd.f32 %v2323_v1, %v1867_v48  ;;  %v4784_v17 = vpop.f32.mrb[77].mxu1 }
 0x196   : > { %v2271_v22 = vpop.f32.mrb[78].mxu0  ;;  %v2326_v24 = vpop.f32.mrb[78].mxu1 }
 0x197   : > { %v4779_v23 = vpop.f32.mrb[79].mxu0  ;;  %v4785_v25 = vpop.f32.mrb[79].mxu1 }
 0x19c   : > { %v2401_v27 = vpop.f32.mrb[80].mxu0  ;;  %v2450_v30 = vpop.f32.mrb[80].mxu1 }
 0x19d   : > { %v2750_v29 = vadd.f32 %v2401_v27, %v2329_v43  ;;  %v4790_v31 = vpop.f32.mrb[81].mxu0  ;;  %v2751_v32 = vadd.f32 %v2450_v30, %v2330_v28  ;;  %v4796_v19 = vpop.f32.mrb[81].mxu1 }
 0x19e   : > { %v2404_v20 = vpop.f32.mrb[82].mxu0  ;;  %v2453_v33 = vpop.f32.mrb[82].mxu1 }
 0x19f   : > { %v4791_v34 = vpop.f32.mrb[83].mxu0  ;;  %v4797_v35 = vpop.f32.mrb[83].mxu1 }
 0x1a4   : > { %v2499_v36 = vpop.f32.mrb[84].mxu0  ;;  %v2548_v39 = vpop.f32.mrb[84].mxu1 }
 0x1a5   : > { %v2752_v37 = vadd.f32 %v2499_v36, %v2331_v62  ;;  %v4802_v41 = vpop.f32.mrb[85].mxu0  ;;  %v2753_v42 = vadd.f32 %v2548_v39, %v2332_v3  ;;  %v4808_v38 = vpop.f32.mrb[85].mxu1 }
 0x1a6   : > { %v2502_v44 = vpop.f32.mrb[86].mxu0  ;;  %v2551_v45 = vpop.f32.mrb[86].mxu1 }
 0x1a7   : > { %v4803_v48 = vpop.f32.mrb[87].mxu0  ;;  %v4809_v2 = vpop.f32.mrb[87].mxu1 }
 0x1ac   : > { %v2597_v49 = vpop.f32.mrb[88].mxu0  ;;  %v2646_v50 = vpop.f32.mrb[88].mxu1 }
 0x1ad   : > { %v2754_v40 = vadd.f32 %v2597_v49, %v2333_v8  ;;  %v4814_v51 = vpop.f32.mrb[89].mxu0  ;;  %v2755_v52 = vadd.f32 %v2646_v50, %v2334_v5  ;;  %v4820_v43 = vpop.f32.mrb[89].mxu1 }
 0x1ae   : > { %v2600_v26 = vpop.f32.mrb[90].mxu0  ;;  %v2649_v53 = vpop.f32.mrb[90].mxu1 }
 0x1af   : > { %v4815_v28 = vpop.f32.mrb[91].mxu0  ;;  %v4821_v55 = vpop.f32.mrb[91].mxu1 }
 0x1b4   : > { %v2695_v56 = vpop.f32.mrb[92].mxu0  ;;  %v2744_v59 = vpop.f32.mrb[92].mxu1 }
 0x1b5   : > { %v2756_v57 = vadd.f32 %v2695_v56, %v2335_v0  ;;  %v4826_v60 = vpop.f32.mrb[93].mxu0  ;;  %v2757_v61 = vadd.f32 %v2744_v59, %v2336_v21  ;;  %v4832_v62 = vpop.f32.mrb[93].mxu1 }
 0x1b6   : > { %v2698_v54 = vpop.f32.mrb[94].mxu0  ;;  %v2747_v63 = vpop.f32.mrb[94].mxu1 }
 0x1b7   : > { %v4827_v3 = vpop.f32.mrb[95].mxu0  ;;  %v4833_v4 = vpop.f32.mrb[95].mxu1 }
 0x1bc   : > { %v2809_v58 = vpop.f32.mrb[96].mxu0  ;;  %v2852_v47 = vpop.f32.mrb[96].mxu1 }
 0x1bd   : > { %v3116_v46 = vadd.f32 %v2809_v58, %v2750_v29  ;;  %v4838_v6 = vpop.f32.mrb[97].mxu0  ;;  %v3117_v7 = vadd.f32 %v2852_v47, %v2751_v32  ;;  %v4844_v8 = vpop.f32.mrb[97].mxu1 }
 0x1be   : > { %v2812_v10 = vpop.f32.mrb[98].mxu0  ;;  %v2855_v11 = vpop.f32.mrb[98].mxu1 }
 0x1bf   : > { %v4839_v5 = vpop.f32.mrb[99].mxu0  ;;  %v4845_v12 = vpop.f32.mrb[99].mxu1 }
 0x1c4   : > { %v2895_v13 = vpop.f32.mrb[100].mxu0  ;;  %v2938_v9 = vpop.f32.mrb[100].mxu1 }
 0x1c5   : > { %v3118_v14 = vadd.f32 %v2895_v13, %v2752_v37  ;;  %v4850_v15 = vpop.f32.mrb[101].mxu0  ;;  %v3119_v16 = vadd.f32 %v2938_v9, %v2753_v42  ;;  %v4856_v0 = vpop.f32.mrb[101].mxu1 }
 0x1c6   : > { %v2898_v1 = vpop.f32.mrb[102].mxu0  ;;  %v2941_v18 = vpop.f32.mrb[102].mxu1 }
 0x1c7   : > { %v4851_v21 = vpop.f32.mrb[103].mxu0  ;;  %v4857_v17 = vpop.f32.mrb[103].mxu1  ;;  %v4014_v18 = vld [vmem:[#allocation2] sm:$0xff] }
 0x1cc   : > { %v2981_v22 = vpop.f32.mrb[104].mxu0  ;;  %v3024_v23 = vpop.f32.mrb[104].mxu1 }
 0x1cd   : > { %v3120_v24 = vadd.f32 %v2981_v22, %v2754_v40  ;;  %v4862_v25 = vpop.f32.mrb[105].mxu0  ;;  %v3121_v27 = vadd.f32 %v3024_v23, %v2755_v52  ;;  %v4868_v29 = vpop.f32.mrb[105].mxu1  ;;  %v4015_v22 = vld [vmem:[#allocation2 + $0x8] sm:$0xff] }
 0x1ce   : > { %v2984_v30 = vpop.f32.mrb[106].mxu0  ;;  %v3027_v31 = vpop.f32.mrb[106].mxu1 }
 0x1cf   : > { %v4863_v32 = vpop.f32.mrb[107].mxu0  ;;  %v4869_v19 = vpop.f32.mrb[107].mxu1 }
 0x1d4   : > { %v3067_v20 = vpop.f32.mrb[108].mxu0  ;;  %v3110_v34 = vpop.f32.mrb[108].mxu1 }
 0x1d5   : > { %v3122_v33 = vadd.f32 %v3067_v20, %v2756_v57  ;;  %v4874_v35 = vpop.f32.mrb[109].mxu0  ;;  %v3123_v36 = vadd.f32 %v3110_v34, %v2757_v61  ;;  %v4880_v37 = vpop.f32.mrb[109].mxu1 }
 0x1d6   : > { %v3070_v39 = vpop.f32.mrb[110].mxu0  ;;  %v3113_v41 = vpop.f32.mrb[110].mxu1 }
 0x1d7   : > { %v4875_v42 = vpop.f32.mrb[111].mxu0  ;;  %v4881_v38 = vpop.f32.mrb[111].mxu1 }
 0x1dc   : > { %v3194_v44 = vpop.f32.mrb[112].mxu0  ;;  %v3249_v48 = vpop.f32.mrb[112].mxu1 }
 0x1dd   : > { %v3585_v45 = vadd.f32 %v3194_v44, %v3116_v46  ;;  %v4886_v2 = vpop.f32.mrb[113].mxu0  ;;  %v3586_v49 = vadd.f32 %v3249_v48, %v3117_v7  ;;  %v4892_v40 = vpop.f32.mrb[113].mxu1 }
 0x1de   : > { %v3197_v50 = vpop.f32.mrb[114].mxu0  ;;  %v3252_v51 = vpop.f32.mrb[114].mxu1  ;;  %v4018_v40 = vld [vmem:[#allocation2 + $0x20] sm:$0xff] }
 0x1df   : > { %v4887_v52 = vpop.f32.mrb[115].mxu0  ;;  %v4893_v43 = vpop.f32.mrb[115].mxu1 }
 0x1e0   : > { %v4019_v52 = vld [vmem:[#allocation2 + $0x28] sm:$0xff] }
 0x1e4   : > { %v3304_v26 = vpop.f32.mrb[116].mxu0  ;;  %v3359_v28 = vpop.f32.mrb[116].mxu1 }
 0x1e5   : > { %v3587_v53 = vadd.f32 %v3304_v26, %v3118_v14  ;;  %v4898_v55 = vpop.f32.mrb[117].mxu0  ;;  %v3588_v56 = vadd.f32 %v3359_v28, %v3119_v16  ;;  %v4904_v57 = vpop.f32.mrb[117].mxu1 }
 0x1e6   : > { %v3307_v59 = vpop.f32.mrb[118].mxu0  ;;  %v3362_v60 = vpop.f32.mrb[118].mxu1 }
 0x1e7   : > { %v4899_v61 = vpop.f32.mrb[119].mxu0  ;;  %v4905_v62 = vpop.f32.mrb[119].mxu1 }
 0x1e8   : > { %v4020_v62 = vld [vmem:[#allocation2 + $0x30] sm:$0xff] }
 0x1ec   : > { %v3414_v54 = vpop.f32.mrb[120].mxu0  ;;  %v3469_v3 = vpop.f32.mrb[120].mxu1 }
 0x1ed   : > { %v3589_v63 = vadd.f32 %v3414_v54, %v3120_v24  ;;  %v4910_v4 = vpop.f32.mrb[121].mxu0  ;;  %v3590_v58 = vadd.f32 %v3469_v3, %v3121_v27  ;;  %v4916_v46 = vpop.f32.mrb[121].mxu1 }
 0x1ee   : > { %v3417_v47 = vpop.f32.mrb[122].mxu0  ;;  %v3472_v6 = vpop.f32.mrb[122].mxu1 }
 0x1ef   : > { %v4911_v7 = vpop.f32.mrb[123].mxu0  ;;  %v4917_v8 = vpop.f32.mrb[123].mxu1 }
 0x1f4   : > { %v3524_v10 = vpop.f32.mrb[124].mxu0  ;;  %v3579_v5 = vpop.f32.mrb[124].mxu1 }
 0x1f5   : > { %v3591_v11 = vadd.f32 %v3524_v10, %v3122_v33  ;;  %v4922_v12 = vpop.f32.mrb[125].mxu0  ;;  %v3592_v13 = vadd.f32 %v3579_v5, %v3123_v36  ;;  %v4928_v14 = vpop.f32.mrb[125].mxu1  ;;  %v4016_v33 = vld [vmem:[#allocation2 + $0x10] sm:$0xff]  ;;  %v4017_v36 = vld [vmem:[#allocation2 + $0x18] sm:$0xff] }
 0x1f6   : > { %v3527_v9 = vpop.f32.mrb[126].mxu0  ;;  %v3582_v15 = vpop.f32.mrb[126].mxu1 }
 0x1f7   : > { %v4923_v16 = vpop.f32.mrb[127].mxu0  ;;  %v4929_v0 = vpop.f32.mrb[127].mxu1 }
 0x1fc   : > { %v3657_v1 = vpop.f32.mrb[128].mxu0  ;;  %v3706_v17 = vpop.f32.mrb[128].mxu1 }
 0x1fd   : > { %v4006_v21 = vadd.f32 %v3657_v1, %v3585_v45  ;;  %v4934_v24 = vpop.f32.mrb[129].mxu0  ;;  %v4007_v23 = vadd.f32 %v3706_v17, %v3586_v49  ;;  %v4940_v25 = vpop.f32.mrb[129].mxu1 }
 0x1fe   : > { %v3660_v27 = vpop.f32.mrb[130].mxu0  ;;  %v3709_v30 = vpop.f32.mrb[130].mxu1 }
 0x1ff   : > { %v4022_v29 = vadd.f32 %v4014_v18, %v4006_v21  ;;  %v4935_v31 = vpop.f32.mrb[131].mxu0  ;;  %v4023_v32 = vadd.f32 %v4015_v22, %v4007_v23  ;;  %v4941_v19 = vpop.f32.mrb[131].mxu1 }
 0x201   : > { %4030 = vst.msk [vmem:[#allocation2] sm:$0xff] %vm301_vm3, %v4022_v29  ;;  %4031 = vst.msk [vmem:[#allocation2 + $0x8] sm:$0xff] %vm301_vm3, %v4023_v32 }
 0x204   : > { %v3755_v20 = vpop.f32.mrb[132].mxu0  ;;  %v3804_v35 = vpop.f32.mrb[132].mxu1 }
 0x205   : > { %v4008_v34 = vadd.f32 %v3755_v20, %v3587_v53  ;;  %v4946_v37 = vpop.f32.mrb[133].mxu0  ;;  %v4009_v39 = vadd.f32 %v3804_v35, %v3588_v56  ;;  %v4952_v41 = vpop.f32.mrb[133].mxu1 }
 0x206   : > { %v3758_v42 = vpop.f32.mrb[134].mxu0  ;;  %v3807_v44 = vpop.f32.mrb[134].mxu1 }
 0x207   : > { %v4024_v38 = vadd.f32 %v4016_v33, %v4008_v34  ;;  %v4947_v45 = vpop.f32.mrb[135].mxu0  ;;  %v4025_v48 = vadd.f32 %v4017_v36, %v4009_v39  ;;  %v4953_v2 = vpop.f32.mrb[135].mxu1 }
 0x208   : > { %v4042_v12 = vld [vmem:[#allocation2] sm:$0xff] (!%p4399_p11) }
 0x209   : > { %4032 = vst.msk [vmem:[#allocation2 + $0x10] sm:$0xff] %vm301_vm3, %v4024_v38  ;;  %4033 = vst.msk [vmem:[#allocation2 + $0x18] sm:$0xff] %vm301_vm3, %v4025_v48  ;;  %v4050_v14 = vmax.f32 (!%p4399_p11), %v4042_v12, 0.0 }
 0x20b   : > { %4058 = vst.msk [vmem:[%s5230_s24] sm:$0xff] (!%p4399_p11), %vm301_vm3, %v4050_v14 }
 0x20c   : > { %v3853_v49 = vpop.f32.mrb[136].mxu0  ;;  %v3902_v51 = vpop.f32.mrb[136].mxu1 }
 0x20d   : > { %v4010_v50 = vadd.f32 %v3853_v49, %v3589_v63  ;;  %v4958_v43 = vpop.f32.mrb[137].mxu0  ;;  %v4011_v26 = vadd.f32 %v3902_v51, %v3590_v58  ;;  %v4964_v53 = vpop.f32.mrb[137].mxu1  ;;  %v4021_v63 = vld [vmem:[#allocation2 + $0x38] sm:$0xff] }
 0x20e   : > { %v3856_v28 = vpop.f32.mrb[138].mxu0  ;;  %v3905_v56 = vpop.f32.mrb[138].mxu1 }
 0x20f   : > { %v4026_v55 = vadd.f32 %v4018_v40, %v4010_v50  ;;  %v4959_v57 = vpop.f32.mrb[139].mxu0  ;;  %v4027_v59 = vadd.f32 %v4019_v52, %v4011_v26  ;;  %v4965_v60 = vpop.f32.mrb[139].mxu1 }
 0x210   : > { %v4045_v16 = vld [vmem:[#allocation2 + $0x18] sm:$0xff] (!%p4399_p11) }
 0x211   : > { %4034 = vst.msk [vmem:[#allocation2 + $0x20] sm:$0xff] %vm301_vm3, %v4026_v55  ;;  %4035 = vst.msk [vmem:[#allocation2 + $0x28] sm:$0xff] %vm301_vm3, %v4027_v59  ;;  %v4053_v18 = vmax.f32 (!%p4399_p11), %v4045_v16, 0.0 }
 0x213   : > { %4041 = sbr.rel (%p4399_p11) target bundleno = 548 (0x224), region = 40  ;;  %4061 = vst.msk [vmem:[%s5230_s24 + $0x18] sm:$0xff] (!%p4399_p11), %vm301_vm3, %v4053_v18 }
 0x214   : > { %v3951_v61 = vpop.f32.mrb[140].mxu0  ;;  %v4000_v3 = vpop.f32.mrb[140].mxu1 }
 0x215   : > { %v4012_v54 = vadd.f32 %v3951_v61, %v3591_v11  ;;  %v4970_v4 = vpop.f32.mrb[141].mxu0  ;;  %v4013_v46 = vadd.f32 %v4000_v3, %v3592_v13  ;;  %v4976_v47 = vpop.f32.mrb[141].mxu1  ;;  %v4043_v11 = vld [vmem:[#allocation2 + $0x8] sm:$0xff] (!%p4399_p11)  ;;  %v4044_v13 = vld [vmem:[#allocation2 + $0x10] sm:$0xff] (!%p4399_p11) }
 0x216   : > { %v3954_v58 = vpop.f32.mrb[142].mxu0  ;;  %v4003_v7 = vpop.f32.mrb[142].mxu1  ;;  %v4051_v9 = vmax.f32 (!%p4399_p11), %v4043_v11, 0.0  ;;  %v4052_v15 = vmax.f32 (!%p4399_p11), %v4044_v13, 0.0 }
 0x217   : > { %v4028_v6 = vadd.f32 %v4020_v62, %v4012_v54  ;;  %v4971_v8 = vpop.f32.mrb[143].mxu0  ;;  %v4029_v10 = vadd.f32 %v4021_v63, %v4013_v46  ;;  %v4977_v5 = vpop.f32.mrb[143].mxu1 }
 0x218   : > { %v4046_v0 = vld [vmem:[#allocation2 + $0x20] sm:$0xff] (!%p4399_p11)  ;;  %v4047_v1 = vld [vmem:[#allocation2 + $0x28] sm:$0xff] (!%p4399_p11)  ;;  %4059 = vst.msk [vmem:[%s5230_s24 + $0x8] sm:$0xff] (!%p4399_p11), %vm301_vm3, %v4051_v9  ;;  %4060 = vst.msk [vmem:[%s5230_s24 + $0x10] sm:$0xff] (!%p4399_p11), %vm301_vm3, %v4052_v15 }
 0x219   : > { %4036 = vst.msk [vmem:[#allocation2 + $0x30] sm:$0xff] %vm301_vm3, %v4028_v6  ;;  %4037 = vst.msk [vmem:[#allocation2 + $0x38] sm:$0xff] %vm301_vm3, %v4029_v10  ;;  %v4054_v21 = vmax.f32 (!%p4399_p11), %v4046_v0, 0.0  ;;  %v4055_v17 = vmax.f32 (!%p4399_p11), %v4047_v1, 0.0 }
 0x21b   : > { %4062 = vst.msk [vmem:[%s5230_s24 + $0x20] sm:$0xff] %vm301_vm3, %v4054_v21  ;;  %4063 = vst.msk [vmem:[%s5230_s24 + $0x28] sm:$0xff] %vm301_vm3, %v4055_v17 }
 0x220   : > { %v4048_v22 = vld [vmem:[#allocation2 + $0x30] sm:$0xff]  ;;  %v4049_v24 = vld [vmem:[#allocation2 + $0x38] sm:$0xff] }
 0x221   : > { %v4056_v23 = vmax.f32 %v4048_v22, 0.0  ;;  %v4057_v25 = vmax.f32 %v4049_v24, 0.0 }
 0x223   : > { %4064 = vst.msk [vmem:[%s5230_s24 + $0x30] sm:$0xff] %vm301_vm3, %v4056_v23  ;;  %4065 = vst.msk [vmem:[%s5230_s24 + $0x38] sm:$0xff] %vm301_vm3, %v4057_v25 }
 0x224 PF: > { %s13_s18 = sadd.s32 1, %s5141_s18   ;;  %s5736_s12 = smov %s5129_s15 }
 0x225   : > { %p10_p12 = scmp.ge.s32.totalorder %s13_s18, 50   ;;  %s5737_s13 = smov %s5133_s16 }
 0x226   : > { %s5738_s14 = smov %s5137_s17  ;;  %s5739_s15 = smov %s5743_s19 }
 0x227   : > { %s5740_s16 = smov %s5747_s20  ;;  %s5741_s17 = smov %s5751_s21 }
 0x228   :  { %12 = sbr.rel (!%p10_p12) target bundleno = 4 (0x4), region = 83 }

// kernel: _lambda_.5
= control target key start
LH: loop header
LB: loop body
LE: loop exit
PB: predicated region body
PF: predicated region fallthrough
CT: control target
= control target key end

     0   :  { %s5263_s15 = smov 0   ;;  %s5265_s16 = smov 0   ;;  %s5841_s0 = inlined_call_operand.vmem [shape: bf16[2,10,10,10,8], index: 0, kind: input, shape index: {}]   ;;  %s5842_s1 = inlined_call_operand.vmem [shape: bf16[3,3,3,8,8], index: 1, kind: input, shape index: {}]   ;;  %s5843_s2 = inlined_call_operand.vmem [shape: f32[1,1,8], index: 2, kind: input, shape index: {}]   ;;  %s5844_s3 = inlined_call_operand.vmem [shape: f32[2,8,8,8,8], index: 3, kind: input, shape index: {}]   ;;  %s5845_s4 = inlined_call_operand.vmem [shape: f32[2,8,8,8,8], index: 4, kind: output, shape index: {}]  }
   0x1   :  { %s5267_s17 = smov 0   ;;  %s5269_s18 = smov 0  }
   0x2   :  { %s5271_s19 = smov 0   ;;  %s5273_s20 = smov 0  }
   0x3   :  { %s5275_s21 = smov 0  }
   0x4 LB: > { %s26_s22 = sadd.s32 1, %s5222_s18  ;;  %s29_s23 = sadd.s32 1, %s5226_s19  ;;  %s5234_s21 = sphi %s5275_s21, %s14_s21   ;;  %s5230_s20 = sphi %s5273_s20, %s5853_s20   ;;  %s5226_s19 = sphi %s5271_s19, %s5852_s19   ;;  %s5222_s18 = sphi %s5269_s18, %s5851_s18   ;;  %s5218_s17 = sphi %s5267_s17, %s5850_s17   ;;  %s5214_s16 = sphi %s5265_s16, %s5849_s16   ;;  %s5210_s15 = sphi %s5263_s15, %s5848_s15  }
   0x5   : > { %p27_p0 = scmp.ge.s32.totalorder %s26_s22, 3  ;;  %p4273_p1 = scmp.ge.s32.totalorder %s5234_s21, 1 }
   0x6   : > { %p219_p2 = scmp.lt.s32.totalorder %s5234_s21, 49  ;;  %s33_s24 = sadd.s32 1, %s5230_s20 }
   0x7   : > { %s5855_s22 = smov (%p27_p0, %s26_s22), 0  ;;  %s5857_s23 = smov (!%p27_p0, %s29_s23), %s5226_s19 }
   0x8   : > { %p220_p3 = pnand %p4273_p1, %p219_p2  ;;  %p31_p4 = scmp.ge.s32.totalorder %s5857_s23, 8 }
   0x9   : > { %s268_s25 = sadd.s32 (!%p220_p3), %s5210_s15, %s5214_s16  ;;  %p269_p6 = scmp.lt.s32.totalorder (!%p220_p3), %s5218_s17, 1 }
   0xa   : > { %s5859_s23 = smov (%p31_p4, %s5857_s23), 0  ;;  %s5861_s24 = smov (!%p31_p4, %s33_s24), %s5230_s20 }
   0xb   : > { %p35_p5 = scmp.ge.s32.totalorder %s5861_s24, 2  ;;  %223 = sbr.rel (%p220_p3) target bundleno = 547 (0x223), region = 36 }
   0xc   : > { %p271_p7 = scmp.lt.s32.totalorder (!%p220_p3), %s268_s25, 9  ;;  %p279_p8 = scmp.lt.s32.totalorder (!%p220_p3), %s5210_s15, 2 }
   0xd   : > { %s5863_s24 = smov (%p35_p5, %s5861_s24), 0  ;;  %p286_p9 = scmp.lt.s32.totalorder (!%p220_p3), %s5214_s16, 7 }
   0xe   : > { %5846 = sst [smem:[#allocation3_spill]] %s5863_s24  ;;  %p4282_p10 = scmp.ne.s32.totalorder (!%p220_p3), %s5210_s15, 0 }
  0x12   : > { %s5865_s17 = smov (!%p269_p6, %s5218_s17), 1  ;;  %s5867_s25 = smov (!%p271_p7, %s268_s25), 9 }
  0x13   : > { %s5072_s26 = smul.u32 200, %s5865_s17  ;;  %s4277_s12 = sshll.u32 %s5865_s17, 6  ;;  %v4283_v1 = vld [vmem:[%s5843_s2] ss:$0 sm:$0xff] (!%p4282_p10)  ;;  %vm330_vm0 = vcmask (!%p4282_p10), 64512  }
  0x14   : > { %s5071_s27 = smul.u32 20, %s5867_s25  ;;  %s5869_s16 = smov (!%p286_p9, %s5214_s16), 7 }
  0x15   : > { %s280_s28 = scalar_select %p279_p8, %s5210_s15, 2 }
  0x16   : > { %s275_s29 = sadd.s32 %s5072_s26, %s5071_s27  ;;  %s4276_s13 = sshll.u32 %s5869_s16, 3 }
  0x17   : > { %s4274_s30 = sshll.u32 %s275_s29, 2  ;;  %s5073_s5 = smul.u32 36, %s280_s28 }
  0x18   : > { %s5317_s8 = scalar_lea.vmem %s5841_s0, %s4274_s30  ;;  %s290_s14 = sadd.s32 %s4277_s12, %s4276_s13 }
  0x19   : > { %s5322_s11 = scalar_lea.vmem %s5842_s1, %s5073_s5  ;;  %s4278_s25 = sshll.u32 %s290_s14, 3 }
  0x1a   : > { %s292_s27 = scalar_lea.vmem %s5844_s3, %s4278_s25  ;;  %s5331_s6 = scalar_lea.vmem %s5845_s4, %s4278_s25 }
  0x1b   : > { %306 = sbr.rel (%p4282_p10) target bundleno = 34 (0x22), region = 40  ;;  %v307_v0 = vld [vmem:[%s292_s27] sm:$0xff] (!%p4282_p10)  ;;  %v308_v2 = vld [vmem:[%s292_s27 + $0x8] sm:$0xff] (!%p4282_p10)  ;;  %v309_v5 = vld [vmem:[%s292_s27 + $0x10] sm:$0xff] (!%p4282_p10) }
  0x1c   : > { %v322_v3 = vadd.f32 (!%p4282_p10), %v4283_v1, %v307_v0  ;;  %v323_v4 = vadd.f32 (!%p4282_p10), %v4283_v1, %v308_v2  ;;  %v310_v6 = vld [vmem:[%s292_s27 + $0x18] sm:$0xff] (!%p4282_p10)  ;;  %v311_v7 = vld [vmem:[%s292_s27 + $0x20] sm:$0xff] (!%p4282_p10)  ;;  %v324_v8 = vadd.f32 (!%p4282_p10), %v4283_v1, %v309_v5  ;;  %v312_v11 = vld [vmem:[%s292_s27 + $0x28] sm:$0xff] (!%p4282_p10) }
  0x1d   : > { %v325_v9 = vadd.f32 (!%p4282_p10), %v4283_v1, %v310_v6  ;;  %v326_v10 = vadd.f32 (!%p4282_p10), %v4283_v1, %v311_v7  ;;  %v313_v12 = vld [vmem:[%s292_s27 + $0x30] sm:$0xff] (!%p4282_p10)  ;;  %v314_v13 = vld [vmem:[%s292_s27 + $0x38] sm:$0xff] (!%p4282_p10)  ;;  %v327_v14 = vadd.f32 (!%p4282_p10), %v4283_v1, %v312_v11 }
  0x1e   : > { %331 = vst.msk [vmem:[#allocation2] sm:$0xff] (!%p4282_p10), %vm330_vm0, %v322_v3  ;;  %332 = vst.msk [vmem:[#allocation2 + $0x8] sm:$0xff] (!%p4282_p10), %vm330_vm0, %v323_v4  ;;  %v328_v15 = vadd.f32 (!%p4282_p10), %v4283_v1, %v313_v12  ;;  %v329_v16 = vadd.f32 (!%p4282_p10), %v4283_v1, %v314_v13 }
  0x1f   : > { %333 = vst.msk [vmem:[#allocation2 + $0x10] sm:$0xff] (!%p4282_p10), %vm330_vm0, %v324_v8  ;;  %334 = vst.msk [vmem:[#allocation2 + $0x18] sm:$0xff] (!%p4282_p10), %vm330_vm0, %v325_v9 }
  0x20   : > { %335 = vst.msk [vmem:[#allocation2 + $0x20] sm:$0xff] (!%p4282_p10), %vm330_vm0, %v326_v10  ;;  %336 = vst.msk [vmem:[#allocation2 + $0x28] sm:$0xff] (!%p4282_p10), %vm330_vm0, %v327_v14 }
  0x21   : > { %337 = vst.msk [vmem:[#allocation2 + $0x30] sm:$0xff] (!%p4282_p10), %vm330_vm0, %v328_v15  ;;  %338 = vst.msk [vmem:[#allocation2 + $0x38] sm:$0xff] (!%p4282_p10), %vm330_vm0, %v329_v16 }
  0x22 PF: > { %v4284_v17 = vld [vmem:[%s5322_s11 + $0x4] sm:$0xf]  ;;  %vm382_vm1 = vcmask 1043456   ;;  %v5236_v18 = vmov 0.0   ;;  %vm5237_vm2 = vmmov 0   ;;  %vm378_vm3 = vcmask 64512  }
  0x23   : > { %4639 = vmatprep.subr.bf16.mxu0 %v5236_v18  ;;  %4645 = vmatprep.subr.bf16.mxu1 %v5236_v18  ;;  %v5349_v19 = vsel %vm382_vm1, %v4284_v17, 0  ;;  %v5132_v20 = vld [vmem:[%s5317_s8] sm:$0x1f]   ;;  %v5133_v21 = vld [vmem:[%s5317_s8 + $0x8] sm:$0x1f]   ;;  %p4492_p11 = scmp.ne.s32.totalorder %s5210_s15, 2 }
  0x24   : > { %4640 = vmatpush3.bf16.msra.mxu0 %v5349_v19  ;;  %4646 = vmatpush3.bf16.msra.mxu1 %v5349_v19  ;;  %v372_v22 = vshrl.u32 %v5132_v20, 16  ;;  %v374_v23 = vshll.u32 %v5132_v20, 16  ;;  %v5134_v24 = vld [vmem:[%s5317_s8 + $0x10] sm:$0x1f]   ;;  %v432_v25 = vshrl.u32 %v5133_v21, 16  ;;  %v434_v26 = vshll.u32 %v5133_v21, 16 }
  0x25   : > { %4641 = vmatprep.mubr.msk.bf16.mxu0 %vm5237_vm2, %v5236_v18  ;;  %4647 = vmatprep.mubr.msk.bf16.mxu1 %vm5237_vm2, %v5236_v18  ;;  %v5135_v27 = vld [vmem:[%s5317_s8 + $0x18] sm:$0x1f]   ;;  %v489_v29 = vshll.u32 %v5134_v24, 16  ;;  %v487_v34 = vshrl.u32 %v5134_v24, 16  ;;  %v5136_v36 = vld [vmem:[%s5317_s8 + $0x20] sm:$0x1f]  }
  0x26   : > { %4651 = vmatprep.subr.bf16.mxu0 %v5236_v18  ;;  %4657 = vmatprep.subr.bf16.mxu1 %v5236_v18  ;;  %v376_v28 = vrot.slane %v374_v23, 1  ;;  %v436_v30 = vrot.slane %v434_v26, 1  ;;  %v544_v31 = vshll.u32 %v5135_v27, 16  ;;  %v542_v37 = vshrl.u32 %v5135_v27, 16  ;;  %v5137_v39 = vld [vmem:[%s5317_s8 + $0x28] sm:$0x1f]  }
  0x27   : > { %v491_v35 = vrot.slane %v489_v29, 1  ;;  %v599_v41 = vshll.u32 %v5136_v36, 16  ;;  %v654_v43 = vshll.u32 %v5137_v39, 16  ;;  %v5138_v44 = vld [vmem:[%s5317_s8 + $0x30] sm:$0x1f]   ;;  %v597_v45 = vshrl.u32 %v5136_v36, 16 }
  0x28   : > { %v377_v32 = vor.u32 %v376_v28, %v372_v22  ;;  %v437_v33 = vor.u32 %v436_v30, %v432_v25  ;;  %v546_v38 = vrot.slane %v544_v31, 1  ;;  %v652_v47 = vshrl.u32 %v5137_v39, 16  ;;  %v5139_v49 = vld [vmem:[%s5317_s8 + $0x38] sm:$0x1f]   ;;  %v347_v58 = vld [vmem:[%s5322_s11] sm:$0xf] }
  0x29   : > { %v492_v40 = vor.u32 %v491_v35, %v487_v34  ;;  %v601_v46 = vrot.slane %v599_v41, 1  ;;  %v656_v48 = vrot.slane %v654_v43, 1  ;;  %v709_v51 = vshll.u32 %v5138_v44, 16  ;;  %v339_v62 = vld [vmem:[%s5317_s8] sm:$0xf] }
  0x2a   : > { %4642 = vmatmul.mubr.msk.bf16.vlgmr.msra.gmra.mrb[0].mxu0 %vm378_vm3, %v377_v32  ;;  %4648 = vmatmul.mubr.msk.bf16.vlgmr.msra.gmra.mrb[0].mxu1 %vm378_vm3, %v437_v33  ;;  %v547_v42 = vor.u32 %v546_v38, %v542_v37  ;;  %v764_v53 = vshll.u32 %v5139_v49, 16  ;;  %v707_v54 = vshrl.u32 %v5138_v44, 16  ;;  %v762_v56 = vshrl.u32 %v5139_v49, 16  ;;  %v340_v63 = vld [vmem:[%s5317_s8 + $0x8] sm:$0xf] }
  0x2b   : > { %4652 = vmatpush3.bf16.msra.mxu0 %v5349_v19  ;;  %4658 = vmatpush3.bf16.msra.mxu1 %v5349_v19  ;;  %v602_v50 = vor.u32 %v601_v46, %v597_v45  ;;  %v657_v52 = vor.u32 %v656_v48, %v652_v47  ;;  %v711_v55 = vrot.slane %v709_v51, 1  ;;  %v815_v61 = vsel %vm382_vm1, %v347_v58, 0  ;;  %v341_v0 = vld [vmem:[%s5317_s8 + $0x10] sm:$0xf]  ;;  %v342_v1 = vld [vmem:[%s5317_s8 + $0x18] sm:$0xf] }
  0x2c   : > { %4653 = vmatprep.mubr.msk.bf16.mxu0 %vm5237_vm2, %v5236_v18  ;;  %4659 = vmatprep.mubr.msk.bf16.mxu1 %vm5237_vm2, %v5236_v18  ;;  %v766_v57 = vrot.slane %v764_v53, 1  ;;  %v343_v2 = vld [vmem:[%s5317_s8 + $0x20] sm:$0xf]  ;;  %v344_v3 = vld [vmem:[%s5317_s8 + $0x28] sm:$0xf] }
  0x2d   : > { %4663 = vmatprep.subr.bf16.mxu0 %v5236_v18  ;;  %4669 = vmatprep.subr.bf16.mxu1 %v5236_v18  ;;  %v712_v59 = vor.u32 %v711_v55, %v707_v54  ;;  %v4309_v4 = vld [vmem:[%s5322_s11 + $0x8] sm:$0xf]  ;;  %v345_v5 = vld [vmem:[%s5317_s8 + $0x30] sm:$0xf]  ;;  %v346_v6 = vld [vmem:[%s5317_s8 + $0x38] sm:$0xf] }
  0x2e   : > { %v767_v60 = vor.u32 %v766_v57, %v762_v56  ;;  %v1186_v7 = vsel %vm382_vm1, %v4309_v4, 0  ;;  %v5140_v8 = vld [vmem:[%s5317_s8] sm:$0x1e]   ;;  %v5141_v9 = vld [vmem:[%s5317_s8 + $0x8] sm:$0x1e]  }
  0x2f   : > { %v1181_v10 = vrot.slane %v5140_v8, 1  ;;  %v1233_v11 = vrot.slane %v5141_v9, 1  ;;  %v5142_v12 = vld [vmem:[%s5317_s8 + $0x10] sm:$0x1e]   ;;  %v5143_v13 = vld [vmem:[%s5317_s8 + $0x18] sm:$0x1e]  }
  0x30   : > { %v1282_v14 = vrot.slane %v5142_v12, 1  ;;  %v1331_v15 = vrot.slane %v5143_v13, 1  ;;  %v5144_v16 = vld [vmem:[%s5317_s8 + $0x20] sm:$0x1e]   ;;  %v5145_v17 = vld [vmem:[%s5317_s8 + $0x28] sm:$0x1e]  }
  0x31   : > { %v1429_v20 = vrot.slane %v5145_v17, 1  ;;  %v5146_v21 = vld [vmem:[%s5317_s8 + $0x30] sm:$0x1e]   ;;  %v5147_v22 = vld [vmem:[%s5317_s8 + $0x38] sm:$0x1e]  }
  0x32   : > { %4654 = vmatmul.mubr.msk.bf16.vlgmr.msra.gmra.mrb[4].mxu0 %vm378_vm3, %v492_v40  ;;  %4660 = vmatmul.mubr.msk.bf16.vlgmr.msra.gmra.mrb[4].mxu1 %vm378_vm3, %v547_v42  ;;  %v4334_v23 = vld [vmem:[%s5322_s11 + $0xc] sm:$0xf]  ;;  %v1478_v24 = vrot.slane %v5146_v21, 1  ;;  %v1527_v25 = vrot.slane %v5147_v22, 1  ;;  %v4326_v27 = vld [vmem:[%s5317_s8 + $0x8] sm:$0xf] }
  0x33   : > { %4664 = vmatpush3.bf16.msra.mxu0 %v5349_v19  ;;  %4670 = vmatpush3.bf16.msra.mxu1 %v5349_v19  ;;  %v1594_v26 = vsel %vm382_vm1, %v4334_v23, 0  ;;  %v4327_v28 = vld [vmem:[%s5317_s8 + $0x10] sm:$0xf]  ;;  %v4328_v29 = vld [vmem:[%s5317_s8 + $0x18] sm:$0xf] }
  0x34   : > { %4665 = vmatprep.mubr.msk.bf16.mxu0 %vm5237_vm2, %v5236_v18  ;;  %4671 = vmatprep.mubr.msk.bf16.mxu1 %vm5237_vm2, %v5236_v18  ;;  %v4329_v30 = vld [vmem:[%s5317_s8 + $0x20] sm:$0xf]  ;;  %v4330_v31 = vld [vmem:[%s5317_s8 + $0x28] sm:$0xf]  ;;  %v4331_v32 = vld [vmem:[%s5317_s8 + $0x30] sm:$0xf] }
  0x35   : > { %4675 = vmatprep.subr.bf16.mxu0 %v5236_v18  ;;  %4681 = vmatprep.subr.bf16.mxu1 %v5236_v18  ;;  %v5148_v33 = vld [vmem:[%s5317_s8 + $0x8] sm:$0x1f]   ;;  %v5149_v34 = vld [vmem:[%s5317_s8 + $0x10] sm:$0x1f]   ;;  %v4332_v37 = vld [vmem:[%s5317_s8 + $0x38] sm:$0xf] }
  0x36   : > { %v4359_v35 = vld [vmem:[%s5322_s11 + $0x10] sm:$0xf]  ;;  %v1971_v36 = vshll.u32 %v5148_v33, 16  ;;  %v2029_v38 = vshll.u32 %v5149_v34, 16  ;;  %v4333_v39 = vld [vmem:[%s5317_s8 + $0x40] sm:$0xf] }
  0x37   : > { %v1979_v40 = vsel %vm382_vm1, %v4359_v35, 0  ;;  %v1969_v41 = vshrl.u32 %v5148_v33, 16  ;;  %v5150_v43 = vld [vmem:[%s5317_s8 + $0x18] sm:$0x1f]   ;;  %v2027_v44 = vshrl.u32 %v5149_v34, 16 }
  0x38   : > { %v1973_v42 = vrot.slane %v1971_v36, 1  ;;  %v2031_v45 = vrot.slane %v2029_v38, 1  ;;  %v5151_v46 = vld [vmem:[%s5317_s8 + $0x20] sm:$0x1f]   ;;  %v2084_v48 = vshll.u32 %v5150_v43, 16  ;;  %v2082_v51 = vshrl.u32 %v5150_v43, 16 }
  0x39   : > { %v5152_v53 = vld [vmem:[%s5317_s8 + $0x28] sm:$0x1f]   ;;  %v2137_v54 = vshrl.u32 %v5151_v46, 16  ;;  %v5153_v56 = vld [vmem:[%s5317_s8 + $0x30] sm:$0x1f]  }
  0x3a   : > { %4666 = vmatmul.mubr.msk.bf16.vlgmr.msra.gmra.mrb[8].mxu0 %vm378_vm3, %v602_v50  ;;  %4672 = vmatmul.mubr.msk.bf16.vlgmr.msra.gmra.mrb[8].mxu1 %vm378_vm3, %v657_v52  ;;  %v1974_v47 = vor.u32 %v1973_v42, %v1969_v41  ;;  %v2032_v49 = vor.u32 %v2031_v45, %v2027_v44  ;;  %v2139_v50 = vshll.u32 %v5151_v46, 16  ;;  %v2086_v52 = vrot.slane %v2084_v48, 1  ;;  %v5159_v21 = vld [vmem:[%s5317_s8 + $0x20] sm:$0x1e]   ;;  %v4409_v34 = vld [vmem:[%s5317_s8 + $0x10] sm:$0xf] }
  0x3b   : > { %4676 = vmatpush3.bf16.msra.mxu0 %v5349_v19  ;;  %4682 = vmatpush3.bf16.msra.mxu1 %v5349_v19  ;;  %v1380_v19 = vrot.slane %v5144_v16, 1  ;;  %v2194_v58 = vshll.u32 %v5152_v53, 16  ;;  %v5157_v16 = vld [vmem:[%s5317_s8 + $0x10] sm:$0x1e]   ;;  %v2587_v23 = vrot.slane %v5159_v21, 1 }
  0x3c   : > { %4677 = vmatprep.mubr.msk.bf16.mxu0 %vm5237_vm2, %v5236_v18  ;;  %4683 = vmatprep.mubr.msk.bf16.mxu1 %vm5237_vm2, %v5236_v18  ;;  %v2141_v55 = vrot.slane %v2139_v50, 1  ;;  %v2087_v57 = vor.u32 %v2086_v52, %v2082_v51  ;;  %v4410_v35 = vld [vmem:[%s5317_s8 + $0x18] sm:$0xf]  ;;  %v4411_v36 = vld [vmem:[%s5317_s8 + $0x20] sm:$0xf] }
  0x3d   : > { %4687 = vmatprep.subr.bf16.mxu0 %v5236_v18  ;;  %4693 = vmatprep.subr.bf16.mxu1 %v5236_v18  ;;  %v4413_v38 = vld [vmem:[%s5317_s8 + $0x30] sm:$0xf]  ;;  %v5165_v41 = vld [vmem:[%s5317_s8 + $0x18] sm:$0x1f]  }
  0x3e   : > { %v4442_v43 = vld [vmem:[%s5322_s11 + $0x1c] sm:$0xf]  ;;  %v3285_v50 = vshll.u32 %v5165_v41, 16 }
  0x42   : > { %4678 = vmatmul.mubr.msk.bf16.vlgmr.msra.gmra.mrb[12].mxu0 %vm378_vm3, %v712_v59  ;;  %4684 = vmatmul.mubr.msk.bf16.vlgmr.msra.gmra.mrb[12].mxu1 %vm378_vm3, %v767_v60  ;;  %v2142_v59 = vor.u32 %v2141_v55, %v2137_v54  ;;  %v2249_v60 = vshll.u32 %v5153_v56, 16  ;;  %v5657_v54 = vsel %vm382_vm1, %v4442_v43, 0 }
  0x43   : > { %4688 = vmatpush3.bf16.msra.mxu0 %v815_v61  ;;  %4694 = vmatpush3.bf16.msra.mxu1 %v815_v61 }
  0x44   : > { %4689 = vmatprep.mubr.msk.bf16.mxu0 %vm5237_vm2, %v5236_v18  ;;  %4695 = vmatprep.mubr.msk.bf16.mxu1 %vm5237_vm2, %v5236_v18 }
  0x45   : > { %4699 = vmatprep.subr.bf16.mxu0 %v5236_v18  ;;  %4705 = vmatprep.subr.bf16.mxu1 %v5236_v18 }
  0x4a   : > { %4690 = vmatmul.mubr.msk.bf16.vlgmr.msra.gmra.mrb[16].mxu0 %vm378_vm3, %v339_v62  ;;  %4696 = vmatmul.mubr.msk.bf16.vlgmr.msra.gmra.mrb[16].mxu1 %vm378_vm3, %v340_v63  ;;  %v2196_v62 = vrot.slane %v2194_v58, 1  ;;  %v5154_v63 = vld [vmem:[%s5317_s8 + $0x38] sm:$0x1f]   ;;  %v5166_v58 = vld [vmem:[%s5317_s8 + $0x20] sm:$0x1f]  }
  0x4b   : > { %4700 = vmatpush3.bf16.msra.mxu0 %v815_v61  ;;  %4706 = vmatpush3.bf16.msra.mxu1 %v815_v61  ;;  %v2304_v4 = vshll.u32 %v5154_v63, 16 }
  0x4c   : > { %4701 = vmatprep.mubr.msk.bf16.mxu0 %vm5237_vm2, %v5236_v18  ;;  %4707 = vmatprep.mubr.msk.bf16.mxu1 %vm5237_vm2, %v5236_v18 }
  0x4d   : > { %4711 = vmatprep.subr.bf16.mxu0 %v5236_v18  ;;  %4717 = vmatprep.subr.bf16.mxu1 %v5236_v18  ;;  %v2306_v8 = vrot.slane %v2304_v4, 1 }
  0x52   : > { %4702 = vmatmul.mubr.msk.bf16.vlgmr.msra.gmra.mrb[20].mxu0 %vm378_vm3, %v341_v0  ;;  %4708 = vmatmul.mubr.msk.bf16.vlgmr.msra.gmra.mrb[20].mxu1 %vm378_vm3, %v342_v1  ;;  %v2247_v0 = vshrl.u32 %v5153_v56, 16  ;;  %v2251_v1 = vrot.slane %v2249_v60, 1  ;;  %v3287_v60 = vrot.slane %v3285_v50, 1 }
  0x53   : > { %4712 = vmatpush3.bf16.msra.mxu0 %v815_v61  ;;  %4718 = vmatpush3.bf16.msra.mxu1 %v815_v61 }
  0x54   : > { %4713 = vmatprep.mubr.msk.bf16.mxu0 %vm5237_vm2, %v5236_v18  ;;  %4719 = vmatprep.mubr.msk.bf16.mxu1 %vm5237_vm2, %v5236_v18 }
  0x55   : > { %4723 = vmatprep.subr.bf16.mxu0 %v5236_v18  ;;  %4729 = vmatprep.subr.bf16.mxu1 %v5236_v18 }
  0x5a   : > { %4714 = vmatmul.mubr.msk.bf16.vlgmr.msra.gmra.mrb[24].mxu0 %vm378_vm3, %v343_v2  ;;  %4720 = vmatmul.mubr.msk.bf16.vlgmr.msra.gmra.mrb[24].mxu1 %vm378_vm3, %v344_v3  ;;  %v5155_v2 = vld [vmem:[%s5317_s8 + $0x40] sm:$0x1f]  }
  0x5b   : > { %4724 = vmatpush3.bf16.msra.mxu0 %v815_v61  ;;  %4730 = vmatpush3.bf16.msra.mxu1 %v815_v61  ;;  %v2192_v61 = vshrl.u32 %v5152_v53, 16  ;;  %v2357_v9 = vshrl.u32 %v5155_v2, 16  ;;  %v4416_v53 = vld [vmem:[%s5317_s8 + $0x48] sm:$0xf] }
  0x5c   : > { %4725 = vmatprep.mubr.msk.bf16.mxu0 %vm5237_vm2, %v5236_v18  ;;  %4731 = vmatprep.mubr.msk.bf16.mxu1 %vm5237_vm2, %v5236_v18 }
  0x5d   : > { %4735 = vmatprep.subr.bf16.mxu0 %v5236_v18  ;;  %4741 = vmatprep.subr.bf16.mxu1 %v5236_v18  ;;  %v2197_v3 = vor.u32 %v2196_v62, %v2192_v61  ;;  %v5167_v61 = vld [vmem:[%s5317_s8 + $0x28] sm:$0x1f]  }
  0x62   : > { %4726 = vmatmul.mubr.msk.bf16.vlgmr.msra.gmra.mrb[28].mxu0 %vm378_vm3, %v345_v5  ;;  %4732 = vmatmul.mubr.msk.bf16.vlgmr.msra.gmra.mrb[28].mxu1 %vm378_vm3, %v346_v6  ;;  %v2252_v5 = vor.u32 %v2251_v1, %v2247_v0  ;;  %v2359_v6 = vshll.u32 %v5155_v2, 16  ;;  %v3340_v2 = vshll.u32 %v5166_v58, 16 }
  0x63   : > { %4736 = vmatpush3.bf16.msra.mxu0 %v1186_v7  ;;  %4742 = vmatpush3.bf16.msra.mxu1 %v1186_v7 }
  0x64   : > { %4737 = vmatprep.mubr.msk.bf16.mxu0 %vm5237_vm2, %v5236_v18  ;;  %4743 = vmatprep.mubr.msk.bf16.mxu1 %vm5237_vm2, %v5236_v18 }
  0x65   : > { %4747 = vmatprep.subr.bf16.mxu0 %v5236_v18  ;;  %4753 = vmatprep.subr.bf16.mxu1 %v5236_v18 }
  0x6a   : > { %4738 = vmatmul.mubr.msk.bf16.vlgmr.msra.gmra.mrb[32].mxu0 %vm378_vm3, %v1181_v10  ;;  %4744 = vmatmul.mubr.msk.bf16.vlgmr.msra.gmra.mrb[32].mxu1 %vm378_vm3, %v1233_v11  ;;  %v2361_v10 = vrot.slane %v2359_v6, 1  ;;  %v4392_v11 = vld [vmem:[%s5322_s11 + $0x14] sm:$0xf]  ;;  %v3395_v6 = vshll.u32 %v5167_v61, 16 }
  0x6b   : > { %4748 = vmatpush3.bf16.msra.mxu0 %v1186_v7  ;;  %4754 = vmatpush3.bf16.msra.mxu1 %v1186_v7 }
  0x6c   : > { %4749 = vmatprep.mubr.msk.bf16.mxu0 %vm5237_vm2, %v5236_v18  ;;  %4755 = vmatprep.mubr.msk.bf16.mxu1 %vm5237_vm2, %v5236_v18  ;;  %v2362_v13 = vor.u32 %v2361_v10, %v2357_v9  ;;  %v3338_v10 = vshrl.u32 %v5166_v58, 16 }
  0x6d   : > { %4759 = vmatprep.subr.bf16.mxu0 %v5236_v18  ;;  %4765 = vmatprep.subr.bf16.mxu1 %v5236_v18 }
  0x72   : > { %4750 = vmatmul.mubr.msk.bf16.vlgmr.msra.gmra.mrb[36].mxu0 %vm378_vm3, %v1282_v14  ;;  %4756 = vmatmul.mubr.msk.bf16.vlgmr.msra.gmra.mrb[36].mxu1 %vm378_vm3, %v1331_v15  ;;  %v2442_v14 = vsel %vm382_vm1, %v4392_v11, 0  ;;  %v5156_v15 = vld [vmem:[%s5317_s8 + $0x8] sm:$0x1e]   ;;  %v3342_v11 = vrot.slane %v3340_v2, 1 }
  0x73   : > { %4760 = vmatpush3.bf16.msra.mxu0 %v1186_v7  ;;  %4766 = vmatpush3.bf16.msra.mxu1 %v1186_v7  ;;  %v2437_v17 = vrot.slane %v5156_v15, 1  ;;  %v5169_v15 = vld [vmem:[%s5317_s8 + $0x38] sm:$0x1f]  }
  0x74   : > { %4761 = vmatprep.mubr.msk.bf16.mxu0 %vm5237_vm2, %v5236_v18  ;;  %4767 = vmatprep.mubr.msk.bf16.mxu1 %vm5237_vm2, %v5236_v18 }
  0x75   : > { %4771 = vmatprep.subr.bf16.mxu0 %v5236_v18  ;;  %4777 = vmatprep.subr.bf16.mxu1 %v5236_v18 }
  0x7a   : > { %4762 = vmatmul.mubr.msk.bf16.vlgmr.msra.gmra.mrb[40].mxu0 %vm378_vm3, %v1380_v19  ;;  %4768 = vmatmul.mubr.msk.bf16.vlgmr.msra.gmra.mrb[40].mxu1 %vm378_vm3, %v1429_v20  ;;  %v2489_v19 = vrot.slane %v5157_v16, 1  ;;  %v5158_v20 = vld [vmem:[%s5317_s8 + $0x18] sm:$0x1e]  }
  0x7b   : > { %4772 = vmatpush3.bf16.msra.mxu0 %v1186_v7  ;;  %4778 = vmatpush3.bf16.msra.mxu1 %v1186_v7  ;;  %v2302_v7 = vshrl.u32 %v5154_v63, 16  ;;  %v2538_v22 = vrot.slane %v5158_v20, 1  ;;  %v3343_v20 = vor.u32 %v3342_v11, %v3338_v10 }
  0x7c   : > { %4773 = vmatprep.mubr.msk.bf16.mxu0 %vm5237_vm2, %v5236_v18  ;;  %4779 = vmatprep.mubr.msk.bf16.mxu1 %vm5237_vm2, %v5236_v18 }
  0x7d   : > { %4783 = vmatprep.subr.bf16.mxu0 %v5236_v18  ;;  %4789 = vmatprep.subr.bf16.mxu1 %v5236_v18  ;;  %v2307_v12 = vor.u32 %v2306_v8, %v2302_v7 }
  0x82   : > { %4774 = vmatmul.mubr.msk.bf16.vlgmr.msra.gmra.mrb[44].mxu0 %vm378_vm3, %v1478_v24  ;;  %4780 = vmatmul.mubr.msk.bf16.vlgmr.msra.gmra.mrb[44].mxu1 %vm378_vm3, %v1527_v25  ;;  %v5160_v24 = vld [vmem:[%s5317_s8 + $0x28] sm:$0x1e]   ;;  %v5161_v25 = vld [vmem:[%s5317_s8 + $0x30] sm:$0x1e]  }
  0x83   : > { %4784 = vmatpush3.bf16.msra.mxu0 %v1594_v26  ;;  %4790 = vmatpush3.bf16.msra.mxu1 %v1594_v26 }
  0x84   : > { %4785 = vmatprep.mubr.msk.bf16.mxu0 %vm5237_vm2, %v5236_v18  ;;  %4791 = vmatprep.mubr.msk.bf16.mxu1 %vm5237_vm2, %v5236_v18 }
  0x85   : > { %4795 = vmatprep.subr.bf16.mxu0 %v5236_v18  ;;  %4801 = vmatprep.subr.bf16.mxu1 %v5236_v18 }
  0x8a   : > { %4786 = vmatmul.mubr.msk.bf16.vlgmr.msra.gmra.mrb[48].mxu0 %vm378_vm3, %v4326_v27  ;;  %4792 = vmatmul.mubr.msk.bf16.vlgmr.msra.gmra.mrb[48].mxu1 %vm378_vm3, %v4327_v28  ;;  %v2685_v27 = vrot.slane %v5161_v25, 1  ;;  %v5162_v28 = vld [vmem:[%s5317_s8 + $0x38] sm:$0x1e]   ;;  %v3505_v25 = vshll.u32 %v5169_v15, 16 }
  0x8b   : > { %4796 = vmatpush3.bf16.msra.mxu0 %v1594_v26  ;;  %4802 = vmatpush3.bf16.msra.mxu1 %v1594_v26 }
  0x8c   : > { %4797 = vmatprep.mubr.msk.bf16.mxu0 %vm5237_vm2, %v5236_v18  ;;  %4803 = vmatprep.mubr.msk.bf16.mxu1 %vm5237_vm2, %v5236_v18 }
  0x8d   : > { %4807 = vmatprep.subr.bf16.mxu0 %v5236_v18  ;;  %4813 = vmatprep.subr.bf16.mxu1 %v5236_v18 }
  0x92   : > { %4798 = vmatmul.mubr.msk.bf16.vlgmr.msra.gmra.mrb[52].mxu0 %vm378_vm3, %v4328_v29  ;;  %4804 = vmatmul.mubr.msk.bf16.vlgmr.msra.gmra.mrb[52].mxu1 %vm378_vm3, %v4329_v30  ;;  %v5163_v29 = vld [vmem:[%s5317_s8 + $0x40] sm:$0x1e]   ;;  %v4417_v30 = vld [vmem:[%s5322_s11 + $0x18] sm:$0xf] }
  0x93   : > { %4808 = vmatpush3.bf16.msra.mxu0 %v1594_v26  ;;  %4814 = vmatpush3.bf16.msra.mxu1 %v1594_v26  ;;  %v2850_v33 = vsel %vm382_vm1, %v4417_v30, 0 }
  0x94   : > { %4809 = vmatprep.mubr.msk.bf16.mxu0 %vm5237_vm2, %v5236_v18  ;;  %4815 = vmatprep.mubr.msk.bf16.mxu1 %vm5237_vm2, %v5236_v18 }
  0x95   : > { %4819 = vmatprep.subr.bf16.mxu0 %v5236_v18  ;;  %4825 = vmatprep.subr.bf16.mxu1 %v5236_v18 }
  0x9a   : > { %4810 = vmatmul.mubr.msk.bf16.vlgmr.msra.gmra.mrb[56].mxu0 %vm378_vm3, %v4330_v31  ;;  %4816 = vmatmul.mubr.msk.bf16.vlgmr.msra.gmra.mrb[56].mxu1 %vm378_vm3, %v4331_v32  ;;  %v2734_v31 = vrot.slane %v5162_v28, 1  ;;  %v2783_v32 = vrot.slane %v5163_v29, 1 }
  0x9b   : > { %4820 = vmatpush3.bf16.msra.mxu0 %v1594_v26  ;;  %4826 = vmatpush3.bf16.msra.mxu1 %v1594_v26  ;;  %v2636_v26 = vrot.slane %v5160_v24, 1 }
  0x9c   : > { %4821 = vmatprep.mubr.msk.bf16.mxu0 %vm5237_vm2, %v5236_v18  ;;  %4827 = vmatprep.mubr.msk.bf16.mxu1 %vm5237_vm2, %v5236_v18 }
  0x9d   : > { %4831 = vmatprep.subr.bf16.mxu0 %v5236_v18  ;;  %4837 = vmatprep.subr.bf16.mxu1 %v5236_v18 }
  0xa2   : > { %4822 = vmatmul.mubr.msk.bf16.vlgmr.msra.gmra.mrb[60].mxu0 %vm378_vm3, %v4332_v37  ;;  %4828 = vmatmul.mubr.msk.bf16.vlgmr.msra.gmra.mrb[60].mxu1 %vm378_vm3, %v4333_v39  ;;  %v4412_v37 = vld [vmem:[%s5317_s8 + $0x28] sm:$0xf]  ;;  %v4414_v39 = vld [vmem:[%s5317_s8 + $0x38] sm:$0xf] }
  0xa3   : > { %4832 = vmatpush3.bf16.msra.mxu0 %v1979_v40  ;;  %4838 = vmatpush3.bf16.msra.mxu1 %v1979_v40 }
  0xa4   : > { %4833 = vmatprep.mubr.msk.bf16.mxu0 %vm5237_vm2, %v5236_v18  ;;  %4839 = vmatprep.mubr.msk.bf16.mxu1 %vm5237_vm2, %v5236_v18 }
  0xa5   : > { %4843 = vmatprep.subr.bf16.mxu0 %v5236_v18  ;;  %4849 = vmatprep.subr.bf16.mxu1 %v5236_v18 }
  0xaa   : > { %4834 = vmatmul.mubr.msk.bf16.vlgmr.msra.gmra.mrb[64].mxu0 %vm378_vm3, %v1974_v47  ;;  %4840 = vmatmul.mubr.msk.bf16.vlgmr.msra.gmra.mrb[64].mxu1 %vm378_vm3, %v2032_v49  ;;  %v4415_v49 = vld [vmem:[%s5317_s8 + $0x40] sm:$0xf] }
  0xab   : > { %4844 = vmatpush3.bf16.msra.mxu0 %v1979_v40  ;;  %4850 = vmatpush3.bf16.msra.mxu1 %v1979_v40 }
  0xac   : > { %4845 = vmatprep.mubr.msk.bf16.mxu0 %vm5237_vm2, %v5236_v18  ;;  %4851 = vmatprep.mubr.msk.bf16.mxu1 %vm5237_vm2, %v5236_v18 }
  0xad   : > { %4855 = vmatprep.subr.bf16.mxu0 %v5236_v18  ;;  %4861 = vmatprep.subr.bf16.mxu1 %v5236_v18 }
  0xb2   : > { %4846 = vmatmul.mubr.msk.bf16.vlgmr.msra.gmra.mrb[68].mxu0 %vm378_vm3, %v2087_v57  ;;  %4852 = vmatmul.mubr.msk.bf16.vlgmr.msra.gmra.mrb[68].mxu1 %vm378_vm3, %v2142_v59  ;;  %v3283_v59 = vshrl.u32 %v5165_v41, 16 }
  0xb3   : > { %4856 = vmatpush3.bf16.msra.mxu0 %v1979_v40  ;;  %4862 = vmatpush3.bf16.msra.mxu1 %v1979_v40 }
  0xb4   : > { %4857 = vmatprep.mubr.msk.bf16.mxu0 %vm5237_vm2, %v5236_v18  ;;  %4863 = vmatprep.mubr.msk.bf16.mxu1 %vm5237_vm2, %v5236_v18 }
  0xb5   : > { %4867 = vmatprep.subr.bf16.mxu0 %v5236_v18  ;;  %4873 = vmatprep.subr.bf16.mxu1 %v5236_v18 }
  0xba   : > { %4858 = vmatmul.mubr.msk.bf16.vlgmr.msra.gmra.mrb[72].mxu0 %vm378_vm3, %v2197_v3  ;;  %4864 = vmatmul.mubr.msk.bf16.vlgmr.msra.gmra.mrb[72].mxu1 %vm378_vm3, %v2252_v5  ;;  %v3288_v5 = vor.u32 %v3287_v60, %v3283_v59 }
  0xbb   : > { %4868 = vmatpush3.bf16.msra.mxu0 %v1979_v40  ;;  %4874 = vmatpush3.bf16.msra.mxu1 %v1979_v40  ;;  %v5164_v40 = vld [vmem:[%s5317_s8 + $0x10] sm:$0x1f]  }
  0xbc   : > { %4869 = vmatprep.mubr.msk.bf16.mxu0 %vm5237_vm2, %v5236_v18  ;;  %4875 = vmatprep.mubr.msk.bf16.mxu1 %vm5237_vm2, %v5236_v18  ;;  %v3227_v46 = vshll.u32 %v5164_v40, 16  ;;  %v3225_v56 = vshrl.u32 %v5164_v40, 16 }
  0xbd   : > { %4879 = vmatprep.subr.bf16.mxu0 %v5236_v18  ;;  %4885 = vmatprep.subr.bf16.mxu1 %v5236_v18 }
  0xbe   : > { %v3229_v57 = vrot.slane %v3227_v46, 1 }
  0xc0   : > { %v3230_v1 = vor.u32 %v3229_v57, %v3225_v56 }
  0xc2   : > { %4870 = vmatmul.mubr.msk.bf16.vlgmr.msra.gmra.mrb[76].mxu0 %vm378_vm3, %v2307_v12  ;;  %4876 = vmatmul.mubr.msk.bf16.vlgmr.msra.gmra.mrb[76].mxu1 %vm378_vm3, %v2362_v13  ;;  %v5168_v12 = vld [vmem:[%s5317_s8 + $0x30] sm:$0x1f]   ;;  %v3393_v13 = vshrl.u32 %v5167_v61, 16 }
  0xc3   : > { %4880 = vmatpush3.bf16.msra.mxu0 %v2442_v14  ;;  %4886 = vmatpush3.bf16.msra.mxu1 %v2442_v14  ;;  %v3450_v21 = vshll.u32 %v5168_v12, 16  ;;  %v3448_v29 = vshrl.u32 %v5168_v12, 16 }
  0xc4   : > { %4881 = vmatprep.mubr.msk.bf16.mxu0 %vm5237_vm2, %v5236_v18  ;;  %4887 = vmatprep.mubr.msk.bf16.mxu1 %vm5237_vm2, %v5236_v18 }
  0xc5   : > { %4891 = vmatprep.subr.bf16.mxu0 %v5236_v18  ;;  %4897 = vmatprep.subr.bf16.mxu1 %v5236_v18  ;;  %v3452_v30 = vrot.slane %v3450_v21, 1 }
  0xca   : > { %4882 = vmatmul.mubr.msk.bf16.vlgmr.msra.gmra.mrb[80].mxu0 %vm378_vm3, %v2437_v17  ;;  %4888 = vmatmul.mubr.msk.bf16.vlgmr.msra.gmra.mrb[80].mxu1 %vm378_vm3, %v2489_v19 }
  0xcb   : > { %4892 = vmatpush3.bf16.msra.mxu0 %v2442_v14  ;;  %4898 = vmatpush3.bf16.msra.mxu1 %v2442_v14 }
  0xcc   : > { %4893 = vmatprep.mubr.msk.bf16.mxu0 %vm5237_vm2, %v5236_v18  ;;  %4899 = vmatprep.mubr.msk.bf16.mxu1 %vm5237_vm2, %v5236_v18 }
  0xcd   : > { %4903 = vmatprep.subr.bf16.mxu0 %v5236_v18  ;;  %4909 = vmatprep.subr.bf16.mxu1 %v5236_v18 }
  0xd2   : > { %4894 = vmatmul.mubr.msk.bf16.vlgmr.msra.gmra.mrb[84].mxu0 %vm378_vm3, %v2538_v22  ;;  %4900 = vmatmul.mubr.msk.bf16.vlgmr.msra.gmra.mrb[84].mxu1 %vm378_vm3, %v2587_v23 }
  0xd3   : > { %4904 = vmatpush3.bf16.msra.mxu0 %v2442_v14  ;;  %4910 = vmatpush3.bf16.msra.mxu1 %v2442_v14 }
  0xd4   : > { %4905 = vmatprep.mubr.msk.bf16.mxu0 %vm5237_vm2, %v5236_v18  ;;  %4911 = vmatprep.mubr.msk.bf16.mxu1 %vm5237_vm2, %v5236_v18 }
  0xd5   : > { %4915 = vmatprep.subr.bf16.mxu0 %v5236_v18  ;;  %4921 = vmatprep.subr.bf16.mxu1 %v5236_v18 }
  0xda   : > { %4906 = vmatmul.mubr.msk.bf16.vlgmr.msra.gmra.mrb[88].mxu0 %vm378_vm3, %v2636_v26  ;;  %4912 = vmatmul.mubr.msk.bf16.vlgmr.msra.gmra.mrb[88].mxu1 %vm378_vm3, %v2685_v27 }
  0xdb   : > { %4916 = vmatpush3.bf16.msra.mxu0 %v2442_v14  ;;  %4922 = vmatpush3.bf16.msra.mxu1 %v2442_v14  ;;  %v3397_v14 = vrot.slane %v3395_v6, 1 }
  0xdc   : > { %4917 = vmatprep.mubr.msk.bf16.mxu0 %vm5237_vm2, %v5236_v18  ;;  %4923 = vmatprep.mubr.msk.bf16.mxu1 %vm5237_vm2, %v5236_v18 }
  0xdd   : > { %4927 = vmatprep.subr.bf16.mxu0 %v5236_v18  ;;  %4933 = vmatprep.subr.bf16.mxu1 %v5236_v18  ;;  %v3398_v24 = vor.u32 %v3397_v14, %v3393_v13 }
  0xe2   : > { %4918 = vmatmul.mubr.msk.bf16.vlgmr.msra.gmra.mrb[92].mxu0 %vm378_vm3, %v2734_v31  ;;  %4924 = vmatmul.mubr.msk.bf16.vlgmr.msra.gmra.mrb[92].mxu1 %vm378_vm3, %v2783_v32  ;;  %v5170_v31 = vld [vmem:[%s5317_s8 + $0x40] sm:$0x1f]   ;;  %v3503_v32 = vshrl.u32 %v5169_v15, 16 }
  0xe3   : > { %4928 = vmatpush3.bf16.msra.mxu0 %v2850_v33  ;;  %4934 = vmatpush3.bf16.msra.mxu1 %v2850_v33 }
  0xe4   : > { %4929 = vmatprep.mubr.msk.bf16.mxu0 %vm5237_vm2, %v5236_v18  ;;  %4935 = vmatprep.mubr.msk.bf16.mxu1 %vm5237_vm2, %v5236_v18 }
  0xe5   : > { %4939 = vmatprep.subr.bf16.mxu0 %v5236_v18  ;;  %4945 = vmatprep.subr.bf16.mxu1 %v5236_v18 }
  0xea   : > { %4930 = vmatmul.mubr.msk.bf16.vlgmr.msra.gmra.mrb[96].mxu0 %vm378_vm3, %v4409_v34  ;;  %4936 = vmatmul.mubr.msk.bf16.vlgmr.msra.gmra.mrb[96].mxu1 %vm378_vm3, %v4410_v35  ;;  %v5171_v34 = vld [vmem:[%s5317_s8 + $0x48] sm:$0x1f]  }
  0xeb   : > { %4940 = vmatpush3.bf16.msra.mxu0 %v2850_v33  ;;  %4946 = vmatpush3.bf16.msra.mxu1 %v2850_v33 }
  0xec   : > { %4941 = vmatprep.mubr.msk.bf16.mxu0 %vm5237_vm2, %v5236_v18  ;;  %4947 = vmatprep.mubr.msk.bf16.mxu1 %vm5237_vm2, %v5236_v18 }
  0xed   : > { %4951 = vmatprep.subr.bf16.mxu0 %v5236_v18  ;;  %4957 = vmatprep.subr.bf16.mxu1 %v5236_v18 }
  0xf2   : > { %4942 = vmatmul.mubr.msk.bf16.vlgmr.msra.gmra.mrb[100].mxu0 %vm378_vm3, %v4411_v36  ;;  %4948 = vmatmul.mubr.msk.bf16.vlgmr.msra.gmra.mrb[100].mxu1 %vm378_vm3, %v4412_v37 }
  0xf3   : > { %4952 = vmatpush3.bf16.msra.mxu0 %v2850_v33  ;;  %4958 = vmatpush3.bf16.msra.mxu1 %v2850_v33 }
  0xf4   : > { %4953 = vmatprep.mubr.msk.bf16.mxu0 %vm5237_vm2, %v5236_v18  ;;  %4959 = vmatprep.mubr.msk.bf16.mxu1 %vm5237_vm2, %v5236_v18 }
  0xf5   : > { %4963 = vmatprep.subr.bf16.mxu0 %v5236_v18  ;;  %4969 = vmatprep.subr.bf16.mxu1 %v5236_v18 }
  0xfa   : > { %4954 = vmatmul.mubr.msk.bf16.vlgmr.msra.gmra.mrb[104].mxu0 %vm378_vm3, %v4413_v38  ;;  %4960 = vmatmul.mubr.msk.bf16.vlgmr.msra.gmra.mrb[104].mxu1 %vm378_vm3, %v4414_v39  ;;  %v3453_v38 = vor.u32 %v3452_v30, %v3448_v29  ;;  %v3560_v39 = vshll.u32 %v5170_v31, 16 }
  0xfb   : > { %4964 = vmatpush3.bf16.msra.mxu0 %v2850_v33  ;;  %4970 = vmatpush3.bf16.msra.mxu1 %v2850_v33  ;;  %v3507_v33 = vrot.slane %v3505_v25, 1 }
  0xfc   : > { %4965 = vmatprep.mubr.msk.bf16.mxu0 %vm5237_vm2, %v5236_v18  ;;  %4971 = vmatprep.mubr.msk.bf16.mxu1 %vm5237_vm2, %v5236_v18  ;;  %v3562_v50 = vrot.slane %v3560_v39, 1 }
  0xfd   : > { %v5645_v42 = vpop.f32.mrb[0].mxu0  ;;  %4975 = vmatprep.subr.bf16.mxu0 %v5236_v18  ;;  %v5651_v44 = vpop.f32.mrb[0].mxu1  ;;  %4981 = vmatprep.subr.bf16.mxu1 %v5236_v18  ;;  %v3508_v43 = vor.u32 %v3507_v33, %v3503_v32  ;;  %v5176_v32 = vld [vmem:[%s5317_s8 + $0x30] sm:$0x1e]  }
  0xfe   : > { %v4643_v45 = vpop.f32.mrb[1].mxu0  ;;  %v4649_v47 = vpop.f32.mrb[1].mxu1 }
  0xff   : > { %v423_v48 = vpop.f32.mrb[2].mxu0  ;;  %v478_v51 = vpop.f32.mrb[2].mxu1  ;;  %v3615_v45 = vshll.u32 %v5171_v34, 16 }
 0x100   : > { %v4644_v52 = vpop.f32.mrb[3].mxu0  ;;  %v4650_v55 = vpop.f32.mrb[3].mxu1  ;;  %v3613_v51 = vshrl.u32 %v5171_v34, 16 }
 0x101   : > { %v3617_v52 = vrot.slane %v3615_v45, 1  ;;  %v4475_v55 = vld [vmem:[%s5322_s11 + $0x20] sm:$0xf] }
 0x102   : > { %4966 = vmatmul.mubr.msk.bf16.vlgmr.msra.gmra.mrb[108].mxu0 %vm378_vm3, %v4415_v49  ;;  %4972 = vmatmul.mubr.msk.bf16.vlgmr.msra.gmra.mrb[108].mxu1 %vm378_vm3, %v4416_v53  ;;  %v3558_v49 = vshrl.u32 %v5170_v31, 16 }
 0x103   : > { %4976 = vmatpush3.bf16.msra.mxu0 %v5657_v54  ;;  %4982 = vmatpush3.bf16.msra.mxu1 %v5657_v54 }
 0x104   : > { %4977 = vmatprep.mubr.msk.bf16.mxu0 %vm5237_vm2, %v5236_v18  ;;  %4983 = vmatprep.mubr.msk.bf16.mxu1 %vm5237_vm2, %v5236_v18 }
 0x105   : > { %v5667_v62 = vpop.f32.mrb[4].mxu0  ;;  %4987 = vmatprep.subr.bf16.mxu0 %v5236_v18  ;;  %v5672_v63 = vpop.f32.mrb[4].mxu1  ;;  %4993 = vmatprep.subr.bf16.mxu1 %v5236_v18 }
 0x106   : > { %v4655_v0 = vpop.f32.mrb[5].mxu0  ;;  %v4661_v3 = vpop.f32.mrb[5].mxu1 }
 0x107   : > { %v533_v4 = vpop.f32.mrb[6].mxu0  ;;  %v588_v7 = vpop.f32.mrb[6].mxu1  ;;  %v3618_v0 = vor.u32 %v3617_v52, %v3613_v51  ;;  %v5725_v3 = vsel %vm382_vm1, %v4475_v55, 0 }
 0x108   : > { %v4656_v8 = vpop.f32.mrb[7].mxu0  ;;  %v4662_v9 = vpop.f32.mrb[7].mxu1 }
 0x10a   : > { %4978 = vmatmul.mubr.msk.bf16.vlgmr.msra.gmra.mrb[112].mxu0 %vm378_vm3, %v3230_v1  ;;  %4984 = vmatmul.mubr.msk.bf16.vlgmr.msra.gmra.mrb[112].mxu1 %vm378_vm3, %v3288_v5  ;;  %v5173_v5 = vld [vmem:[%s5317_s8 + $0x18] sm:$0x1e]  }
 0x10b   : > { %4988 = vmatpush3.bf16.msra.mxu0 %v5657_v54  ;;  %4994 = vmatpush3.bf16.msra.mxu1 %v5657_v54  ;;  %v3745_v13 = vrot.slane %v5173_v5, 1 }
 0x10c   : > { %4989 = vmatprep.mubr.msk.bf16.mxu0 %vm5237_vm2, %v5236_v18  ;;  %4995 = vmatprep.mubr.msk.bf16.mxu1 %vm5237_vm2, %v5236_v18 }
 0x10d   : > { %v5683_v16 = vpop.f32.mrb[8].mxu0  ;;  %4999 = vmatprep.subr.bf16.mxu0 %v5236_v18  ;;  %v5688_v17 = vpop.f32.mrb[8].mxu1  ;;  %5005 = vmatprep.subr.bf16.mxu1 %v5236_v18 }
 0x10e   : > { %v4667_v19 = vpop.f32.mrb[9].mxu0  ;;  %v4673_v22 = vpop.f32.mrb[9].mxu1 }
 0x10f   : > { %v643_v23 = vpop.f32.mrb[10].mxu0  ;;  %v698_v26 = vpop.f32.mrb[10].mxu1 }
 0x110   : > { %v4668_v27 = vpop.f32.mrb[11].mxu0  ;;  %v4674_v28 = vpop.f32.mrb[11].mxu1 }
 0x112   : > { %4990 = vmatmul.mubr.msk.bf16.vlgmr.msra.gmra.mrb[116].mxu0 %vm378_vm3, %v3343_v20  ;;  %4996 = vmatmul.mubr.msk.bf16.vlgmr.msra.gmra.mrb[116].mxu1 %vm378_vm3, %v3398_v24  ;;  %v5174_v20 = vld [vmem:[%s5317_s8 + $0x20] sm:$0x1e]  }
 0x113   : > { %5000 = vmatpush3.bf16.msra.mxu0 %v5657_v54  ;;  %5006 = vmatpush3.bf16.msra.mxu1 %v5657_v54  ;;  %v3794_v24 = vrot.slane %v5174_v20, 1 }
 0x114   : > { %5001 = vmatprep.mubr.msk.bf16.mxu0 %vm5237_vm2, %v5236_v18  ;;  %5007 = vmatprep.mubr.msk.bf16.mxu1 %vm5237_vm2, %v5236_v18 }
 0x115   : > { %v5699_v35 = vpop.f32.mrb[12].mxu0  ;;  %5011 = vmatprep.subr.bf16.mxu0 %v5236_v18  ;;  %v5704_v36 = vpop.f32.mrb[12].mxu1  ;;  %5017 = vmatprep.subr.bf16.mxu1 %v5236_v18 }
 0x116   : > { %v4679_v37 = vpop.f32.mrb[13].mxu0  ;;  %v4685_v40 = vpop.f32.mrb[13].mxu1 }
 0x117   : > { %v753_v41 = vpop.f32.mrb[14].mxu0  ;;  %v808_v46 = vpop.f32.mrb[14].mxu1 }
 0x118   : > { %v4680_v47 = vpop.f32.mrb[15].mxu0  ;;  %v4686_v48 = vpop.f32.mrb[15].mxu1 }
 0x119   : > { %v5178_v48 = vld [vmem:[%s5317_s8 + $0x40] sm:$0x1e]  }
 0x11a   : > { %5002 = vmatmul.mubr.msk.bf16.vlgmr.msra.gmra.mrb[120].mxu0 %vm378_vm3, %v3453_v38  ;;  %5008 = vmatmul.mubr.msk.bf16.vlgmr.msra.gmra.mrb[120].mxu1 %vm378_vm3, %v3508_v43  ;;  %v3892_v38 = vrot.slane %v5176_v32, 1  ;;  %v3990_v52 = vrot.slane %v5178_v48, 1 }
 0x11b   : > { %5012 = vmatpush3.bf16.msra.mxu0 %v5657_v54  ;;  %5018 = vmatpush3.bf16.msra.mxu1 %v5657_v54  ;;  %v3563_v54 = vor.u32 %v3562_v50, %v3558_v49 }
 0x11c   : > { %5013 = vmatprep.mubr.msk.bf16.mxu0 %vm5237_vm2, %v5236_v18  ;;  %5019 = vmatprep.mubr.msk.bf16.mxu1 %vm5237_vm2, %v5236_v18 }
 0x11d   : > { %v851_v53 = vpop.f32.mrb[16].mxu0  ;;  %5023 = vmatprep.subr.bf16.mxu0 %v5236_v18  ;;  %v894_v57 = vpop.f32.mrb[16].mxu1  ;;  %5029 = vmatprep.subr.bf16.mxu1 %v5236_v18 }
 0x11e   : > { %v5718_v56 = vadd.f32 %v851_v53, %v5645_v42  ;;  %v4691_v58 = vpop.f32.mrb[17].mxu0  ;;  %v5722_v59 = vadd.f32 %v894_v57, %v5651_v44  ;;  %v4697_v60 = vpop.f32.mrb[17].mxu1  ;;  %v5172_v42 = vld [vmem:[%s5317_s8 + $0x10] sm:$0x1e]  }
 0x11f   : > { %v854_v61 = vpop.f32.mrb[18].mxu0  ;;  %v897_v1 = vpop.f32.mrb[18].mxu1  ;;  %v3693_v9 = vrot.slane %v5172_v42, 1 }
 0x120   : > { %v4692_v2 = vpop.f32.mrb[19].mxu0  ;;  %v4698_v4 = vpop.f32.mrb[19].mxu1 }
 0x122   : > { %5014 = vmatmul.mubr.msk.bf16.vlgmr.msra.gmra.mrb[124].mxu0 %vm378_vm3, %v3563_v54  ;;  %5020 = vmatmul.mubr.msk.bf16.vlgmr.msra.gmra.mrb[124].mxu1 %vm378_vm3, %v3618_v0 }
 0x123   : > { %5024 = vmatpush3.bf16.msra.mxu0 %v5725_v3  ;;  %5030 = vmatpush3.bf16.msra.mxu1 %v5725_v3 }
 0x124   : > { %5025 = vmatprep.mubr.msk.bf16.mxu0 %vm5237_vm2, %v5236_v18  ;;  %5031 = vmatprep.mubr.msk.bf16.mxu1 %vm5237_vm2, %v5236_v18 }
 0x125   : > { %v937_v44 = vpop.f32.mrb[20].mxu0  ;;  %5035 = vmatprep.subr.bf16.mxu0 %v5236_v18  ;;  %v980_v7 = vpop.f32.mrb[20].mxu1  ;;  %5041 = vmatprep.subr.bf16.mxu1 %v5236_v18 }
 0x126   : > { %v5739_v6 = vadd.f32 %v937_v44, %v5667_v62  ;;  %v4703_v8 = vpop.f32.mrb[21].mxu0  ;;  %v5743_v10 = vadd.f32 %v980_v7, %v5672_v63  ;;  %v4709_v11 = vpop.f32.mrb[21].mxu1  ;;  %v5175_v62 = vld [vmem:[%s5317_s8 + $0x28] sm:$0x1e]  }
 0x127   : > { %v940_v12 = vpop.f32.mrb[22].mxu0  ;;  %v983_v14 = vpop.f32.mrb[22].mxu1  ;;  %v3843_v28 = vrot.slane %v5175_v62, 1 }
 0x128   : > { %v4704_v15 = vpop.f32.mrb[23].mxu0  ;;  %v4710_v19 = vpop.f32.mrb[23].mxu1 }
 0x12a   : > { %5026 = vmatmul.mubr.msk.bf16.vlgmr.msra.gmra.mrb[128].mxu0 %vm378_vm3, %v3693_v9  ;;  %5032 = vmatmul.mubr.msk.bf16.vlgmr.msra.gmra.mrb[128].mxu1 %vm378_vm3, %v3745_v13 }
 0x12b   : > { %5036 = vmatpush3.bf16.msra.mxu0 %v5725_v3  ;;  %5042 = vmatpush3.bf16.msra.mxu1 %v5725_v3 }
 0x12c   : > { %5037 = vmatprep.mubr.msk.bf16.mxu0 %vm5237_vm2, %v5236_v18  ;;  %5043 = vmatprep.mubr.msk.bf16.mxu1 %vm5237_vm2, %v5236_v18 }
 0x12d   : > { %v1023_v63 = vpop.f32.mrb[24].mxu0  ;;  %5047 = vmatprep.subr.bf16.mxu0 %v5236_v18  ;;  %v1066_v22 = vpop.f32.mrb[24].mxu1  ;;  %5053 = vmatprep.subr.bf16.mxu1 %v5236_v18 }
 0x12e   : > { %v5757_v21 = vadd.f32 %v1023_v63, %v5683_v16  ;;  %v4715_v23 = vpop.f32.mrb[25].mxu0  ;;  %v5761_v25 = vadd.f32 %v1066_v22, %v5688_v17  ;;  %v4721_v26 = vpop.f32.mrb[25].mxu1  ;;  %v5177_v16 = vld [vmem:[%s5317_s8 + $0x38] sm:$0x1e]  }
 0x12f   : > { %v1026_v27 = vpop.f32.mrb[26].mxu0  ;;  %v1069_v29 = vpop.f32.mrb[26].mxu1  ;;  %v3941_v43 = vrot.slane %v5177_v16, 1 }
 0x130   : > { %v4716_v30 = vpop.f32.mrb[27].mxu0  ;;  %v4722_v31 = vpop.f32.mrb[27].mxu1 }
 0x132   : > { %5038 = vmatmul.mubr.msk.bf16.vlgmr.msra.gmra.mrb[132].mxu0 %vm378_vm3, %v3794_v24  ;;  %5044 = vmatmul.mubr.msk.bf16.vlgmr.msra.gmra.mrb[132].mxu1 %vm378_vm3, %v3843_v28 }
 0x133   : > { %5048 = vmatpush3.bf16.msra.mxu0 %v5725_v3  ;;  %5054 = vmatpush3.bf16.msra.mxu1 %v5725_v3 }
 0x134   : > { %5049 = vmatprep.mubr.msk.bf16.mxu0 %vm5237_vm2, %v5236_v18  ;;  %5055 = vmatprep.mubr.msk.bf16.mxu1 %vm5237_vm2, %v5236_v18 }
 0x135   : > { %v1109_v17 = vpop.f32.mrb[28].mxu0  ;;  %5059 = vmatprep.subr.bf16.mxu0 %v5236_v18  ;;  %v1152_v34 = vpop.f32.mrb[28].mxu1  ;;  %5065 = vmatprep.subr.bf16.mxu1 %v5236_v18 }
 0x136   : > { %v1110_v33 = vadd.f32 %v1109_v17, %v5699_v35  ;;  %v4727_v37 = vpop.f32.mrb[29].mxu0  ;;  %v1153_v39 = vadd.f32 %v1152_v34, %v5704_v36  ;;  %v4733_v40 = vpop.f32.mrb[29].mxu1  ;;  %v5179_v35 = vld [vmem:[%s5317_s8 + $0x48] sm:$0x1e]  }
 0x137   : > { %v1112_v41 = vpop.f32.mrb[30].mxu0  ;;  %v1155_v45 = vpop.f32.mrb[30].mxu1  ;;  %v4039_v58 = vrot.slane %v5179_v35, 1 }
 0x138   : > { %v4728_v46 = vpop.f32.mrb[31].mxu0  ;;  %v4734_v47 = vpop.f32.mrb[31].mxu1 }
 0x13a   : > { %5050 = vmatmul.mubr.msk.bf16.vlgmr.msra.gmra.mrb[136].mxu0 %vm378_vm3, %v3892_v38  ;;  %5056 = vmatmul.mubr.msk.bf16.vlgmr.msra.gmra.mrb[136].mxu1 %vm378_vm3, %v3941_v43 }
 0x13b   : > { %5060 = vmatpush3.bf16.msra.mxu0 %v5725_v3  ;;  %5066 = vmatpush3.bf16.msra.mxu1 %v5725_v3 }
 0x13c   : > { %5061 = vmatprep.mubr.msk.bf16.mxu0 %vm5237_vm2, %v5236_v18  ;;  %5067 = vmatprep.mubr.msk.bf16.mxu1 %vm5237_vm2, %v5236_v18 }
 0x13d   : > { %v1222_v36 = vpop.f32.mrb[32].mxu0  ;;  %v1271_v50 = vpop.f32.mrb[32].mxu1 }
 0x13e   : > { %v1571_v49 = vadd.f32 %v1222_v36, %v5718_v56  ;;  %v4739_v51 = vpop.f32.mrb[33].mxu0  ;;  %v1572_v53 = vadd.f32 %v1271_v50, %v5722_v59  ;;  %v4745_v55 = vpop.f32.mrb[33].mxu1 }
 0x13f   : > { %v1225_v57 = vpop.f32.mrb[34].mxu0  ;;  %v1274_v54 = vpop.f32.mrb[34].mxu1 }
 0x140   : > { %v4740_v60 = vpop.f32.mrb[35].mxu0  ;;  %v4746_v61 = vpop.f32.mrb[35].mxu1 }
 0x142   : > { %5062 = vmatmul.mubr.msk.bf16.vlgmr.msra.gmra.mrb[140].mxu0 %vm378_vm3, %v3990_v52  ;;  %5068 = vmatmul.mubr.msk.bf16.vlgmr.msra.gmra.mrb[140].mxu1 %vm378_vm3, %v4039_v58 }
 0x145   : > { %v1320_v0 = vpop.f32.mrb[36].mxu0  ;;  %v1369_v1 = vpop.f32.mrb[36].mxu1 }
 0x146   : > { %v1573_v18 = vadd.f32 %v1320_v0, %v5739_v6  ;;  %v4751_v56 = vpop.f32.mrb[37].mxu0  ;;  %v1574_v2 = vadd.f32 %v1369_v1, %v5743_v10  ;;  %v4757_v3 = vpop.f32.mrb[37].mxu1 }
 0x147   : > { %v1323_v4 = vpop.f32.mrb[38].mxu0  ;;  %v1372_v59 = vpop.f32.mrb[38].mxu1 }
 0x148   : > { %v4752_v42 = vpop.f32.mrb[39].mxu0  ;;  %v4758_v5 = vpop.f32.mrb[39].mxu1 }
 0x14d   : > { %v1418_v44 = vpop.f32.mrb[40].mxu0  ;;  %v1467_v8 = vpop.f32.mrb[40].mxu1 }
 0x14e   : > { %v1575_v7 = vadd.f32 %v1418_v44, %v5757_v21  ;;  %v4763_v9 = vpop.f32.mrb[41].mxu0  ;;  %v1576_v11 = vadd.f32 %v1467_v8, %v5761_v25  ;;  %v4769_v12 = vpop.f32.mrb[41].mxu1 }
 0x14f   : > { %v1421_v13 = vpop.f32.mrb[42].mxu0  ;;  %v1470_v14 = vpop.f32.mrb[42].mxu1 }
 0x150   : > { %v4764_v6 = vpop.f32.mrb[43].mxu0  ;;  %v4770_v15 = vpop.f32.mrb[43].mxu1 }
 0x155   : > { %v1516_v19 = vpop.f32.mrb[44].mxu0  ;;  %v1565_v10 = vpop.f32.mrb[44].mxu1 }
 0x156   : > { %v1577_v20 = vadd.f32 %v1516_v19, %v1110_v33  ;;  %v4775_v62 = vpop.f32.mrb[45].mxu0  ;;  %v1578_v63 = vadd.f32 %v1565_v10, %v1153_v39  ;;  %v4781_v22 = vpop.f32.mrb[45].mxu1 }
 0x157   : > { %v1519_v23 = vpop.f32.mrb[46].mxu0  ;;  %v1568_v24 = vpop.f32.mrb[46].mxu1 }
 0x158   : > { %v4776_v26 = vpop.f32.mrb[47].mxu0  ;;  %v4782_v27 = vpop.f32.mrb[47].mxu1 }
 0x15d   : > { %v1630_v21 = vpop.f32.mrb[48].mxu0  ;;  %v1673_v29 = vpop.f32.mrb[48].mxu1 }
 0x15e   : > { %v1937_v28 = vadd.f32 %v1630_v21, %v1571_v49  ;;  %v4787_v30 = vpop.f32.mrb[49].mxu0  ;;  %v1938_v25 = vadd.f32 %v1673_v29, %v1572_v53  ;;  %v4793_v31 = vpop.f32.mrb[49].mxu1 }
 0x15f   : > { %v1633_v32 = vpop.f32.mrb[50].mxu0  ;;  %v1676_v16 = vpop.f32.mrb[50].mxu1 }
 0x160   : > { %v4788_v17 = vpop.f32.mrb[51].mxu0  ;;  %v4794_v34 = vpop.f32.mrb[51].mxu1 }
 0x165   : > { %v1716_v37 = vpop.f32.mrb[52].mxu0  ;;  %v1759_v38 = vpop.f32.mrb[52].mxu1 }
 0x166   : > { %v1939_v33 = vadd.f32 %v1716_v37, %v1573_v18  ;;  %v4799_v40 = vpop.f32.mrb[53].mxu0  ;;  %v1940_v39 = vadd.f32 %v1759_v38, %v1574_v2  ;;  %v4805_v41 = vpop.f32.mrb[53].mxu1 }
 0x167   : > { %v1719_v43 = vpop.f32.mrb[54].mxu0  ;;  %v1762_v45 = vpop.f32.mrb[54].mxu1 }
 0x168   : > { %v4800_v46 = vpop.f32.mrb[55].mxu0  ;;  %v4806_v47 = vpop.f32.mrb[55].mxu1 }
 0x16d   : > { %v1802_v48 = vpop.f32.mrb[56].mxu0  ;;  %v1845_v36 = vpop.f32.mrb[56].mxu1 }
 0x16e   : > { %v1941_v35 = vadd.f32 %v1802_v48, %v1575_v7  ;;  %v4811_v49 = vpop.f32.mrb[57].mxu0  ;;  %v1942_v50 = vadd.f32 %v1845_v36, %v1576_v11  ;;  %v4817_v51 = vpop.f32.mrb[57].mxu1 }
 0x16f   : > { %v1805_v52 = vpop.f32.mrb[58].mxu0  ;;  %v1848_v53 = vpop.f32.mrb[58].mxu1 }
 0x170   : > { %v4812_v55 = vpop.f32.mrb[59].mxu0  ;;  %v4818_v57 = vpop.f32.mrb[59].mxu1 }
 0x175   : > { %v1888_v58 = vpop.f32.mrb[60].mxu0  ;;  %v1931_v60 = vpop.f32.mrb[60].mxu1 }
 0x176   : > { %v1943_v54 = vadd.f32 %v1888_v58, %v1577_v20  ;;  %v4823_v61 = vpop.f32.mrb[61].mxu0  ;;  %v1944_v0 = vadd.f32 %v1931_v60, %v1578_v63  ;;  %v4829_v18 = vpop.f32.mrb[61].mxu1 }
 0x177   : > { %v1891_v1 = vpop.f32.mrb[62].mxu0  ;;  %v1934_v56 = vpop.f32.mrb[62].mxu1 }
 0x178   : > { %v4824_v2 = vpop.f32.mrb[63].mxu0  ;;  %v4830_v3 = vpop.f32.mrb[63].mxu1 }
 0x17d   : > { %v2015_v4 = vpop.f32.mrb[64].mxu0  ;;  %v2070_v42 = vpop.f32.mrb[64].mxu1 }
 0x17e   : > { %v2406_v59 = vadd.f32 %v2015_v4, %v1937_v28  ;;  %v4835_v5 = vpop.f32.mrb[65].mxu0  ;;  %v2407_v44 = vadd.f32 %v2070_v42, %v1938_v25  ;;  %v4841_v7 = vpop.f32.mrb[65].mxu1 }
 0x17f   : > { %v2018_v8 = vpop.f32.mrb[66].mxu0  ;;  %v2073_v9 = vpop.f32.mrb[66].mxu1 }
 0x180   : > { %v4836_v11 = vpop.f32.mrb[67].mxu0  ;;  %v4842_v12 = vpop.f32.mrb[67].mxu1 }
 0x185   : > { %v2125_v13 = vpop.f32.mrb[68].mxu0  ;;  %v2180_v6 = vpop.f32.mrb[68].mxu1 }
 0x186   : > { %v2408_v14 = vadd.f32 %v2125_v13, %v1939_v33  ;;  %v4847_v15 = vpop.f32.mrb[69].mxu0  ;;  %v2409_v19 = vadd.f32 %v2180_v6, %v1940_v39  ;;  %v4853_v20 = vpop.f32.mrb[69].mxu1 }
 0x187   : > { %v2128_v10 = vpop.f32.mrb[70].mxu0  ;;  %v2183_v62 = vpop.f32.mrb[70].mxu1 }
 0x188   : > { %v4848_v63 = vpop.f32.mrb[71].mxu0  ;;  %v4854_v22 = vpop.f32.mrb[71].mxu1 }
 0x18d   : > { %v2235_v23 = vpop.f32.mrb[72].mxu0  ;;  %v2290_v26 = vpop.f32.mrb[72].mxu1 }
 0x18e   : > { %v2410_v24 = vadd.f32 %v2235_v23, %v1941_v35  ;;  %v4859_v27 = vpop.f32.mrb[73].mxu0  ;;  %v2411_v21 = vadd.f32 %v2290_v26, %v1942_v50  ;;  %v4865_v28 = vpop.f32.mrb[73].mxu1 }
 0x18f   : > { %v2238_v29 = vpop.f32.mrb[74].mxu0  ;;  %v2293_v30 = vpop.f32.mrb[74].mxu1 }
 0x190   : > { %v4860_v25 = vpop.f32.mrb[75].mxu0  ;;  %v4866_v31 = vpop.f32.mrb[75].mxu1 }
 0x195   : > { %v2345_v32 = vpop.f32.mrb[76].mxu0  ;;  %v2400_v17 = vpop.f32.mrb[76].mxu1 }
 0x196   : > { %v2412_v16 = vadd.f32 %v2345_v32, %v1943_v54  ;;  %v4871_v34 = vpop.f32.mrb[77].mxu0  ;;  %v2413_v37 = vadd.f32 %v2400_v17, %v1944_v0  ;;  %v4877_v33 = vpop.f32.mrb[77].mxu1 }
 0x197   : > { %v2348_v38 = vpop.f32.mrb[78].mxu0  ;;  %v2403_v40 = vpop.f32.mrb[78].mxu1 }
 0x198   : > { %v4872_v39 = vpop.f32.mrb[79].mxu0  ;;  %v4878_v41 = vpop.f32.mrb[79].mxu1 }
 0x19d   : > { %v2478_v43 = vpop.f32.mrb[80].mxu0  ;;  %v2527_v46 = vpop.f32.mrb[80].mxu1 }
 0x19e   : > { %v2827_v45 = vadd.f32 %v2478_v43, %v2406_v59  ;;  %v4883_v47 = vpop.f32.mrb[81].mxu0  ;;  %v2828_v48 = vadd.f32 %v2527_v46, %v2407_v44  ;;  %v4889_v35 = vpop.f32.mrb[81].mxu1 }
 0x19f   : > { %v2481_v36 = vpop.f32.mrb[82].mxu0  ;;  %v2530_v49 = vpop.f32.mrb[82].mxu1 }
 0x1a0   : > { %v4884_v50 = vpop.f32.mrb[83].mxu0  ;;  %v4890_v51 = vpop.f32.mrb[83].mxu1 }
 0x1a5   : > { %v2576_v52 = vpop.f32.mrb[84].mxu0  ;;  %v2625_v55 = vpop.f32.mrb[84].mxu1 }
 0x1a6   : > { %v2829_v53 = vadd.f32 %v2576_v52, %v2408_v14  ;;  %v4895_v57 = vpop.f32.mrb[85].mxu0  ;;  %v2830_v58 = vadd.f32 %v2625_v55, %v2409_v19  ;;  %v4901_v54 = vpop.f32.mrb[85].mxu1 }
 0x1a7   : > { %v2579_v60 = vpop.f32.mrb[86].mxu0  ;;  %v2628_v61 = vpop.f32.mrb[86].mxu1 }
 0x1a8   : > { %v4896_v0 = vpop.f32.mrb[87].mxu0  ;;  %v4902_v18 = vpop.f32.mrb[87].mxu1 }
 0x1ad   : > { %v2674_v1 = vpop.f32.mrb[88].mxu0  ;;  %v2723_v2 = vpop.f32.mrb[88].mxu1 }
 0x1ae   : > { %v2831_v56 = vadd.f32 %v2674_v1, %v2410_v24  ;;  %v4907_v3 = vpop.f32.mrb[89].mxu0  ;;  %v2832_v4 = vadd.f32 %v2723_v2, %v2411_v21  ;;  %v4913_v59 = vpop.f32.mrb[89].mxu1 }
 0x1af   : > { %v2677_v42 = vpop.f32.mrb[90].mxu0  ;;  %v2726_v5 = vpop.f32.mrb[90].mxu1 }
 0x1b0   : > { %v4908_v44 = vpop.f32.mrb[91].mxu0  ;;  %v4914_v7 = vpop.f32.mrb[91].mxu1 }
 0x1b5   : > { %v2772_v8 = vpop.f32.mrb[92].mxu0  ;;  %v2821_v11 = vpop.f32.mrb[92].mxu1 }
 0x1b6   : > { %v2833_v9 = vadd.f32 %v2772_v8, %v2412_v16  ;;  %v4919_v12 = vpop.f32.mrb[93].mxu0  ;;  %v2834_v13 = vadd.f32 %v2821_v11, %v2413_v37  ;;  %v4925_v14 = vpop.f32.mrb[93].mxu1 }
 0x1b7   : > { %v2775_v6 = vpop.f32.mrb[94].mxu0  ;;  %v2824_v15 = vpop.f32.mrb[94].mxu1 }
 0x1b8   : > { %v4920_v19 = vpop.f32.mrb[95].mxu0  ;;  %v4926_v20 = vpop.f32.mrb[95].mxu1 }
 0x1bd   : > { %v2886_v10 = vpop.f32.mrb[96].mxu0  ;;  %v2929_v63 = vpop.f32.mrb[96].mxu1 }
 0x1be   : > { %v3193_v62 = vadd.f32 %v2886_v10, %v2827_v45  ;;  %v4931_v22 = vpop.f32.mrb[97].mxu0  ;;  %v3194_v23 = vadd.f32 %v2929_v63, %v2828_v48  ;;  %v4937_v24 = vpop.f32.mrb[97].mxu1 }
 0x1bf   : > { %v2889_v26 = vpop.f32.mrb[98].mxu0  ;;  %v2932_v27 = vpop.f32.mrb[98].mxu1 }
 0x1c0   : > { %v4932_v21 = vpop.f32.mrb[99].mxu0  ;;  %v4938_v28 = vpop.f32.mrb[99].mxu1 }
 0x1c5   : > { %v2972_v29 = vpop.f32.mrb[100].mxu0  ;;  %v3015_v25 = vpop.f32.mrb[100].mxu1 }
 0x1c6   : > { %v3195_v30 = vadd.f32 %v2972_v29, %v2829_v53  ;;  %v4943_v31 = vpop.f32.mrb[101].mxu0  ;;  %v3196_v32 = vadd.f32 %v3015_v25, %v2830_v58  ;;  %v4949_v16 = vpop.f32.mrb[101].mxu1 }
 0x1c7   : > { %v2975_v17 = vpop.f32.mrb[102].mxu0  ;;  %v3018_v34 = vpop.f32.mrb[102].mxu1 }
 0x1c8   : > { %v4944_v37 = vpop.f32.mrb[103].mxu0  ;;  %v4950_v33 = vpop.f32.mrb[103].mxu1  ;;  %v4091_v34 = vld [vmem:[#allocation2] sm:$0xff] }
 0x1cd   : > { %v3058_v38 = vpop.f32.mrb[104].mxu0  ;;  %v3101_v39 = vpop.f32.mrb[104].mxu1 }
 0x1ce   : > { %v3197_v40 = vadd.f32 %v3058_v38, %v2831_v56  ;;  %v4955_v41 = vpop.f32.mrb[105].mxu0  ;;  %v3198_v43 = vadd.f32 %v3101_v39, %v2832_v4  ;;  %v4961_v45 = vpop.f32.mrb[105].mxu1  ;;  %v4092_v38 = vld [vmem:[#allocation2 + $0x8] sm:$0xff] }
 0x1cf   : > { %v3061_v46 = vpop.f32.mrb[106].mxu0  ;;  %v3104_v47 = vpop.f32.mrb[106].mxu1 }
 0x1d0   : > { %v4956_v48 = vpop.f32.mrb[107].mxu0  ;;  %v4962_v35 = vpop.f32.mrb[107].mxu1 }
 0x1d5   : > { %v3144_v36 = vpop.f32.mrb[108].mxu0  ;;  %v3187_v50 = vpop.f32.mrb[108].mxu1 }
 0x1d6   : > { %v3199_v49 = vadd.f32 %v3144_v36, %v2833_v9  ;;  %v4967_v51 = vpop.f32.mrb[109].mxu0  ;;  %v3200_v52 = vadd.f32 %v3187_v50, %v2834_v13  ;;  %v4973_v53 = vpop.f32.mrb[109].mxu1 }
 0x1d7   : > { %v3147_v55 = vpop.f32.mrb[110].mxu0  ;;  %v3190_v57 = vpop.f32.mrb[110].mxu1 }
 0x1d8   : > { %v4968_v58 = vpop.f32.mrb[111].mxu0  ;;  %v4974_v54 = vpop.f32.mrb[111].mxu1 }
 0x1dd   : > { %v3271_v60 = vpop.f32.mrb[112].mxu0  ;;  %v3326_v0 = vpop.f32.mrb[112].mxu1 }
 0x1de   : > { %v3662_v61 = vadd.f32 %v3271_v60, %v3193_v62  ;;  %v4979_v18 = vpop.f32.mrb[113].mxu0  ;;  %v3663_v1 = vadd.f32 %v3326_v0, %v3194_v23  ;;  %v4985_v56 = vpop.f32.mrb[113].mxu1 }
 0x1df   : > { %v3274_v2 = vpop.f32.mrb[114].mxu0  ;;  %v3329_v3 = vpop.f32.mrb[114].mxu1  ;;  %v4095_v56 = vld [vmem:[#allocation2 + $0x20] sm:$0xff] }
 0x1e0   : > { %v4980_v4 = vpop.f32.mrb[115].mxu0  ;;  %v4986_v59 = vpop.f32.mrb[115].mxu1 }
 0x1e1   : > { %v4096_v4 = vld [vmem:[#allocation2 + $0x28] sm:$0xff] }
 0x1e5   : > { %v3381_v42 = vpop.f32.mrb[116].mxu0  ;;  %v3436_v44 = vpop.f32.mrb[116].mxu1 }
 0x1e6   : > { %v3664_v5 = vadd.f32 %v3381_v42, %v3195_v30  ;;  %v4991_v7 = vpop.f32.mrb[117].mxu0  ;;  %v3665_v8 = vadd.f32 %v3436_v44, %v3196_v32  ;;  %v4997_v9 = vpop.f32.mrb[117].mxu1 }
 0x1e7   : > { %v3384_v11 = vpop.f32.mrb[118].mxu0  ;;  %v3439_v12 = vpop.f32.mrb[118].mxu1 }
 0x1e8   : > { %v4992_v13 = vpop.f32.mrb[119].mxu0  ;;  %v4998_v14 = vpop.f32.mrb[119].mxu1 }
 0x1e9   : > { %v4097_v14 = vld [vmem:[#allocation2 + $0x30] sm:$0xff] }
 0x1ed   : > { %v3491_v6 = vpop.f32.mrb[120].mxu0  ;;  %v3546_v19 = vpop.f32.mrb[120].mxu1 }
 0x1ee   : > { %v3666_v15 = vadd.f32 %v3491_v6, %v3197_v40  ;;  %v5003_v20 = vpop.f32.mrb[121].mxu0  ;;  %v3667_v10 = vadd.f32 %v3546_v19, %v3198_v43  ;;  %v5009_v62 = vpop.f32.mrb[121].mxu1 }
 0x1ef   : > { %v3494_v63 = vpop.f32.mrb[122].mxu0  ;;  %v3549_v22 = vpop.f32.mrb[122].mxu1 }
 0x1f0   : > { %v5004_v23 = vpop.f32.mrb[123].mxu0  ;;  %v5010_v24 = vpop.f32.mrb[123].mxu1 }
 0x1f5   : > { %v3601_v26 = vpop.f32.mrb[124].mxu0  ;;  %v3656_v21 = vpop.f32.mrb[124].mxu1 }
 0x1f6   : > { %v3668_v27 = vadd.f32 %v3601_v26, %v3199_v49  ;;  %v5015_v28 = vpop.f32.mrb[125].mxu0  ;;  %v3669_v29 = vadd.f32 %v3656_v21, %v3200_v52  ;;  %v5021_v30 = vpop.f32.mrb[125].mxu1  ;;  %v4093_v49 = vld [vmem:[#allocation2 + $0x10] sm:$0xff]  ;;  %v4094_v52 = vld [vmem:[#allocation2 + $0x18] sm:$0xff] }
 0x1f7   : > { %v3604_v25 = vpop.f32.mrb[126].mxu0  ;;  %v3659_v31 = vpop.f32.mrb[126].mxu1 }
 0x1f8   : > { %v5016_v32 = vpop.f32.mrb[127].mxu0  ;;  %v5022_v16 = vpop.f32.mrb[127].mxu1 }
 0x1fd   : > { %v3734_v17 = vpop.f32.mrb[128].mxu0  ;;  %v3783_v33 = vpop.f32.mrb[128].mxu1 }
 0x1fe   : > { %v4083_v37 = vadd.f32 %v3734_v17, %v3662_v61  ;;  %v5027_v40 = vpop.f32.mrb[129].mxu0  ;;  %v4084_v39 = vadd.f32 %v3783_v33, %v3663_v1  ;;  %v5033_v41 = vpop.f32.mrb[129].mxu1 }
 0x1ff   : > { %v3737_v43 = vpop.f32.mrb[130].mxu0  ;;  %v3786_v46 = vpop.f32.mrb[130].mxu1 }
 0x200   : > { %v4099_v45 = vadd.f32 %v4091_v34, %v4083_v37  ;;  %v5028_v47 = vpop.f32.mrb[131].mxu0  ;;  %v4100_v48 = vadd.f32 %v4092_v38, %v4084_v39  ;;  %v5034_v35 = vpop.f32.mrb[131].mxu1 }
 0x202   : > { %4107 = vst.msk [vmem:[#allocation2] sm:$0xff] %vm378_vm3, %v4099_v45  ;;  %4108 = vst.msk [vmem:[#allocation2 + $0x8] sm:$0xff] %vm378_vm3, %v4100_v48 }
 0x205   : > { %v3832_v36 = vpop.f32.mrb[132].mxu0  ;;  %v3881_v51 = vpop.f32.mrb[132].mxu1 }
 0x206   : > { %v4085_v50 = vadd.f32 %v3832_v36, %v3664_v5  ;;  %v5039_v53 = vpop.f32.mrb[133].mxu0  ;;  %v4086_v55 = vadd.f32 %v3881_v51, %v3665_v8  ;;  %v5045_v57 = vpop.f32.mrb[133].mxu1 }
 0x207   : > { %v3835_v58 = vpop.f32.mrb[134].mxu0  ;;  %v3884_v60 = vpop.f32.mrb[134].mxu1 }
 0x208   : > { %v4101_v54 = vadd.f32 %v4093_v49, %v4085_v50  ;;  %v5040_v61 = vpop.f32.mrb[135].mxu0  ;;  %v4102_v0 = vadd.f32 %v4094_v52, %v4086_v55  ;;  %v5046_v18 = vpop.f32.mrb[135].mxu1 }
 0x209   : > { %v4119_v28 = vld [vmem:[#allocation2] sm:$0xff] (!%p4492_p11) }
 0x20a   : > { %4109 = vst.msk [vmem:[#allocation2 + $0x10] sm:$0xff] %vm378_vm3, %v4101_v54  ;;  %4110 = vst.msk [vmem:[#allocation2 + $0x18] sm:$0xff] %vm378_vm3, %v4102_v0 }
 0x20b   : > { %4127 = vst.msk [vmem:[%s5331_s6] sm:$0xff] (!%p4492_p11), %vm378_vm3, %v4119_v28 }
 0x20d   : > { %v3930_v1 = vpop.f32.mrb[136].mxu0  ;;  %v3979_v3 = vpop.f32.mrb[136].mxu1 }
 0x20e   : > { %v4087_v2 = vadd.f32 %v3930_v1, %v3666_v15  ;;  %v5051_v59 = vpop.f32.mrb[137].mxu0  ;;  %v4088_v42 = vadd.f32 %v3979_v3, %v3667_v10  ;;  %v5057_v5 = vpop.f32.mrb[137].mxu1  ;;  %v4098_v15 = vld [vmem:[#allocation2 + $0x38] sm:$0xff] }
 0x20f   : > { %v3933_v44 = vpop.f32.mrb[138].mxu0  ;;  %v3982_v8 = vpop.f32.mrb[138].mxu1 }
 0x210   : > { %v4103_v7 = vadd.f32 %v4095_v56, %v4087_v2  ;;  %v5052_v9 = vpop.f32.mrb[139].mxu0  ;;  %v4104_v11 = vadd.f32 %v4096_v4, %v4088_v42  ;;  %v5058_v12 = vpop.f32.mrb[139].mxu1 }
 0x211   : > { %v4122_v30 = vld [vmem:[#allocation2 + $0x18] sm:$0xff] (!%p4492_p11) }
 0x212   : > { %4111 = vst.msk [vmem:[#allocation2 + $0x20] sm:$0xff] %vm378_vm3, %v4103_v7  ;;  %4112 = vst.msk [vmem:[#allocation2 + $0x28] sm:$0xff] %vm378_vm3, %v4104_v11 }
 0x213   : > { %4130 = vst.msk [vmem:[%s5331_s6 + $0x18] sm:$0xff] (!%p4492_p11), %vm378_vm3, %v4122_v30 }
 0x214   : > { %4118 = sbr.rel (%p4492_p11) target bundleno = 547 (0x223), region = 44 }
 0x215   : > { %v4028_v13 = vpop.f32.mrb[140].mxu0  ;;  %v4077_v19 = vpop.f32.mrb[140].mxu1 }
 0x216   : > { %v4089_v6 = vadd.f32 %v4028_v13, %v3668_v27  ;;  %v5063_v20 = vpop.f32.mrb[141].mxu0  ;;  %v4090_v62 = vadd.f32 %v4077_v19, %v3669_v29  ;;  %v5069_v63 = vpop.f32.mrb[141].mxu1  ;;  %v4120_v27 = vld [vmem:[#allocation2 + $0x8] sm:$0xff] (!%p4492_p11)  ;;  %v4121_v29 = vld [vmem:[#allocation2 + $0x10] sm:$0xff] (!%p4492_p11) }
 0x217   : > { %v4031_v10 = vpop.f32.mrb[142].mxu0  ;;  %v4080_v23 = vpop.f32.mrb[142].mxu1  ;;  %4128 = vst.msk [vmem:[%s5331_s6 + $0x8] sm:$0xff] (!%p4492_p11), %vm378_vm3, %v4120_v27  ;;  %4129 = vst.msk [vmem:[%s5331_s6 + $0x10] sm:$0xff] (!%p4492_p11), %vm378_vm3, %v4121_v29 }
 0x218   : > { %v4105_v22 = vadd.f32 %v4097_v14, %v4089_v6  ;;  %v5064_v24 = vpop.f32.mrb[143].mxu0  ;;  %v4106_v26 = vadd.f32 %v4098_v15, %v4090_v62  ;;  %v5070_v21 = vpop.f32.mrb[143].mxu1 }
 0x219   : > { %v4123_v25 = vld [vmem:[#allocation2 + $0x20] sm:$0xff] (!%p4492_p11)  ;;  %v4124_v31 = vld [vmem:[#allocation2 + $0x28] sm:$0xff] (!%p4492_p11) }
 0x21a   : > { %4113 = vst.msk [vmem:[#allocation2 + $0x30] sm:$0xff] %vm378_vm3, %v4105_v22  ;;  %4114 = vst.msk [vmem:[#allocation2 + $0x38] sm:$0xff] %vm378_vm3, %v4106_v26 }
 0x21b   : > { %4131 = vst.msk [vmem:[%s5331_s6 + $0x20] sm:$0xff] %vm378_vm3, %v4123_v25  ;;  %4132 = vst.msk [vmem:[%s5331_s6 + $0x28] sm:$0xff] %vm378_vm3, %v4124_v31 }
 0x221   : > { %v4125_v32 = vld [vmem:[#allocation2 + $0x30] sm:$0xff]  ;;  %v4126_v16 = vld [vmem:[#allocation2 + $0x38] sm:$0xff] }
 0x222   : > { %4133 = vst.msk [vmem:[%s5331_s6 + $0x30] sm:$0xff] %vm378_vm3, %v4125_v32  ;;  %4134 = vst.msk [vmem:[%s5331_s6 + $0x38] sm:$0xff] %vm378_vm3, %v4126_v16 }
 0x223 PF: > { %s14_s21 = sadd.s32 1, %s5234_s21   ;;  %s5847_s24 = sld [smem:[#allocation3_spill]] }
 0x224   : > { %p11_p12 = scmp.ge.s32.totalorder %s14_s21, 50   ;;  %s5848_s15 = smov %s5222_s18 }
 0x225   : > { %s5849_s16 = smov %s5226_s19  ;;  %s5850_s17 = smov %s5230_s20 }
 0x226   : > { %s5851_s18 = smov %s5855_s22  ;;  %s5852_s19 = smov %s5859_s23 }
 0x227   :  { %13 = sbr.rel (!%p11_p12) target bundleno = 4 (0x4), region = 90 }
 0x229   : > { %s5853_s20 = smov %s5847_s24 }

</bundles_post_ra>
